<compile_context>
chip_gen: v7x
topology: tpu7x:2x2x1
jax: 0.10.0
libtpu: 0.0.40
codegen_flags: <defaults>
</compile_context>

<pallas_src>
import functools

import numpy as np
import jax
import jax.numpy as jnp
from jax import lax
from jax.experimental import pallas as pl
from jax.experimental.pallas import tpu as pltpu


def _pick_lane_batch(n: int) -> int:
    """Largest B <= 8 dividing n that still leaves >= 2 grid steps (keeps both TCs busy)."""
    best = 1
    for b in range(1, 9):
        if n % b == 0 and (n // b >= 2 or n == 1):
            best = b
    return best


def _build_masks(H, W, B):
    """Row/col border masks for spatial offsets -4..4, in per-image local coordinates.

    rowmask[o+4, p] = 1 iff 0 <= (p % (H*W)) // W + o < H
    colmask[o+4, p] = 1 iff 0 <=  p % W            + o < W
    Local coordinates make the circular lane-roll wrap (across image boundaries of the
    lane-batched block and across the array end) behave exactly like zero "same" padding.
    """
    HW = H * W
    p = np.arange(B * HW)
    h = (p % HW) // W
    w = p % W
    offs = np.arange(-4, 5)[:, None]
    row = ((h[None, :] + offs >= 0) & (h[None, :] + offs < H)).astype(np.float32)
    col = ((w[None, :] + offs >= 0) & (w[None, :] + offs < W)).astype(np.float32)
    return row, col


def _arcnn_kernel(sc_ref, x_ref, rmask_ref, cmask_ref,
                  w1_ref, b1_ref, w2_ref, b2_ref, w3_ref, b3_ref, w4_ref,
                  o_ref, v_ref, panel_ref, x1v_ref, x3v_ref, *, W, HWT):
    """Fused ARCNN forward for one lane-batched block of images.

    Activations are (C, HWT): channels on sublanes, B images * H * W flattened on lanes.
    sc_ref (SMEM scalar prefetch) holds [prelu1, prelu2, prelu3, bias4].
    """
    f32, bf16 = jnp.float32, jnp.bfloat16

    def lshift(v, s):
        # shifted[..., p] == v[..., (p + s) % HWT].
        # pltpu.roll follows jnp.roll semantics (roll(v, k)[p] == v[p - k]), so the roll
        # amount for a forward shift by s is (-s) mod HWT.
        a = (-s) % HWT
        return pltpu.roll(v, a, axis=1) if a else v

    def prelu(y, a):
        return jnp.where(y >= 0.0, y, a * y)

    def rmask(i):
        return rmask_ref[pl.ds(i, 1), :]        # (1, HWT) f32, offset i-4 row mask

    def cmask(i):
        return cmask_ref[pl.ds(i, 1), :]        # (1, HWT) f32, offset i-4 col mask

    # ---------- layer 1: 9x9, 1 -> 64, pad 4 (im2col panel + one MXU matmul) ----------
    # (a) 9 vertically shifted, row-masked copies of the single input row.
    x0 = x_ref[0]                                # (1, HWT) f32
    v_ref[...] = jnp.zeros_like(v_ref)           # rows 9..15 stay zero (panel pad rows)
    for dy in range(9):
        v_ref[pl.ds(dy, 1), :] = rmask(dy) * lshift(x0, (dy - 4) * W)
    # (b) 9 horizontal block-rolls of the whole 16-row group -> dense bf16 im2col panel.
    v = v_ref[...]                               # (16, HWT) f32
    for dx in range(9):
        panel_ref[pl.ds(dx * 16, 16), :] = (cmask(dx) * lshift(v, dx - 4)).astype(bf16)
    y1 = jnp.dot(w1_ref[...], panel_ref[...], preferred_element_type=f32)   # (64, HWT)
    x1 = prelu(y1 + b1_ref[...], sc_ref[0])

    # ---------- layer 2: 7x7, 64 -> 32, pad 3 (vertical shifts on the K axis, ----------
    # ----------           horizontal shifts applied to the 32-row matmul output) -------
    for dy in range(7):
        x1v_ref[pl.ds(dy * 64, 64), :] = (
            rmask(dy + 1) * lshift(x1, (dy - 3) * W)).astype(bf16)
    y2 = jnp.dot(w2_ref[...], x1v_ref[...], preferred_element_type=f32)     # (224, HWT)
    acc2 = None
    for dx in range(7):
        t = cmask(dx + 1) * lshift(y2[dx * 32:(dx + 1) * 32, :], dx - 3)
        acc2 = t if acc2 is None else acc2 + t
    x2 = prelu(acc2 + b2_ref[...], sc_ref[1])

    # ---------- layer 3: 1x1, 32 -> 16 (single MXU matmul) ----------
    y3 = jnp.dot(w3_ref[...], x2.astype(bf16), preferred_element_type=f32)  # (16, HWT)
    x3 = prelu(y3 + b3_ref[...], sc_ref[2])

    # ---------- layer 4: 5x5, 16 -> 1, pad 2, no PReLU (same decomposition) ----------
    for dy in range(5):
        x3v_ref[pl.ds(dy * 16, 16), :] = (
            rmask(dy + 2) * lshift(x3, (dy - 2) * W)).astype(bf16)
    t4 = jnp.dot(w4_ref[...], x3v_ref[...], preferred_element_type=f32)     # (8, HWT), rows 5..7 zero
    out = None
    for dx in range(5):
        t = cmask(dx + 2) * lshift(t4[dx:dx + 1, :], dx - 2)
        out = t if out is None else out + t
    o_ref[0] = (out + sc_ref[3]).astype(o_ref.dtype)                        # (1, HWT) lane-dense


def arcnn_forward(x_nchw, p, lane_batch=None):
    """ARCNN forward. x_nchw: (N, 1, H, W) float32 -> (N, 1, H, W) float32."""
    N, C, H, W = x_nchw.shape
    assert C == 1, "ARCNN takes single-channel input"
    HW = H * W
    B = _pick_lane_batch(N) if lane_batch is None else lane_batch
    assert N % B == 0
    G = N // B
    HWT = B * HW
    x = x_nchw.reshape(G, 1, HWT).astype(jnp.float32)      # free reshape, lane-dense blocks

    row_np, col_np = _build_masks(H, W, B)
    rmask = jnp.asarray(row_np)                            # (9, HWT) f32
    cmask = jnp.asarray(col_np)                            # (9, HWT) f32

    bf16 = jnp.bfloat16
    # layer 1: columns ordered dx-major / dy-minor, dy padded 9 -> 16 (matches panel layout).
    w1m = jnp.transpose(p["w1"][:, :, 0, :], (2, 1, 0))                    # (64, dx=9, dy=9)
    w1p = jnp.pad(w1m, ((0, 0), (0, 0), (0, 7))).reshape(64, 9 * 16).astype(bf16)
    # layer 2: rows = (dx, cout), cols = (dy, cin)  -> (224, 448) lane-dense bf16.
    w2s = jnp.transpose(p["w2"], (1, 3, 0, 2)).reshape(7 * 32, 7 * 64).astype(bf16)
    # layer 3: (16, 32)
    w3s = p["w3"][0, 0].T.astype(bf16)
    # layer 4: rows = dx (padded 5 -> 8), cols = (dy, cin) -> (8, 80)
    w4s = jnp.transpose(p["w4"][:, :, :, 0], (1, 0, 2)).reshape(5, 5 * 16)
    w4s = jnp.pad(w4s, ((0, 3), (0, 0))).astype(bf16)

    b1 = p["b1"].reshape(64, 1).astype(jnp.float32)
    b2 = p["b2"].reshape(32, 1).astype(jnp.float32)
    b3 = p["b3"].reshape(16, 1).astype(jnp.float32)
    scalars = jnp.stack([p["a1"], p["a2"], p["a3"], p["b4"][0]]).astype(jnp.float32)

    kernel = functools.partial(_arcnn_kernel, W=W, HWT=HWT)

    out = pl.pallas_call(
        kernel,
        out_shape=jax.ShapeDtypeStruct((G, 1, HWT), jnp.float32),
        grid_spec=pltpu.PrefetchScalarGridSpec(
            num_scalar_prefetch=1,                         # `scalars` -> SMEM
            grid=(G,),
            in_specs=[
                pl.BlockSpec((1, 1, HWT), lambda g, sc: (g, 0, 0)),   # x block (B images)
                pl.BlockSpec(rmask.shape, lambda g, sc: (0, 0)),      # row masks (9, HWT)
                pl.BlockSpec(cmask.shape, lambda g, sc: (0, 0)),      # col masks (9, HWT)
                pl.BlockSpec(w1p.shape, lambda g, sc: (0, 0)),        # (64, 144) bf16
                pl.BlockSpec(b1.shape, lambda g, sc: (0, 0)),         # (64, 1)
                pl.BlockSpec(w2s.shape, lambda g, sc: (0, 0)),        # (224, 448) bf16
                pl.BlockSpec(b2.shape, lambda g, sc: (0, 0)),         # (32, 1)
                pl.BlockSpec(w3s.shape, lambda g, sc: (0, 0)),        # (16, 32) bf16
                pl.BlockSpec(b3.shape, lambda g, sc: (0, 0)),         # (16, 1)
                pl.BlockSpec(w4s.shape, lambda g, sc: (0, 0)),        # (8, 80) bf16
            ],
            out_specs=pl.BlockSpec((1, 1, HWT), lambda g, sc: (g, 0, 0)),
            scratch_shapes=[
                pltpu.VMEM((16, HWT), jnp.float32),       # layer-1 vertical-shift rows
                pltpu.VMEM((9 * 16, HWT), jnp.bfloat16),  # layer-1 im2col panel
                pltpu.VMEM((7 * 64, HWT), jnp.bfloat16),  # layer-2 vertically shifted stack
                pltpu.VMEM((5 * 16, HWT), jnp.bfloat16),  # layer-4 vertically shifted stack
            ],
        ),
        compiler_params=pltpu.CompilerParams(
            dimension_semantics=("parallel",),             # shard batch-of-blocks across TCs
            vmem_limit_bytes=32 * 1024 * 1024,
        ),
    )(scalars, x, rmask, cmask, w1p, b1, w2s, b2, w3s, b3, w4s)
    return out.reshape(N, 1, H, W)


def init_params(key):
    """Deterministic synthetic init matching ARCNN's parameter shapes (HWIO conv weights)."""
    def conv_w(k, cout, cin, ksz, std):
        return std * jax.random.normal(k, (ksz, ksz, cin, cout), jnp.float32)

    k1, k2, k3, k4 = jax.random.split(key, 4)
    return {
        "w1": conv_w(k1, 64, 1, 9, (2.0 / (64 * 9 * 9)) ** 0.5),
        "b1": jnp.zeros((64,), jnp.float32), "a1": jnp.float32(0.25),
        "w2": conv_w(k2, 32, 64, 7, (2.0 / (32 * 7 * 7)) ** 0.5),
        "b2": jnp.zeros((32,), jnp.float32), "a2": jnp.float32(0.25),
        "w3": conv_w(k3, 16, 32, 1, (2.0 / (16 * 1 * 1)) ** 0.5),
        "b3": jnp.zeros((16,), jnp.float32), "a3": jnp.float32(0.25),
        "w4": conv_w(k4, 1, 16, 5, 0.001),
        "b4": jnp.zeros((1,), jnp.float32),
    }


# ----------------------- pure-JAX reference (for sanity check) -----------------------
def _ref_conv(x_nhwc, w_hwio, b, pad):
    y = lax.conv_general_dilated(
        x_nhwc, w_hwio, window_strides=(1, 1),
        padding=[(pad, pad), (pad, pad)],
        dimension_numbers=("NHWC", "HWIO", "NHWC"))
    return y + b.reshape(1, 1, 1, -1)


def _prelu_ref(y, a):
    return jnp.where(y >= 0.0, y, a * y)


def arcnn_reference(x_nchw, p):
    x = jnp.transpose(x_nchw, (0, 2, 3, 1))
    x = _prelu_ref(_ref_conv(x, p["w1"], p["b1"], 4), p["a1"])
    x = _prelu_ref(_ref_conv(x, p["w2"], p["b2"], 3), p["a2"])
    x = _prelu_ref(_ref_conv(x, p["w3"], p["b3"], 0), p["a3"])
    x = _ref_conv(x, p["w4"], p["b4"], 2)
    return jnp.transpose(x, (0, 3, 1, 2))


if __name__ == "__main__":
    key = jax.random.PRNGKey(0)
    kx, kp = jax.random.split(key)
    params = init_params(kp)

    # Primary check: batch=2 (lane batch B=1, grid of 2).
    x = jax.random.normal(kx, (2, 1, 16, 16), jnp.float32)     # NCHW like PyTorch
    out = jax.block_until_ready(arcnn_forward(x, params))
    assert out.shape == (2, 1, 16, 16), out.shape
    ref = jax.block_until_ready(arcnn_reference(x, params))
    # bf16 MXU inputs (f32 accumulation) => relaxed tolerance vs the f32 reference.
    assert jnp.allclose(out, ref, atol=5e-3, rtol=5e-2), float(jnp.max(jnp.abs(out - ref)))

    # Secondary check: batch=4 exercises the lane-batched path (B=2 images per grid step).
    x4 = jax.random.normal(kx, (4, 1, 16, 16), jnp.float32)
    out4 = jax.block_until_ready(arcnn_forward(x4, params))
    ref4 = jax.block_until_ready(arcnn_reference(x4, params))
    assert out4.shape == (4, 1, 16, 16), out4.shape
    assert jnp.allclose(out4, ref4, atol=5e-3, rtol=5e-2), float(jnp.max(jnp.abs(out4 - ref4)))

    print("KERNEL_OK")
</pallas_src>

<mosaic_0001>
module attributes {stable_mosaic.version = 11 : i64} {
  func.func @_arcnn_kernel(%arg0: i32, %arg1: memref<4xf32, #tpu.memory_space<smem>>, %arg2: memref<1x1x256xf32, #tpu.memory_space<vmem>>, %arg3: memref<9x256xf32, #tpu.memory_space<vmem>>, %arg4: memref<9x256xf32, #tpu.memory_space<vmem>>, %arg5: memref<64x144xbf16, #tpu.memory_space<vmem>>, %arg6: memref<64x1xf32, #tpu.memory_space<vmem>>, %arg7: memref<224x448xbf16, #tpu.memory_space<vmem>>, %arg8: memref<32x1xf32, #tpu.memory_space<vmem>>, %arg9: memref<16x32xbf16, #tpu.memory_space<vmem>>, %arg10: memref<16x1xf32, #tpu.memory_space<vmem>>, %arg11: memref<8x80xbf16, #tpu.memory_space<vmem>>, %arg12: memref<1x1x256xf32, #tpu.memory_space<vmem>>, %arg13: memref<16x256xf32, #tpu.memory_space<vmem>>, %arg14: memref<144x256xbf16, #tpu.memory_space<vmem>>, %arg15: memref<448x256xbf16, #tpu.memory_space<vmem>>, %arg16: memref<80x256xbf16, #tpu.memory_space<vmem>>) attributes {dimension_semantics = [#tpu.dimension_semantics<parallel>], iteration_bounds = array<i64: 2>, scalar_prefetch = 1 : i64, scratch_operands = 4 : i64, tpu.core_type = #tpu.core_type<tc>, window_params = [{transform_indices = @transform_0, window_bounds = array<i64: 1, 1, 256>}, {pipeline_mode = #tpu.pipeline_mode<synchronous>, transform_indices = @transform_1, window_bounds = array<i64: 9, 256>}, {pipeline_mode = #tpu.pipeline_mode<synchronous>, transform_indices = @transform_2, window_bounds = array<i64: 9, 256>}, {pipeline_mode = #tpu.pipeline_mode<synchronous>, transform_indices = @transform_3, window_bounds = array<i64: 64, 144>}, {pipeline_mode = #tpu.pipeline_mode<synchronous>, transform_indices = @transform_4, window_bounds = array<i64: 64, 1>}, {pipeline_mode = #tpu.pipeline_mode<synchronous>, transform_indices = @transform_5, window_bounds = array<i64: 224, 448>}, {pipeline_mode = #tpu.pipeline_mode<synchronous>, transform_indices = @transform_6, window_bounds = array<i64: 32, 1>}, {pipeline_mode = #tpu.pipeline_mode<synchronous>, transform_indices = @transform_7, window_bounds = array<i64: 16, 32>}, {pipeline_mode = #tpu.pipeline_mode<synchronous>, transform_indices = @transform_8, window_bounds = array<i64: 16, 1>}, {pipeline_mode = #tpu.pipeline_mode<synchronous>, transform_indices = @transform_9, window_bounds = array<i64: 8, 80>}, {transform_indices = @transform_10, window_bounds = array<i64: 1, 1, 256>}]} {
    %c0 = arith.constant 0 : index
    %c0_0 = arith.constant 0 : index
    %c0_1 = arith.constant 0 : index
    %0 = vector.load %arg2[%c0, %c0_0, %c0_1] : memref<1x1x256xf32, #tpu.memory_space<vmem>>, vector<1x1x256xf32>
    %1 = vector.shape_cast %0 : vector<1x1x256xf32> to vector<1x256xf32>
    %cst = arith.constant 0.000000e+00 : f32
    %2 = vector.broadcast %cst : f32 to vector<16x256xf32>
    %c0_2 = arith.constant 0 : index
    %c0_3 = arith.constant 0 : index
    %3 = vector.load %arg13[%c0_2, %c0_3] : memref<16x256xf32, #tpu.memory_space<vmem>>, vector<16x256xf32>
    tpu.vector_store %arg13[%c0_2, %c0_3], %2 {strides = array<i32>} : memref<16x256xf32, #tpu.memory_space<vmem>>, vector<16x256xf32>,
    %c0_4 = arith.constant 0 : index
    %c0_5 = arith.constant 0 : index
    %4 = vector.load %arg3[%c0_4, %c0_5] : memref<9x256xf32, #tpu.memory_space<vmem>>, vector<1x256xf32>
    %c64_i32 = arith.constant 64 : i32
    %5 = tpu.dynamic_rotate %1 by %c64_i32 dim 1 : vector<1x256xf32>, i32 -> vector<1x256xf32>
    %6 = arith.mulf %4, %5 : vector<1x256xf32>
    %c0_6 = arith.constant 0 : index
    %c0_7 = arith.constant 0 : index
    %7 = vector.load %arg13[%c0_6, %c0_7] : memref<16x256xf32, #tpu.memory_space<vmem>>, vector<1x256xf32>
    tpu.vector_store %arg13[%c0_6, %c0_7], %6 {strides = array<i32>} : memref<16x256xf32, #tpu.memory_space<vmem>>, vector<1x256xf32>,
    %c1 = arith.constant 1 : index
    %c0_8 = arith.constant 0 : index
    %8 = vector.load %arg3[%c1, %c0_8] : memref<9x256xf32, #tpu.memory_space<vmem>>, vector<1x256xf32>
    %c48_i32 = arith.constant 48 : i32
    %9 = tpu.dynamic_rotate %1 by %c48_i32 dim 1 : vector<1x256xf32>, i32 -> vector<1x256xf32>
    %10 = arith.mulf %8, %9 : vector<1x256xf32>
    %c1_9 = arith.constant 1 : index
    %c0_10 = arith.constant 0 : index
    %11 = vector.load %arg13[%c1_9, %c0_10] : memref<16x256xf32, #tpu.memory_space<vmem>>, vector<1x256xf32>
    tpu.vector_store %arg13[%c1_9, %c0_10], %10 {strides = array<i32>} : memref<16x256xf32, #tpu.memory_space<vmem>>, vector<1x256xf32>,
    %c2 = arith.constant 2 : index
    %c0_11 = arith.constant 0 : index
    %12 = vector.load %arg3[%c2, %c0_11] : memref<9x256xf32, #tpu.memory_space<vmem>>, vector<1x256xf32>
    %c32_i32 = arith.constant 32 : i32
    %13 = tpu.dynamic_rotate %1 by %c32_i32 dim 1 : vector<1x256xf32>, i32 -> vector<1x256xf32>
    %14 = arith.mulf %12, %13 : vector<1x256xf32>
    %c2_12 = arith.constant 2 : index
    %c0_13 = arith.constant 0 : index
    %15 = vector.load %arg13[%c2_12, %c0_13] : memref<16x256xf32, #tpu.memory_space<vmem>>, vector<1x256xf32>
    tpu.vector_store %arg13[%c2_12, %c0_13], %14 {strides = array<i32>} : memref<16x256xf32, #tpu.memory_space<vmem>>, vector<1x256xf32>,
    %c3 = arith.constant 3 : index
    %c0_14 = arith.constant 0 : index
    %16 = vector.load %arg3[%c3, %c0_14] : memref<9x256xf32, #tpu.memory_space<vmem>>, vector<1x256xf32>
    %c16_i32 = arith.constant 16 : i32
    %17 = tpu.dynamic_rotate %1 by %c16_i32 dim 1 : vector<1x256xf32>, i32 -> vector<1x256xf32>
    %18 = arith.mulf %16, %17 : vector<1x256xf32>
    %c3_15 = arith.constant 3 : index
    %c0_16 = arith.constant 0 : index
    %19 = vector.load %arg13[%c3_15, %c0_16] : memref<16x256xf32, #tpu.memory_space<vmem>>, vector<1x256xf32>
    tpu.vector_store %arg13[%c3_15, %c0_16], %18 {strides = array<i32>} : memref<16x256xf32, #tpu.memory_space<vmem>>, vector<1x256xf32>,
    %c4 = arith.constant 4 : index
    %c0_17 = arith.constant 0 : index
    %20 = vector.load %arg3[%c4, %c0_17] : memref<9x256xf32, #tpu.memory_space<vmem>>, vector<1x256xf32>
    %21 = arith.mulf %20, %1 : vector<1x256xf32>
    %c4_18 = arith.constant 4 : index
    %c0_19 = arith.constant 0 : index
    %22 = vector.load %arg13[%c4_18, %c0_19] : memref<16x256xf32, #tpu.memory_space<vmem>>, vector<1x256xf32>
    tpu.vector_store %arg13[%c4_18, %c0_19], %21 {strides = array<i32>} : memref<16x256xf32, #tpu.memory_space<vmem>>, vector<1x256xf32>,
    %c5 = arith.constant 5 : index
    %c0_20 = arith.constant 0 : index
    %23 = vector.load %arg3[%c5, %c0_20] : memref<9x256xf32, #tpu.memory_space<vmem>>, vector<1x256xf32>
    %c240_i32 = arith.constant 240 : i32
    %24 = tpu.dynamic_rotate %1 by %c240_i32 dim 1 : vector<1x256xf32>, i32 -> vector<1x256xf32>
    %25 = arith.mulf %23, %24 : vector<1x256xf32>
    %c5_21 = arith.constant 5 : index
    %c0_22 = arith.constant 0 : index
    %26 = vector.load %arg13[%c5_21, %c0_22] : memref<16x256xf32, #tpu.memory_space<vmem>>, vector<1x256xf32>
    tpu.vector_store %arg13[%c5_21, %c0_22], %25 {strides = array<i32>} : memref<16x256xf32, #tpu.memory_space<vmem>>, vector<1x256xf32>,
    %c6 = arith.constant 6 : index
    %c0_23 = arith.constant 0 : index
    %27 = vector.load %arg3[%c6, %c0_23] : memref<9x256xf32, #tpu.memory_space<vmem>>, vector<1x256xf32>
    %c224_i32 = arith.constant 224 : i32
    %28 = tpu.dynamic_rotate %1 by %c224_i32 dim 1 : vector<1x256xf32>, i32 -> vector<1x256xf32>
    %29 = arith.mulf %27, %28 : vector<1x256xf32>
    %c6_24 = arith.constant 6 : index
    %c0_25 = arith.constant 0 : index
    %30 = vector.load %arg13[%c6_24, %c0_25] : memref<16x256xf32, #tpu.memory_space<vmem>>, vector<1x256xf32>
    tpu.vector_store %arg13[%c6_24, %c0_25], %29 {strides = array<i32>} : memref<16x256xf32, #tpu.memory_space<vmem>>, vector<1x256xf32>,
    %c7 = arith.constant 7 : index
    %c0_26 = arith.constant 0 : index
    %31 = vector.load %arg3[%c7, %c0_26] : memref<9x256xf32, #tpu.memory_space<vmem>>, vector<1x256xf32>
    %c208_i32 = arith.constant 208 : i32
    %32 = tpu.dynamic_rotate %1 by %c208_i32 dim 1 : vector<1x256xf32>, i32 -> vector<1x256xf32>
    %33 = arith.mulf %31, %32 : vector<1x256xf32>
    %c7_27 = arith.constant 7 : index
    %c0_28 = arith.constant 0 : index
    %34 = vector.load %arg13[%c7_27, %c0_28] : memref<16x256xf32, #tpu.memory_space<vmem>>, vector<1x256xf32>
    tpu.vector_store %arg13[%c7_27, %c0_28], %33 {strides = array<i32>} : memref<16x256xf32, #tpu.memory_space<vmem>>, vector<1x256xf32>,
    %c8 = arith.constant 8 : index
    %c0_29 = arith.constant 0 : index
    %35 = vector.load %arg3[%c8, %c0_29] : memref<9x256xf32, #tpu.memory_space<vmem>>, vector<1x256xf32>
    %c192_i32 = arith.constant 192 : i32
    %36 = tpu.dynamic_rotate %1 by %c192_i32 dim 1 : vector<1x256xf32>, i32 -> vector<1x256xf32>
    %37 = arith.mulf %35, %36 : vector<1x256xf32>
    %c8_30 = arith.constant 8 : index
    %c0_31 = arith.constant 0 : index
    %38 = vector.load %arg13[%c8_30, %c0_31] : memref<16x256xf32, #tpu.memory_space<vmem>>, vector<1x256xf32>
    tpu.vector_store %arg13[%c8_30, %c0_31], %37 {strides = array<i32>} : memref<16x256xf32, #tpu.memory_space<vmem>>, vector<1x256xf32>,
    %c0_32 = arith.constant 0 : index
    %c0_33 = arith.constant 0 : index
    %39 = vector.load %arg13[%c0_32, %c0_33] : memref<16x256xf32, #tpu.memory_space<vmem>>, vector<16x256xf32>
    %c0_34 = arith.constant 0 : index
    %c0_35 = arith.constant 0 : index
    %40 = vector.load %arg4[%c0_34, %c0_35] : memref<9x256xf32, #tpu.memory_space<vmem>>, vector<1x256xf32>
    %c4_i32 = arith.constant 4 : i32
    %41 = tpu.dynamic_rotate %39 by %c4_i32 dim 1 : vector<16x256xf32>, i32 -> vector<16x256xf32>
    %42 = vector.broadcast %40 : vector<1x256xf32> to vector<16x256xf32>
    %43 = arith.mulf %42, %41 : vector<16x256xf32>
    %44 = arith.truncf %43 : vector<16x256xf32> to vector<16x256xbf16>
    %c0_36 = arith.constant 0 : index
    %c0_37 = arith.constant 0 : index
    %45 = vector.load %arg14[%c0_36, %c0_37] : memref<144x256xbf16, #tpu.memory_space<vmem>>, vector<16x256xbf16>
    tpu.vector_store %arg14[%c0_36, %c0_37], %44 {strides = array<i32>} : memref<144x256xbf16, #tpu.memory_space<vmem>>, vector<16x256xbf16>,
    %c1_38 = arith.constant 1 : index
    %c0_39 = arith.constant 0 : index
    %46 = vector.load %arg4[%c1_38, %c0_39] : memref<9x256xf32, #tpu.memory_space<vmem>>, vector<1x256xf32>
    %c3_i32 = arith.constant 3 : i32
    %47 = tpu.dynamic_rotate %39 by %c3_i32 dim 1 : vector<16x256xf32>, i32 -> vector<16x256xf32>
    %48 = vector.broadcast %46 : vector<1x256xf32> to vector<16x256xf32>
    %49 = arith.mulf %48, %47 : vector<16x256xf32>
    %50 = arith.truncf %49 : vector<16x256xf32> to vector<16x256xbf16>
    %c16 = arith.constant 16 : index
    %c0_40 = arith.constant 0 : index
    %51 = vector.load %arg14[%c16, %c0_40] : memref<144x256xbf16, #tpu.memory_space<vmem>>, vector<16x256xbf16>
    tpu.vector_store %arg14[%c16, %c0_40], %50 {strides = array<i32>} : memref<144x256xbf16, #tpu.memory_space<vmem>>, vector<16x256xbf16>,
    %c2_41 = arith.constant 2 : index
    %c0_42 = arith.constant 0 : index
    %52 = vector.load %arg4[%c2_41, %c0_42] : memref<9x256xf32, #tpu.memory_space<vmem>>, vector<1x256xf32>
    %c2_i32 = arith.constant 2 : i32
    %53 = tpu.dynamic_rotate %39 by %c2_i32 dim 1 : vector<16x256xf32>, i32 -> vector<16x256xf32>
    %54 = vector.broadcast %52 : vector<1x256xf32> to vector<16x256xf32>
    %55 = arith.mulf %54, %53 : vector<16x256xf32>
    %56 = arith.truncf %55 : vector<16x256xf32> to vector<16x256xbf16>
    %c32 = arith.constant 32 : index
    %c0_43 = arith.constant 0 : index
    %57 = vector.load %arg14[%c32, %c0_43] : memref<144x256xbf16, #tpu.memory_space<vmem>>, vector<16x256xbf16>
    tpu.vector_store %arg14[%c32, %c0_43], %56 {strides = array<i32>} : memref<144x256xbf16, #tpu.memory_space<vmem>>, vector<16x256xbf16>,
    %c3_44 = arith.constant 3 : index
    %c0_45 = arith.constant 0 : index
    %58 = vector.load %arg4[%c3_44, %c0_45] : memref<9x256xf32, #tpu.memory_space<vmem>>, vector<1x256xf32>
    %c1_i32 = arith.constant 1 : i32
    %59 = tpu.dynamic_rotate %39 by %c1_i32 dim 1 : vector<16x256xf32>, i32 -> vector<16x256xf32>
    %60 = vector.broadcast %58 : vector<1x256xf32> to vector<16x256xf32>
    %61 = arith.mulf %60, %59 : vector<16x256xf32>
    %62 = arith.truncf %61 : vector<16x256xf32> to vector<16x256xbf16>
    %c48 = arith.constant 48 : index
    %c0_46 = arith.constant 0 : index
    %63 = vector.load %arg14[%c48, %c0_46] : memref<144x256xbf16, #tpu.memory_space<vmem>>, vector<16x256xbf16>
    tpu.vector_store %arg14[%c48, %c0_46], %62 {strides = array<i32>} : memref<144x256xbf16, #tpu.memory_space<vmem>>, vector<16x256xbf16>,
    %c4_47 = arith.constant 4 : index
    %c0_48 = arith.constant 0 : index
    %64 = vector.load %arg4[%c4_47, %c0_48] : memref<9x256xf32, #tpu.memory_space<vmem>>, vector<1x256xf32>
    %65 = vector.broadcast %64 : vector<1x256xf32> to vector<16x256xf32>
    %66 = arith.mulf %65, %39 : vector<16x256xf32>
    %67 = arith.truncf %66 : vector<16x256xf32> to vector<16x256xbf16>
    %c64 = arith.constant 64 : index
    %c0_49 = arith.constant 0 : index
    %68 = vector.load %arg14[%c64, %c0_49] : memref<144x256xbf16, #tpu.memory_space<vmem>>, vector<16x256xbf16>
    tpu.vector_store %arg14[%c64, %c0_49], %67 {strides = array<i32>} : memref<144x256xbf16, #tpu.memory_space<vmem>>, vector<16x256xbf16>,
    %c5_50 = arith.constant 5 : index
    %c0_51 = arith.constant 0 : index
    %69 = vector.load %arg4[%c5_50, %c0_51] : memref<9x256xf32, #tpu.memory_space<vmem>>, vector<1x256xf32>
    %c255_i32 = arith.constant 255 : i32
    %70 = tpu.dynamic_rotate %39 by %c255_i32 dim 1 : vector<16x256xf32>, i32 -> vector<16x256xf32>
    %71 = vector.broadcast %69 : vector<1x256xf32> to vector<16x256xf32>
    %72 = arith.mulf %71, %70 : vector<16x256xf32>
    %73 = arith.truncf %72 : vector<16x256xf32> to vector<16x256xbf16>
    %c80 = arith.constant 80 : index
    %c0_52 = arith.constant 0 : index
    %74 = vector.load %arg14[%c80, %c0_52] : memref<144x256xbf16, #tpu.memory_space<vmem>>, vector<16x256xbf16>
    tpu.vector_store %arg14[%c80, %c0_52], %73 {strides = array<i32>} : memref<144x256xbf16, #tpu.memory_space<vmem>>, vector<16x256xbf16>,
    %c6_53 = arith.constant 6 : index
    %c0_54 = arith.constant 0 : index
    %75 = vector.load %arg4[%c6_53, %c0_54] : memref<9x256xf32, #tpu.memory_space<vmem>>, vector<1x256xf32>
    %c254_i32 = arith.constant 254 : i32
    %76 = tpu.dynamic_rotate %39 by %c254_i32 dim 1 : vector<16x256xf32>, i32 -> vector<16x256xf32>
    %77 = vector.broadcast %75 : vector<1x256xf32> to vector<16x256xf32>
    %78 = arith.mulf %77, %76 : vector<16x256xf32>
    %79 = arith.truncf %78 : vector<16x256xf32> to vector<16x256xbf16>
    %c96 = arith.constant 96 : index
    %c0_55 = arith.constant 0 : index
    %80 = vector.load %arg14[%c96, %c0_55] : memref<144x256xbf16, #tpu.memory_space<vmem>>, vector<16x256xbf16>
    tpu.vector_store %arg14[%c96, %c0_55], %79 {strides = array<i32>} : memref<144x256xbf16, #tpu.memory_space<vmem>>, vector<16x256xbf16>,
    %c7_56 = arith.constant 7 : index
    %c0_57 = arith.constant 0 : index
    %81 = vector.load %arg4[%c7_56, %c0_57] : memref<9x256xf32, #tpu.memory_space<vmem>>, vector<1x256xf32>
    %c253_i32 = arith.constant 253 : i32
    %82 = tpu.dynamic_rotate %39 by %c253_i32 dim 1 : vector<16x256xf32>, i32 -> vector<16x256xf32>
    %83 = vector.broadcast %81 : vector<1x256xf32> to vector<16x256xf32>
    %84 = arith.mulf %83, %82 : vector<16x256xf32>
    %85 = arith.truncf %84 : vector<16x256xf32> to vector<16x256xbf16>
    %c112 = arith.constant 112 : index
    %c0_58 = arith.constant 0 : index
    %86 = vector.load %arg14[%c112, %c0_58] : memref<144x256xbf16, #tpu.memory_space<vmem>>, vector<16x256xbf16>
    tpu.vector_store %arg14[%c112, %c0_58], %85 {strides = array<i32>} : memref<144x256xbf16, #tpu.memory_space<vmem>>, vector<16x256xbf16>,
    %c8_59 = arith.constant 8 : index
    %c0_60 = arith.constant 0 : index
    %87 = vector.load %arg4[%c8_59, %c0_60] : memref<9x256xf32, #tpu.memory_space<vmem>>, vector<1x256xf32>
    %c252_i32 = arith.constant 252 : i32
    %88 = tpu.dynamic_rotate %39 by %c252_i32 dim 1 : vector<16x256xf32>, i32 -> vector<16x256xf32>
    %89 = vector.broadcast %87 : vector<1x256xf32> to vector<16x256xf32>
    %90 = arith.mulf %89, %88 : vector<16x256xf32>
    %91 = arith.truncf %90 : vector<16x256xf32> to vector<16x256xbf16>
    %c128 = arith.constant 128 : index
    %c0_61 = arith.constant 0 : index
    %92 = vector.load %arg14[%c128, %c0_61] : memref<144x256xbf16, #tpu.memory_space<vmem>>, vector<16x256xbf16>
    tpu.vector_store %arg14[%c128, %c0_61], %91 {strides = array<i32>} : memref<144x256xbf16, #tpu.memory_space<vmem>>, vector<16x256xbf16>,
    %c0_62 = arith.constant 0 : index
    %c0_63 = arith.constant 0 : index
    %93 = vector.load %arg5[%c0_62, %c0_63] : memref<64x144xbf16, #tpu.memory_space<vmem>>, vector<64x144xbf16>
    %c0_64 = arith.constant 0 : index
    %c0_65 = arith.constant 0 : index
    %94 = vector.load %arg14[%c0_64, %c0_65] : memref<144x256xbf16, #tpu.memory_space<vmem>>, vector<144x256xbf16>
    %cst_66 = arith.constant dense<0.000000e+00> : vector<64x256xf32>
    %95 = tpu.matmul %93, %94, %cst_66 {dimension_numbers = #tpu.dot_dimension_numbers<[1], [0], [0], [1], [0, 0, 1, 1], [], []>} : vector<64x144xbf16>, vector<144x256xbf16>, vector<64x256xf32> -> vector<64x256xf32>
    %c0_67 = arith.constant 0 : index
    %c0_68 = arith.constant 0 : index
    %96 = vector.load %arg6[%c0_67, %c0_68] : memref<64x1xf32, #tpu.memory_space<vmem>>, vector<64x1xf32>
    %97 = vector.broadcast %96 : vector<64x1xf32> to vector<64x256xf32>
    %98 = arith.addf %95, %97 : vector<64x256xf32>
    %c0_69 = arith.constant 0 : index
    %99 = memref.load %arg1[%c0_69] : memref<4xf32, #tpu.memory_space<smem>>
    %cst_70 = arith.constant 0.000000e+00 : f32
    %100 = vector.broadcast %cst_70 : f32 to vector<64x256xf32>
    %101 = arith.cmpf oge, %98, %100 : vector<64x256xf32>
    %102 = vector.broadcast %99 : f32 to vector<64x256xf32>
    %103 = arith.mulf %102, %98 : vector<64x256xf32>
    %104 = arith.select %101, %98, %103 : vector<64x256xi1>, vector<64x256xf32>
    %c1_71 = arith.constant 1 : index
    %c0_72 = arith.constant 0 : index
    %105 = vector.load %arg3[%c1_71, %c0_72] : memref<9x256xf32, #tpu.memory_space<vmem>>, vector<1x256xf32>
    %c48_i32_73 = arith.constant 48 : i32
    %106 = tpu.dynamic_rotate %104 by %c48_i32_73 dim 1 : vector<64x256xf32>, i32 -> vector<64x256xf32>
    %107 = vector.broadcast %105 : vector<1x256xf32> to vector<64x256xf32>
    %108 = arith.mulf %107, %106 : vector<64x256xf32>
    %109 = arith.truncf %108 : vector<64x256xf32> to vector<64x256xbf16>
    %c0_74 = arith.constant 0 : index
    %c0_75 = arith.constant 0 : index
    %110 = vector.load %arg15[%c0_74, %c0_75] : memref<448x256xbf16, #tpu.memory_space<vmem>>, vector<64x256xbf16>
    tpu.vector_store %arg15[%c0_74, %c0_75], %109 {strides = array<i32>} : memref<448x256xbf16, #tpu.memory_space<vmem>>, vector<64x256xbf16>,
    %c2_76 = arith.constant 2 : index
    %c0_77 = arith.constant 0 : index
    %111 = vector.load %arg3[%c2_76, %c0_77] : memref<9x256xf32, #tpu.memory_space<vmem>>, vector<1x256xf32>
    %c32_i32_78 = arith.constant 32 : i32
    %112 = tpu.dynamic_rotate %104 by %c32_i32_78 dim 1 : vector<64x256xf32>, i32 -> vector<64x256xf32>
    %113 = vector.broadcast %111 : vector<1x256xf32> to vector<64x256xf32>
    %114 = arith.mulf %113, %112 : vector<64x256xf32>
    %115 = arith.truncf %114 : vector<64x256xf32> to vector<64x256xbf16>
    %c64_79 = arith.constant 64 : index
    %c0_80 = arith.constant 0 : index
    %116 = vector.load %arg15[%c64_79, %c0_80] : memref<448x256xbf16, #tpu.memory_space<vmem>>, vector<64x256xbf16>
    tpu.vector_store %arg15[%c64_79, %c0_80], %115 {strides = array<i32>} : memref<448x256xbf16, #tpu.memory_space<vmem>>, vector<64x256xbf16>,
    %c3_81 = arith.constant 3 : index
    %c0_82 = arith.constant 0 : index
    %117 = vector.load %arg3[%c3_81, %c0_82] : memref<9x256xf32, #tpu.memory_space<vmem>>, vector<1x256xf32>
    %c16_i32_83 = arith.constant 16 : i32
    %118 = tpu.dynamic_rotate %104 by %c16_i32_83 dim 1 : vector<64x256xf32>, i32 -> vector<64x256xf32>
    %119 = vector.broadcast %117 : vector<1x256xf32> to vector<64x256xf32>
    %120 = arith.mulf %119, %118 : vector<64x256xf32>
    %121 = arith.truncf %120 : vector<64x256xf32> to vector<64x256xbf16>
    %c128_84 = arith.constant 128 : index
    %c0_85 = arith.constant 0 : index
    %122 = vector.load %arg15[%c128_84, %c0_85] : memref<448x256xbf16, #tpu.memory_space<vmem>>, vector<64x256xbf16>
    tpu.vector_store %arg15[%c128_84, %c0_85], %121 {strides = array<i32>} : memref<448x256xbf16, #tpu.memory_space<vmem>>, vector<64x256xbf16>,
    %c4_86 = arith.constant 4 : index
    %c0_87 = arith.constant 0 : index
    %123 = vector.load %arg3[%c4_86, %c0_87] : memref<9x256xf32, #tpu.memory_space<vmem>>, vector<1x256xf32>
    %124 = vector.broadcast %123 : vector<1x256xf32> to vector<64x256xf32>
    %125 = arith.mulf %124, %104 : vector<64x256xf32>
    %126 = arith.truncf %125 : vector<64x256xf32> to vector<64x256xbf16>
    %c192 = arith.constant 192 : index
    %c0_88 = arith.constant 0 : index
    %127 = vector.load %arg15[%c192, %c0_88] : memref<448x256xbf16, #tpu.memory_space<vmem>>, vector<64x256xbf16>
    tpu.vector_store %arg15[%c192, %c0_88], %126 {strides = array<i32>} : memref<448x256xbf16, #tpu.memory_space<vmem>>, vector<64x256xbf16>,
    %c5_89 = arith.constant 5 : index
    %c0_90 = arith.constant 0 : index
    %128 = vector.load %arg3[%c5_89, %c0_90] : memref<9x256xf32, #tpu.memory_space<vmem>>, vector<1x256xf32>
    %c240_i32_91 = arith.constant 240 : i32
    %129 = tpu.dynamic_rotate %104 by %c240_i32_91 dim 1 : vector<64x256xf32>, i32 -> vector<64x256xf32>
    %130 = vector.broadcast %128 : vector<1x256xf32> to vector<64x256xf32>
    %131 = arith.mulf %130, %129 : vector<64x256xf32>
    %132 = arith.truncf %131 : vector<64x256xf32> to vector<64x256xbf16>
    %c256 = arith.constant 256 : index
    %c0_92 = arith.constant 0 : index
    %133 = vector.load %arg15[%c256, %c0_92] : memref<448x256xbf16, #tpu.memory_space<vmem>>, vector<64x256xbf16>
    tpu.vector_store %arg15[%c256, %c0_92], %132 {strides = array<i32>} : memref<448x256xbf16, #tpu.memory_space<vmem>>, vector<64x256xbf16>,
    %c6_93 = arith.constant 6 : index
    %c0_94 = arith.constant 0 : index
    %134 = vector.load %arg3[%c6_93, %c0_94] : memref<9x256xf32, #tpu.memory_space<vmem>>, vector<1x256xf32>
    %c224_i32_95 = arith.constant 224 : i32
    %135 = tpu.dynamic_rotate %104 by %c224_i32_95 dim 1 : vector<64x256xf32>, i32 -> vector<64x256xf32>
    %136 = vector.broadcast %134 : vector<1x256xf32> to vector<64x256xf32>
    %137 = arith.mulf %136, %135 : vector<64x256xf32>
    %138 = arith.truncf %137 : vector<64x256xf32> to vector<64x256xbf16>
    %c320 = arith.constant 320 : index
    %c0_96 = arith.constant 0 : index
    %139 = vector.load %arg15[%c320, %c0_96] : memref<448x256xbf16, #tpu.memory_space<vmem>>, vector<64x256xbf16>
    tpu.vector_store %arg15[%c320, %c0_96], %138 {strides = array<i32>} : memref<448x256xbf16, #tpu.memory_space<vmem>>, vector<64x256xbf16>,
    %c7_97 = arith.constant 7 : index
    %c0_98 = arith.constant 0 : index
    %140 = vector.load %arg3[%c7_97, %c0_98] : memref<9x256xf32, #tpu.memory_space<vmem>>, vector<1x256xf32>
    %c208_i32_99 = arith.constant 208 : i32
    %141 = tpu.dynamic_rotate %104 by %c208_i32_99 dim 1 : vector<64x256xf32>, i32 -> vector<64x256xf32>
    %142 = vector.broadcast %140 : vector<1x256xf32> to vector<64x256xf32>
    %143 = arith.mulf %142, %141 : vector<64x256xf32>
    %144 = arith.truncf %143 : vector<64x256xf32> to vector<64x256xbf16>
    %c384 = arith.constant 384 : index
    %c0_100 = arith.constant 0 : index
    %145 = vector.load %arg15[%c384, %c0_100] : memref<448x256xbf16, #tpu.memory_space<vmem>>, vector<64x256xbf16>
    tpu.vector_store %arg15[%c384, %c0_100], %144 {strides = array<i32>} : memref<448x256xbf16, #tpu.memory_space<vmem>>, vector<64x256xbf16>,
    %c0_101 = arith.constant 0 : index
    %c0_102 = arith.constant 0 : index
    %146 = vector.load %arg7[%c0_101, %c0_102] : memref<224x448xbf16, #tpu.memory_space<vmem>>, vector<224x448xbf16>
    %c0_103 = arith.constant 0 : index
    %c0_104 = arith.constant 0 : index
    %147 = vector.load %arg15[%c0_103, %c0_104] : memref<448x256xbf16, #tpu.memory_space<vmem>>, vector<448x256xbf16>
    %cst_105 = arith.constant dense<0.000000e+00> : vector<224x256xf32>
    %148 = tpu.matmul %146, %147, %cst_105 {dimension_numbers = #tpu.dot_dimension_numbers<[1], [0], [0], [1], [0, 0, 1, 1], [], []>} : vector<224x448xbf16>, vector<448x256xbf16>, vector<224x256xf32> -> vector<224x256xf32>
    %c1_106 = arith.constant 1 : index
    %c0_107 = arith.constant 0 : index
    %149 = vector.load %arg4[%c1_106, %c0_107] : memref<9x256xf32, #tpu.memory_space<vmem>>, vector<1x256xf32>
    %150 = vector.extract_strided_slice %148 {offsets = [0, 0], sizes = [32, 256], strides = [1, 1]} : vector<224x256xf32> to vector<32x256xf32>
    %c3_i32_108 = arith.constant 3 : i32
    %151 = tpu.dynamic_rotate %150 by %c3_i32_108 dim 1 : vector<32x256xf32>, i32 -> vector<32x256xf32>
    %152 = vector.broadcast %149 : vector<1x256xf32> to vector<32x256xf32>
    %153 = arith.mulf %152, %151 : vector<32x256xf32>
    %c2_109 = arith.constant 2 : index
    %c0_110 = arith.constant 0 : index
    %154 = vector.load %arg4[%c2_109, %c0_110] : memref<9x256xf32, #tpu.memory_space<vmem>>, vector<1x256xf32>
    %155 = vector.extract_strided_slice %148 {offsets = [32, 0], sizes = [32, 256], strides = [1, 1]} : vector<224x256xf32> to vector<32x256xf32>
    %c2_i32_111 = arith.constant 2 : i32
    %156 = tpu.dynamic_rotate %155 by %c2_i32_111 dim 1 : vector<32x256xf32>, i32 -> vector<32x256xf32>
    %157 = vector.broadcast %154 : vector<1x256xf32> to vector<32x256xf32>
    %158 = arith.mulf %157, %156 : vector<32x256xf32>
    %159 = arith.addf %153, %158 : vector<32x256xf32>
    %c3_112 = arith.constant 3 : index
    %c0_113 = arith.constant 0 : index
    %160 = vector.load %arg4[%c3_112, %c0_113] : memref<9x256xf32, #tpu.memory_space<vmem>>, vector<1x256xf32>
    %161 = vector.extract_strided_slice %148 {offsets = [64, 0], sizes = [32, 256], strides = [1, 1]} : vector<224x256xf32> to vector<32x256xf32>
    %c1_i32_114 = arith.constant 1 : i32
    %162 = tpu.dynamic_rotate %161 by %c1_i32_114 dim 1 : vector<32x256xf32>, i32 -> vector<32x256xf32>
    %163 = vector.broadcast %160 : vector<1x256xf32> to vector<32x256xf32>
    %164 = arith.mulf %163, %162 : vector<32x256xf32>
    %165 = arith.addf %159, %164 : vector<32x256xf32>
    %c4_115 = arith.constant 4 : index
    %c0_116 = arith.constant 0 : index
    %166 = vector.load %arg4[%c4_115, %c0_116] : memref<9x256xf32, #tpu.memory_space<vmem>>, vector<1x256xf32>
    %167 = vector.extract_strided_slice %148 {offsets = [96, 0], sizes = [32, 256], strides = [1, 1]} : vector<224x256xf32> to vector<32x256xf32>
    %168 = vector.broadcast %166 : vector<1x256xf32> to vector<32x256xf32>
    %169 = arith.mulf %168, %167 : vector<32x256xf32>
    %170 = arith.addf %165, %169 : vector<32x256xf32>
    %c5_117 = arith.constant 5 : index
    %c0_118 = arith.constant 0 : index
    %171 = vector.load %arg4[%c5_117, %c0_118] : memref<9x256xf32, #tpu.memory_space<vmem>>, vector<1x256xf32>
    %172 = vector.extract_strided_slice %148 {offsets = [128, 0], sizes = [32, 256], strides = [1, 1]} : vector<224x256xf32> to vector<32x256xf32>
    %c255_i32_119 = arith.constant 255 : i32
    %173 = tpu.dynamic_rotate %172 by %c255_i32_119 dim 1 : vector<32x256xf32>, i32 -> vector<32x256xf32>
    %174 = vector.broadcast %171 : vector<1x256xf32> to vector<32x256xf32>
    %175 = arith.mulf %174, %173 : vector<32x256xf32>
    %176 = arith.addf %170, %175 : vector<32x256xf32>
    %c6_120 = arith.constant 6 : index
    %c0_121 = arith.constant 0 : index
    %177 = vector.load %arg4[%c6_120, %c0_121] : memref<9x256xf32, #tpu.memory_space<vmem>>, vector<1x256xf32>
    %178 = vector.extract_strided_slice %148 {offsets = [160, 0], sizes = [32, 256], strides = [1, 1]} : vector<224x256xf32> to vector<32x256xf32>
    %c254_i32_122 = arith.constant 254 : i32
    %179 = tpu.dynamic_rotate %178 by %c254_i32_122 dim 1 : vector<32x256xf32>, i32 -> vector<32x256xf32>
    %180 = vector.broadcast %177 : vector<1x256xf32> to vector<32x256xf32>
    %181 = arith.mulf %180, %179 : vector<32x256xf32>
    %182 = arith.addf %176, %181 : vector<32x256xf32>
    %c7_123 = arith.constant 7 : index
    %c0_124 = arith.constant 0 : index
    %183 = vector.load %arg4[%c7_123, %c0_124] : memref<9x256xf32, #tpu.memory_space<vmem>>, vector<1x256xf32>
    %184 = vector.extract_strided_slice %148 {offsets = [192, 0], sizes = [32, 256], strides = [1, 1]} : vector<224x256xf32> to vector<32x256xf32>
    %c253_i32_125 = arith.constant 253 : i32
    %185 = tpu.dynamic_rotate %184 by %c253_i32_125 dim 1 : vector<32x256xf32>, i32 -> vector<32x256xf32>
    %186 = vector.broadcast %183 : vector<1x256xf32> to vector<32x256xf32>
    %187 = arith.mulf %186, %185 : vector<32x256xf32>
    %188 = arith.addf %182, %187 : vector<32x256xf32>
    %c0_126 = arith.constant 0 : index
    %c0_127 = arith.constant 0 : index
    %189 = vector.load %arg8[%c0_126, %c0_127] : memref<32x1xf32, #tpu.memory_space<vmem>>, vector<32x1xf32>
    %190 = vector.broadcast %189 : vector<32x1xf32> to vector<32x256xf32>
    %191 = arith.addf %188, %190 : vector<32x256xf32>
    %c1_128 = arith.constant 1 : index
    %192 = memref.load %arg1[%c1_128] : memref<4xf32, #tpu.memory_space<smem>>
    %cst_129 = arith.constant 0.000000e+00 : f32
    %193 = vector.broadcast %cst_129 : f32 to vector<32x256xf32>
    %194 = arith.cmpf oge, %191, %193 : vector<32x256xf32>
    %195 = vector.broadcast %192 : f32 to vector<32x256xf32>
    %196 = arith.mulf %195, %191 : vector<32x256xf32>
    %197 = arith.select %194, %191, %196 : vector<32x256xi1>, vector<32x256xf32>
    %c0_130 = arith.constant 0 : index
    %c0_131 = arith.constant 0 : index
    %198 = vector.load %arg9[%c0_130, %c0_131] : memref<16x32xbf16, #tpu.memory_space<vmem>>, vector<16x32xbf16>
    %199 = arith.truncf %197 : vector<32x256xf32> to vector<32x256xbf16>
    %cst_132 = arith.constant dense<0.000000e+00> : vector<16x256xf32>
    %200 = tpu.matmul %198, %199, %cst_132 {dimension_numbers = #tpu.dot_dimension_numbers<[1], [0], [0], [1], [0, 0, 1, 1], [], []>} : vector<16x32xbf16>, vector<32x256xbf16>, vector<16x256xf32> -> vector<16x256xf32>
    %c0_133 = arith.constant 0 : index
    %c0_134 = arith.constant 0 : index
    %201 = vector.load %arg10[%c0_133, %c0_134] : memref<16x1xf32, #tpu.memory_space<vmem>>, vector<16x1xf32>
    %202 = vector.broadcast %201 : vector<16x1xf32> to vector<16x256xf32>
    %203 = arith.addf %200, %202 : vector<16x256xf32>
    %c2_135 = arith.constant 2 : index
    %204 = memref.load %arg1[%c2_135] : memref<4xf32, #tpu.memory_space<smem>>
    %cst_136 = arith.constant 0.000000e+00 : f32
    %205 = vector.broadcast %cst_136 : f32 to vector<16x256xf32>
    %206 = arith.cmpf oge, %203, %205 : vector<16x256xf32>
    %207 = vector.broadcast %204 : f32 to vector<16x256xf32>
    %208 = arith.mulf %207, %203 : vector<16x256xf32>
    %209 = arith.select %206, %203, %208 : vector<16x256xi1>, vector<16x256xf32>
    %c2_137 = arith.constant 2 : index
    %c0_138 = arith.constant 0 : index
    %210 = vector.load %arg3[%c2_137, %c0_138] : memref<9x256xf32, #tpu.memory_space<vmem>>, vector<1x256xf32>
    %c32_i32_139 = arith.constant 32 : i32
    %211 = tpu.dynamic_rotate %209 by %c32_i32_139 dim 1 : vector<16x256xf32>, i32 -> vector<16x256xf32>
    %212 = vector.broadcast %210 : vector<1x256xf32> to vector<16x256xf32>
    %213 = arith.mulf %212, %211 : vector<16x256xf32>
    %214 = arith.truncf %213 : vector<16x256xf32> to vector<16x256xbf16>
    %c0_140 = arith.constant 0 : index
    %c0_141 = arith.constant 0 : index
    %215 = vector.load %arg16[%c0_140, %c0_141] : memref<80x256xbf16, #tpu.memory_space<vmem>>, vector<16x256xbf16>
    tpu.vector_store %arg16[%c0_140, %c0_141], %214 {strides = array<i32>} : memref<80x256xbf16, #tpu.memory_space<vmem>>, vector<16x256xbf16>,
    %c3_142 = arith.constant 3 : index
    %c0_143 = arith.constant 0 : index
    %216 = vector.load %arg3[%c3_142, %c0_143] : memref<9x256xf32, #tpu.memory_space<vmem>>, vector<1x256xf32>
    %c16_i32_144 = arith.constant 16 : i32
    %217 = tpu.dynamic_rotate %209 by %c16_i32_144 dim 1 : vector<16x256xf32>, i32 -> vector<16x256xf32>
    %218 = vector.broadcast %216 : vector<1x256xf32> to vector<16x256xf32>
    %219 = arith.mulf %218, %217 : vector<16x256xf32>
    %220 = arith.truncf %219 : vector<16x256xf32> to vector<16x256xbf16>
    %c16_145 = arith.constant 16 : index
    %c0_146 = arith.constant 0 : index
    %221 = vector.load %arg16[%c16_145, %c0_146] : memref<80x256xbf16, #tpu.memory_space<vmem>>, vector<16x256xbf16>
    tpu.vector_store %arg16[%c16_145, %c0_146], %220 {strides = array<i32>} : memref<80x256xbf16, #tpu.memory_space<vmem>>, vector<16x256xbf16>,
    %c4_147 = arith.constant 4 : index
    %c0_148 = arith.constant 0 : index
    %222 = vector.load %arg3[%c4_147, %c0_148] : memref<9x256xf32, #tpu.memory_space<vmem>>, vector<1x256xf32>
    %223 = vector.broadcast %222 : vector<1x256xf32> to vector<16x256xf32>
    %224 = arith.mulf %223, %209 : vector<16x256xf32>
    %225 = arith.truncf %224 : vector<16x256xf32> to vector<16x256xbf16>
    %c32_149 = arith.constant 32 : index
    %c0_150 = arith.constant 0 : index
    %226 = vector.load %arg16[%c32_149, %c0_150] : memref<80x256xbf16, #tpu.memory_space<vmem>>, vector<16x256xbf16>
    tpu.vector_store %arg16[%c32_149, %c0_150], %225 {strides = array<i32>} : memref<80x256xbf16, #tpu.memory_space<vmem>>, vector<16x256xbf16>,
    %c5_151 = arith.constant 5 : index
    %c0_152 = arith.constant 0 : index
    %227 = vector.load %arg3[%c5_151, %c0_152] : memref<9x256xf32, #tpu.memory_space<vmem>>, vector<1x256xf32>
    %c240_i32_153 = arith.constant 240 : i32
    %228 = tpu.dynamic_rotate %209 by %c240_i32_153 dim 1 : vector<16x256xf32>, i32 -> vector<16x256xf32>
    %229 = vector.broadcast %227 : vector<1x256xf32> to vector<16x256xf32>
    %230 = arith.mulf %229, %228 : vector<16x256xf32>
    %231 = arith.truncf %230 : vector<16x256xf32> to vector<16x256xbf16>
    %c48_154 = arith.constant 48 : index
    %c0_155 = arith.constant 0 : index
    %232 = vector.load %arg16[%c48_154, %c0_155] : memref<80x256xbf16, #tpu.memory_space<vmem>>, vector<16x256xbf16>
    tpu.vector_store %arg16[%c48_154, %c0_155], %231 {strides = array<i32>} : memref<80x256xbf16, #tpu.memory_space<vmem>>, vector<16x256xbf16>,
    %c6_156 = arith.constant 6 : index
    %c0_157 = arith.constant 0 : index
    %233 = vector.load %arg3[%c6_156, %c0_157] : memref<9x256xf32, #tpu.memory_space<vmem>>, vector<1x256xf32>
    %c224_i32_158 = arith.constant 224 : i32
    %234 = tpu.dynamic_rotate %209 by %c224_i32_158 dim 1 : vector<16x256xf32>, i32 -> vector<16x256xf32>
    %235 = vector.broadcast %233 : vector<1x256xf32> to vector<16x256xf32>
    %236 = arith.mulf %235, %234 : vector<16x256xf32>
    %237 = arith.truncf %236 : vector<16x256xf32> to vector<16x256xbf16>
    %c64_159 = arith.constant 64 : index
    %c0_160 = arith.constant 0 : index
    %238 = vector.load %arg16[%c64_159, %c0_160] : memref<80x256xbf16, #tpu.memory_space<vmem>>, vector<16x256xbf16>
    tpu.vector_store %arg16[%c64_159, %c0_160], %237 {strides = array<i32>} : memref<80x256xbf16, #tpu.memory_space<vmem>>, vector<16x256xbf16>,
    %c0_161 = arith.constant 0 : index
    %c0_162 = arith.constant 0 : index
    %239 = vector.load %arg11[%c0_161, %c0_162] : memref<8x80xbf16, #tpu.memory_space<vmem>>, vector<8x80xbf16>
    %c0_163 = arith.constant 0 : index
    %c0_164 = arith.constant 0 : index
    %240 = vector.load %arg16[%c0_163, %c0_164] : memref<80x256xbf16, #tpu.memory_space<vmem>>, vector<80x256xbf16>
    %cst_165 = arith.constant dense<0.000000e+00> : vector<8x256xf32>
    %241 = tpu.matmul %239, %240, %cst_165 {dimension_numbers = #tpu.dot_dimension_numbers<[1], [0], [0], [1], [0, 0, 1, 1], [], []>} : vector<8x80xbf16>, vector<80x256xbf16>, vector<8x256xf32> -> vector<8x256xf32>
    %c2_166 = arith.constant 2 : index
    %c0_167 = arith.constant 0 : index
    %242 = vector.load %arg4[%c2_166, %c0_167] : memref<9x256xf32, #tpu.memory_space<vmem>>, vector<1x256xf32>
    %243 = vector.extract_strided_slice %241 {offsets = [0, 0], sizes = [1, 256], strides = [1, 1]} : vector<8x256xf32> to vector<1x256xf32>
    %c2_i32_168 = arith.constant 2 : i32
    %244 = tpu.dynamic_rotate %243 by %c2_i32_168 dim 1 : vector<1x256xf32>, i32 -> vector<1x256xf32>
    %245 = arith.mulf %242, %244 : vector<1x256xf32>
    %c3_169 = arith.constant 3 : index
    %c0_170 = arith.constant 0 : index
    %246 = vector.load %arg4[%c3_169, %c0_170] : memref<9x256xf32, #tpu.memory_space<vmem>>, vector<1x256xf32>
    %247 = vector.extract_strided_slice %241 {offsets = [1, 0], sizes = [1, 256], strides = [1, 1]} : vector<8x256xf32> to vector<1x256xf32>
    %c1_i32_171 = arith.constant 1 : i32
    %248 = tpu.dynamic_rotate %247 by %c1_i32_171 dim 1 : vector<1x256xf32>, i32 -> vector<1x256xf32>
    %249 = arith.mulf %246, %248 : vector<1x256xf32>
    %250 = arith.addf %245, %249 : vector<1x256xf32>
    %c4_172 = arith.constant 4 : index
    %c0_173 = arith.constant 0 : index
    %251 = vector.load %arg4[%c4_172, %c0_173] : memref<9x256xf32, #tpu.memory_space<vmem>>, vector<1x256xf32>
    %252 = vector.extract_strided_slice %241 {offsets = [2, 0], sizes = [1, 256], strides = [1, 1]} : vector<8x256xf32> to vector<1x256xf32>
    %253 = arith.mulf %251, %252 : vector<1x256xf32>
    %254 = arith.addf %250, %253 : vector<1x256xf32>
    %c5_174 = arith.constant 5 : index
    %c0_175 = arith.constant 0 : index
    %255 = vector.load %arg4[%c5_174, %c0_175] : memref<9x256xf32, #tpu.memory_space<vmem>>, vector<1x256xf32>
    %256 = vector.extract_strided_slice %241 {offsets = [3, 0], sizes = [1, 256], strides = [1, 1]} : vector<8x256xf32> to vector<1x256xf32>
    %c255_i32_176 = arith.constant 255 : i32
    %257 = tpu.dynamic_rotate %256 by %c255_i32_176 dim 1 : vector<1x256xf32>, i32 -> vector<1x256xf32>
    %258 = arith.mulf %255, %257 : vector<1x256xf32>
    %259 = arith.addf %254, %258 : vector<1x256xf32>
    %c6_177 = arith.constant 6 : index
    %c0_178 = arith.constant 0 : index
    %260 = vector.load %arg4[%c6_177, %c0_178] : memref<9x256xf32, #tpu.memory_space<vmem>>, vector<1x256xf32>
    %261 = vector.extract_strided_slice %241 {offsets = [4, 0], sizes = [1, 256], strides = [1, 1]} : vector<8x256xf32> to vector<1x256xf32>
    %c254_i32_179 = arith.constant 254 : i32
    %262 = tpu.dynamic_rotate %261 by %c254_i32_179 dim 1 : vector<1x256xf32>, i32 -> vector<1x256xf32>
    %263 = arith.mulf %260, %262 : vector<1x256xf32>
    %264 = arith.addf %259, %263 : vector<1x256xf32>
    %c3_180 = arith.constant 3 : index
    %265 = memref.load %arg1[%c3_180] : memref<4xf32, #tpu.memory_space<smem>>
    %266 = vector.broadcast %265 : f32 to vector<1x256xf32>
    %267 = arith.addf %264, %266 : vector<1x256xf32>
    %c0_181 = arith.constant 0 : index
    %c0_182 = arith.constant 0 : index
    %c0_183 = arith.constant 0 : index
    %268 = vector.load %arg12[%c0_181, %c0_182, %c0_183] : memref<1x1x256xf32, #tpu.memory_space<vmem>>, vector<1x1x256xf32>
    %269 = vector.shape_cast %268 : vector<1x1x256xf32> to vector<1x256xf32>
    %270 = vector.shape_cast %267 : vector<1x256xf32> to vector<1x1x256xf32>
    tpu.vector_store %arg12[%c0_181, %c0_182, %c0_183], %270 {strides = array<i32>} : memref<1x1x256xf32, #tpu.memory_space<vmem>>, vector<1x1x256xf32>,
    return
  }
  func.func @transform_0(%arg0: i32, %arg1: memref<4xf32, #tpu.memory_space<smem>>) -> (i32, i32, i32) {
    %c0_i32 = arith.constant 0 : i32
    %c0_i32_0 = arith.constant 0 : i32
    %c0_i32_1 = arith.constant 0 : i32
    return %arg0, %c0_i32, %c0_i32_0 : i32, i32, i32
  }
  func.func @transform_1(%arg0: i32, %arg1: memref<4xf32, #tpu.memory_space<smem>>) -> (i32, i32) {
    %c0_i32 = arith.constant 0 : i32
    %c0_i32_0 = arith.constant 0 : i32
    %c0_i32_1 = arith.constant 0 : i32
    return %c0_i32, %c0_i32_0 : i32, i32
  }
  func.func @transform_2(%arg0: i32, %arg1: memref<4xf32, #tpu.memory_space<smem>>) -> (i32, i32) {
    %c0_i32 = arith.constant 0 : i32
    %c0_i32_0 = arith.constant 0 : i32
    %c0_i32_1 = arith.constant 0 : i32
    return %c0_i32, %c0_i32_0 : i32, i32
  }
  func.func @transform_3(%arg0: i32, %arg1: memref<4xf32, #tpu.memory_space<smem>>) -> (i32, i32) {
    %c0_i32 = arith.constant 0 : i32
    %c0_i32_0 = arith.constant 0 : i32
    %c0_i32_1 = arith.constant 0 : i32
    return %c0_i32, %c0_i32_0 : i32, i32
  }
  func.func @transform_4(%arg0: i32, %arg1: memref<4xf32, #tpu.memory_space<smem>>) -> (i32, i32) {
    %c0_i32 = arith.constant 0 : i32
    %c0_i32_0 = arith.constant 0 : i32
    %c0_i32_1 = arith.constant 0 : i32
    return %c0_i32, %c0_i32_0 : i32, i32
  }
  func.func @transform_5(%arg0: i32, %arg1: memref<4xf32, #tpu.memory_space<smem>>) -> (i32, i32) {
    %c0_i32 = arith.constant 0 : i32
    %c0_i32_0 = arith.constant 0 : i32
    %c0_i32_1 = arith.constant 0 : i32
    return %c0_i32, %c0_i32_0 : i32, i32
  }
  func.func @transform_6(%arg0: i32, %arg1: memref<4xf32, #tpu.memory_space<smem>>) -> (i32, i32) {
    %c0_i32 = arith.constant 0 : i32
    %c0_i32_0 = arith.constant 0 : i32
    %c0_i32_1 = arith.constant 0 : i32
    return %c0_i32, %c0_i32_0 : i32, i32
  }
  func.func @transform_7(%arg0: i32, %arg1: memref<4xf32, #tpu.memory_space<smem>>) -> (i32, i32) {
    %c0_i32 = arith.constant 0 : i32
    %c0_i32_0 = arith.constant 0 : i32
    %c0_i32_1 = arith.constant 0 : i32
    return %c0_i32, %c0_i32_0 : i32, i32
  }
  func.func @transform_8(%arg0: i32, %arg1: memref<4xf32, #tpu.memory_space<smem>>) -> (i32, i32) {
    %c0_i32 = arith.constant 0 : i32
    %c0_i32_0 = arith.constant 0 : i32
    %c0_i32_1 = arith.constant 0 : i32
    return %c0_i32, %c0_i32_0 : i32, i32
  }
  func.func @transform_9(%arg0: i32, %arg1: memref<4xf32, #tpu.memory_space<smem>>) -> (i32, i32) {
    %c0_i32 = arith.constant 0 : i32
    %c0_i32_0 = arith.constant 0 : i32
    %c0_i32_1 = arith.constant 0 : i32
    return %c0_i32, %c0_i32_0 : i32, i32
  }
  func.func @transform_10(%arg0: i32, %arg1: memref<4xf32, #tpu.memory_space<smem>>) -> (i32, i32, i32) {
    %c0_i32 = arith.constant 0 : i32
    %c0_i32_0 = arith.constant 0 : i32
    %c0_i32_1 = arith.constant 0 : i32
    return %arg0, %c0_i32, %c0_i32_0 : i32, i32, i32
  }
}

</mosaic_0001>

<bundles_post_ra>
// kernel: tpu_custom_call.1
= control target key start
LH: loop header
LB: loop body
LE: loop exit
PB: predicated region body
PF: predicated region fallthrough
CT: control target
= control target key end

     0   :  { %s5895_s0 = inlined_call_operand.vmem [shape: f32[4], index: 0, kind: input, shape index: {}]   ;;  %s5896_s1 = inlined_call_operand.vmem [shape: f32[2,1,256], index: 1, kind: input, shape index: {}]   ;;  %s5897_s2 = inlined_call_operand.vmem [shape: f32[9,256], index: 2, kind: input, shape index: {}]   ;;  %s5898_s3 = inlined_call_operand.hbm [shape: f32[9,256], index: 3, kind: input, shape index: {}]   ;;  %s5899_s4 = inlined_call_operand.vmem [shape: bf16[64,144], index: 4, kind: input, shape index: {}]   ;;  %s5900_s5 = inlined_call_operand.vmem [shape: f32[64,1], index: 5, kind: input, shape index: {}]   ;;  %s5901_s6 = inlined_call_operand.hbm [shape: bf16[224,448], index: 6, kind: input, shape index: {}]   ;;  %s5902_s7 = inlined_call_operand.vmem [shape: f32[32,1], index: 7, kind: input, shape index: {}]   ;;  %s5903_s8 = inlined_call_operand.vmem [shape: bf16[16,32], index: 8, kind: input, shape index: {}]   ;;  %s5904_s9 = inlined_call_operand.vmem [shape: f32[16,1], index: 9, kind: input, shape index: {}]   ;;  %s5905_s10 = inlined_call_operand.vmem [shape: bf16[8,80], index: 10, kind: input, shape index: {}]   ;;  %s5906_s11 = inlined_call_operand.hbm [shape: f32[2,1,256], index: 11, kind: output, shape index: {}]  }
   0x1   :  { %s16_s19 = sshll.u32 %s5895_s0, 4  ;;  %s17_s19 = int_to_ptr.vmem [resolvable:$true] %s16_s19 }
   0x2   :  { %s3866_s20 = scalar_lea.vmem %s17_s19, 16  ;;  %p3871_p1 = scmp.lt.s32.totalorder %s17_s19, %s17_s19 }
   0x3   :  { %p3867_p0 = scmp.ne.s32.totalorder %s17_s19, %s3866_s20  ;;  %p3872_p2 = scmp.lt.s32.totalorder %s3866_s20, %s3866_s20 }
   0x5   :  { %p3873_p3 = por %p3872_p2, %p3871_p1 }
   0x7   :  { %p3874_p4 = pnand %p3873_p3, %p3867_p0 }
   0x9   :  { %3877 = shalt.err (!%p3874_p4)  }
   0xa   :  { %s4008_s21 = smov [#allocation7]  }
   0xb   :  { %19 = dma.vmem_to_smem %s17_s19, 16, %s4008_s21, [#allocation6] }
   0xc   :  { %3978 = dma.done.wait [#allocation6], 16 }
   0xd   :  { %3979 = vsyncadd [#allocation6], 4294967280 }
   0xe   :  { %21 = sfence }
   0xf   :  { %22 = vsyncpa [#allocation9], 0 }
  0x10   :  { %23 = vsyncpa [#allocation12], 0 }
  0x11   :  { %24 = vsyncpa [#allocation10], 0 }
  0x12   :  { %26 = vsyncpa [#allocation10 + $0x1], 0  ;;  %s4095_s22 = smov 0   ;;  %s4097_s0 = smov 0  }
  0x13   :  { %s4099_s23 = smov 0   ;;  %s4101_s24 = smov 0  }
  0x14 LB: > { %5945 = sst [smem:[#allocation18_spill]] %s4002_s23  ;;  %s4116_s25 = sadd.s32 4294967295, %s4006_s24   ;;  %s4006_s24 = sphi %s4101_s24, %s6020_s24   ;;  %s4002_s23 = sphi %s4099_s23, %s6022_s23   ;;  %s3998_s0 = sphi %s4097_s0, %s6024_s0   ;;  %s3994_s22 = sphi %s4095_s22, %s6023_s22  }
  0x15   : > { %s3482_s26 = sadd.s32 4294967294, %s4006_s24   ;;  %s4120_s27 = sadd.s32 1, %s4006_s24  }
  0x16   : > { %5946 = sst [smem:[#allocation19_spill]] %s4120_s27  ;;  %s254_s28 = sadd.s32 1, %s4002_s23 }
  0x17   : > { %s251_s29 = ssub.s32 %s4006_s24, %s4120_s27  ;;  %p264_p5 = scmp.ne.s32.totalorder %s4002_s23, %s3998_s0 }
  0x18   : > { %p252_p6 = scmp.eq.s32.totalorder %s251_s29, 0  ;;  %p265_p7 = scmp.eq.s32.totalorder %s4116_s25, 1 }
  0x19   : > { %p270_p8 = scmp.ne.s32.totalorder %s3998_s0, %s3994_s22  ;;  %p271_p9 = scmp.eq.s32.totalorder %s3482_s26, 1 }
  0x1a   : > { %s4131_s30 = scalar_select %p252_p6, %s4002_s23, %s254_s28  }
  0x1b   : > { %p4133_p10 = por %p265_p7, %p264_p5  ;;  %p4137_p11 = por %p271_p9, %p270_p8 }
  0x1c   : > { %5947 = sst [smem:[#allocation20_spill]] %s4131_s30  ;;  %p3483_p12 = scmp.ge.s32.totalorder %s4006_s24, 1 }
  0x1d   : > { %s5948_s12 = scalar_select %p4133_p10, 1, 0 }
  0x1e   : > { %s5949_s13 = scalar_select %p4137_p11, 1, 0 }
  0x1f   : > { %p278_p13 = scmp.lt.s32.totalorder %s4006_s24, 3  ;;  %p5907_p0 = scmp.eq.s32.totalorder %s4116_s25, 0 }
  0x20   : > { %5950 = sst [smem:[#allocation21_spill]] %s5949_s13  ;;  %s4009_s15 = smov [#allocation8]  }
  0x21   : > { %p4144_p1 = pnand %p3483_p12, %p278_p13  ;;  %s293_s16 = sshll.u32 %s4009_s15, 4  ;;  %s294_s16 = int_to_ptr.vmem [resolvable:$true] %s293_s16 }
  0x22   : > { %s4010_s18 = smov [#allocation11]   ;;  %s3878_s26 = scalar_lea.hbm %s5898_s3, 512 }
  0x23   : > { %s5951_s14 = scalar_select %p4144_p1, 1, 0 }
  0x24   : > { %p3696_p2 = pneg %p4144_p1  ;;  %s312_s19 = sshll.u32 %s4010_s18, 4  ;;  %s4156_s19 = int_to_ptr.vmem [resolvable:$true] %s312_s19 }
  0x25   : > { %p3879_p4 = scmp.ne.s32.totalorder %s5898_s3, %s3878_s26  ;;  %p3885_p8 = scmp.lt.u32.totalorder %s3878_s26, %s5898_s3 }
  0x26   : > { %p4152_p3 = pnand %p5907_p0, %p3696_p2 }
  0x28   : > { %p3880_p5 = pneg %p4152_p3 }
  0x2a   : > { %p3881_p6 = pnand %p3880_p5, %p3879_p4 }
  0x2c   : > { %p3882_p7 = pneg %p3881_p6 }
  0x2e   : > { %p3887_p9 = pnand %p3885_p8, %p3882_p7 }
  0x30   : > { %3890 = shalt.err (!%p3887_p9)
}
  0x31   : > { %s3891_s18 = scalar_lea.vmem %s294_s16, 512  ;;  %p3899_p0 = scmp.lt.s32.totalorder %s294_s16, %s294_s16 }
  0x32   : > { %p3892_p12 = scmp.ne.s32.totalorder %s294_s16, %s3891_s18  ;;  %p3900_p11 = scmp.lt.s32.totalorder %s3891_s18, %s3891_s18 }
  0x34   : > { %p3894_p13 = pnand %p3892_p12, %p3880_p5  ;;  %p3901_p10 = por %p3900_p11, %p3899_p0 }
  0x36   : > { %p3895_p2 = pneg %p3894_p13 }
  0x38   : > { %p3902_p1 = pnand %p3901_p10, %p3895_p2 }
  0x3a   : > { %3905 = shalt.err (!%p3902_p1)
}
  0x3b   : > { %s4011_s20 = smov 256   ;;  %s4012_s21 = smov 16  }
  0x3c   : > { %3699 = dma.hbm_to_vmem [thread:$0]  (!%p4152_p3), %s5898_s3, 512, %s294_s16, [#allocation9], %s4011_s20, %s4011_s20, %s4012_s21  }
  0x3d   : > { %s3906_s15 = scalar_lea.hbm %s5901_s6, 7168 }
  0x3e   : > { %p3907_p4 = scmp.ne.s32.totalorder %s5901_s6, %s3906_s15  ;;  %p3913_p0 = scmp.lt.u32.totalorder %s3906_s15, %s5901_s6 }
  0x40   : > { %p3909_p10 = pnand %p3907_p4, %p3880_p5 }
  0x42   : > { %p3910_p11 = pneg %p3909_p10 }
  0x44   : > { %p3915_p1 = pnand %p3913_p0, %p3910_p11 }
  0x46   : > { %3918 = shalt.err (!%p3915_p1)
}
  0x47   : > { %s3919_s16 = scalar_lea.vmem %s4156_s19, 7168  ;;  %p3927_p9 = scmp.lt.s32.totalorder %s4156_s19, %s4156_s19 }
  0x48   : > { %p3920_p6 = scmp.ne.s32.totalorder %s4156_s19, %s3919_s16  ;;  %p3928_p12 = scmp.lt.s32.totalorder %s3919_s16, %s3919_s16 }
  0x4a   : > { %p3922_p7 = pnand %p3920_p6, %p3880_p5  ;;  %p3929_p13 = por %p3928_p12, %p3927_p9 }
  0x4c   : > { %p3923_p8 = pneg %p3922_p7 }
  0x4e   : > { %p3930_p2 = pnand %p3929_p13, %p3923_p8 }
  0x50   : > { %3933 = shalt.err (!%p3930_p2)
}
  0x51   : > { %3702 = dma.hbm_to_vmem [thread:$0]  (!%p4152_p3), %s5901_s6, 7168, %s4156_s19, [#allocation12], %s4011_s20, %s4011_s20, %s4012_s21  }
  0x52   : > { %p5953_p4 = scmp.ne.s32.totalorder %s5951_s14, 0 }
  0x54   : > { %347 = sbr.rel (%p5953_p4) target bundleno = 2171 (0x87b), region = 60 }
  0x5b   : > { %p5954_p10 = scmp.eq.s32.totalorder %s4116_s25, 0 }
  0x5d   : > { %3981 = dma.done.wait (%p5954_p10), [#allocation9], 512   ;;  %p5955_p5 = pmov %p5954_p10 }
  0x5f   : > { %3983 = vsyncadd (%p5955_p5), [#allocation9], 4294966784  ;;  %p5956_p11 = pmov %p5955_p5 }
  0x60   : > { %p5957_p0 = pmov %p5955_p5 }
  0x61   : > { %3985 = dma.done.wait (%p5956_p11), [#allocation12], 7168  }
  0x62   : > { %3987 = vsyncadd (%p5957_p0), [#allocation12], 4294960128  ;;  %p388_p1 = scmp.lt.s32.totalorder %s4116_s25, 1  ;;  %v400_v0 = vlaneseq  ;;  %v4013_v1 = vmov 0.0   ;;  %v5958_v9 = vmov 0  ;;  %s4014_s26 = smov 48  }
  0x63   : > { %394 = vst [vmem:[#allocation2] sm:$0xff] %v4013_v1  ;;  %395 = vst [vmem:[#allocation2 + $0x8] sm:$0xff] %v4013_v1  ;;  %v3495_v6 = vld [vmem:[%s5897_s2 + $0x4] ss:$8 sm:$0x3]  ;;  %s4015_s28 = smov 64  }
  0x64   : > { %396 = vst [vmem:[#allocation2 + $0x10] sm:$0xff] %v4013_v1  ;;  %397 = vst [vmem:[#allocation2 + $0x18] sm:$0xff] %v4013_v1  ;;  %s389_s13 = scalar_select %p388_p1, %s4116_s25, 1  ;;  %v401_v2 = vshrl.u32 %v400_v0, 7  ;;  %vm4228_vm0 = vcmp.lt.s32.totalorder %v400_v0, 256  ;;  %v4247_v13 = vand.u32 127, %v400_v0 }
  0x65   : > { %v5959_v9 = vsel %vm4228_vm0, 4294967295, %v5958_v9  ;;  %s4016_s29 = smov 32   ;;  %s4017_s15 = smov 16   ;;  %v4021_v11 = vmov 1966171168   ;;  %vm1064_vm8 = vcmask 130048  }
  0x66   : > { %s3491_s14 = sshll.u32 %s389_s13, 1  ;;  %v4217_v3 = vsub.s32 0, %v401_v2  ;;  %v4222_v4 = vsub.s32 1, %v401_v2  ;;  %5960 = vst [vmem:[#allocation22_spill] sm:$0xff] %v5959_v9  ;;  %s4018_s18 = smov 112   ;;  %v423_v12 = vunpack.c.l.s4 %v4021_v11  ;;  %vm450_vm1 = vcmp.lt.s32.totalorder %v4247_v13, 48 }
  0x67   : > { %s391_s20 = scalar_lea.vmem %s5896_s1, %s3491_s14  ;;  %s4019_s16 = smov 96   ;;  %vm416_vm2 = vcmp.lt.s32.totalorder %v4247_v13, 64  ;;  %vm481_vm3 = vcmp.lt.s32.totalorder %v4247_v13, 32  ;;  %v3492_v27 = vld [vmem:[%s5897_s2 + $0x1] ss:$8 sm:$0x3] }
  0x68   : > { %v393_v5 = vld [vmem:[%s391_s20] sm:$0x3]  ;;  %s5926_s23 = smov 80   ;;  %v424_v16 = vunpack.c.0.s8 %v423_v12  ;;  %v3499_v34 = vld [vmem:[%s5897_s2 + $0x10] ss:$8 sm:$0x3] }
  0x69   : > { %v403_v7 = vrot.slane %v393_v5, %v4217_v3  ;;  %v539_v8 = vmul.f32 %v3495_v6, %v393_v5  ;;  %v407_v10 = vrot.slane %v393_v5, %v4222_v4  ;;  %v398_v29 = vld [vmem:[%s5897_s2] ss:$8 sm:$0x3]  ;;  %vm512_vm4 = vcmp.lt.s32.totalorder %v4247_v13, 16  ;;  %s4022_s17 = smov 4   ;;  %s5918_s27 = smov 2  }
  0x6a   : > { %v4251_v17 = vsub.s32 %v424_v16, %v401_v2  ;;  %v3493_v47 = vld [vmem:[%s5897_s2 + $0x2] ss:$8 sm:$0x3]  ;;  %vm549_vm5 = vcmp.lt.s32.totalorder %v4247_v13, 112  ;;  %vm580_vm6 = vcmp.lt.s32.totalorder %v4247_v13, 96  ;;  %vm611_vm7 = vcmp.lt.s32.totalorder %v4247_v13, 80 }
  0x6b   : > { %446 = vrot.lane.b32.xlu1 %v403_v7, %s4014_s26  ;;  %410 = vrot.lane.b32.xlu0 %v403_v7, %s4015_s28  ;;  %541 = vst.msk [vmem:[#allocation2 + $0x4] ss:$8 sm:$0x3] %vm4228_vm0, %v539_v8  ;;  %v3494_v56 = vld [vmem:[%s5897_s2 + $0x3] ss:$8 sm:$0x3] }
  0x6c   : > { %5961 = vst [vmem:[#allocation23_spill] sm:$0xff] %v4251_v17  ;;  %v3496_v1 = vld [vmem:[%s5897_s2 + $0x5] ss:$8 sm:$0x3]  ;;  %s5914_s13 = smov 1   ;;  %s5916_s14 = smov 127  }
  0x6d   : > { %s5924_s19 = smov 126   ;;  %s4029_s20 = smov 124   ;;  %vm671_vm9 = vcmp.lt.s32.totalorder %v4247_v13, 4  ;;  %vm705_vm10 = vcmp.lt.s32.totalorder %v4247_v13, 3  ;;  %vm739_vm11 = vcmp.lt.s32.totalorder %v4247_v13, 2  ;;  %vm773_vm12 = vcmp.lt.s32.totalorder %v4247_v13, 1 }
  0x6e   : > { %vm5930_vm13 = vcmp.lt.s32.totalorder %v4247_v13, 127  ;;  %vm5929_vm14 = vcmp.lt.s32.totalorder %v4247_v13, 126  ;;  %vm5928_vm15 = vcmp.lt.s32.totalorder %v4247_v13, 125  ;;  %s5969_s21 = smov 80   ;;  %s5986_s30 = smov 126  }
  0x6f   : > { %448 = vrot.lane.b32.xlu1 %v407_v10, %s4014_s26  ;;  %412 = vrot.lane.b32.xlu0 %v407_v10, %s4015_s28  ;;  %s5920_s28 = smov 3   ;;  %p6017_p6 = scmp.ne.s32.totalorder %s5948_s12, 0 }
  0x73   : > { %479 = vrot.lane.b32.xlu1 %v407_v10, %s4016_s29  ;;  %477 = vrot.lane.b32.xlu0 %v403_v7, %s4016_s29 }
  0x77   : > { %510 = vrot.lane.b32.xlu1 %v407_v10, %s4017_s15  ;;  %508 = vrot.lane.b32.xlu0 %v403_v7, %s4017_s15 }
  0x7b   : > { %547 = vrot.lane.b32.xlu1 %v407_v10, %s4018_s18  ;;  %545 = vrot.lane.b32.xlu0 %v403_v7, %s4018_s18 }
  0x7f   : > { %578 = vrot.lane.b32.xlu1 %v407_v10, %s4019_s16  ;;  %576 = vrot.lane.b32.xlu0 %v403_v7, %s4019_s16 }
  0x83   : > { %609 = vrot.lane.b32.xlu1 %v407_v10, %s5926_s23  ;;  %607 = vrot.lane.b32.xlu0 %v403_v7, %s5926_s23  ;;  %s5987_s23 = smov 125  }
  0xdd   : > { %v447_v14 = vpop.permute.xlu1 %446  ;;  %v411_v15 = vpop.permute.xlu0 %410 }
  0xe1   : > { %v449_v18 = vpop.permute.xlu1 %448  ;;  %v413_v19 = vpop.permute.xlu0 %412 }
  0xe2   : > { %v451_v20 = vsel %vm450_vm1, %v447_v14, %v449_v18  ;;  %v452_v21 = vsel %vm450_vm1, %v449_v18, %v447_v14  ;;  %v417_v22 = vsel %vm416_vm2, %v411_v15, %v413_v19  ;;  %v418_v23 = vsel %vm416_vm2, %v413_v19, %v411_v15  ;;  %v3497_v15 = vld [vmem:[%s5897_s2 + $0x6] ss:$8 sm:$0x3] }
  0xe3   : > { %v455_v24 = vcombine.low %v452_v21, %v451_v20  ;;  %v421_v25 = vcombine.low %v418_v23, %v417_v22  ;;  %v638_v26 = vcombine.low %v417_v22, %v418_v23  ;;  %vm930_vm2 = vcmp.lt.s32.totalorder %v4247_v13, 124 }
  0xe5   : > { %v462_v28 = vrot.slane %v455_v24, %v4251_v17  ;;  %v428_v30 = vrot.slane %v421_v25, %v4251_v17  ;;  %v645_v31 = vrot.slane %v638_v26, %v4251_v17  ;;  %v480_v32 = vpop.permute.xlu1 %479  ;;  %v478_v33 = vpop.permute.xlu0 %477  ;;  %v3498_v24 = vld [vmem:[%s5897_s2 + $0x7] ss:$8 sm:$0x3] }
  0xe6   : > { %v482_v35 = vsel %vm481_vm3, %v478_v33, %v480_v32  ;;  %v483_v36 = vsel %vm481_vm3, %v480_v32, %v478_v33 }
  0xe7   : > { %v469_v37 = vrot.slane %v462_v28, %v4251_v17  ;;  %v435_v38 = vrot.slane %v428_v30, %v4251_v17  ;;  %v652_v39 = vrot.slane %v645_v31, %v4251_v17  ;;  %v486_v40 = vcombine.low %v483_v36, %v482_v35 }
  0xe9   : > { %v471_v41 = vmul.f32 %v3492_v27, %v469_v37  ;;  %v437_v42 = vmul.f32 %v435_v38, %v398_v29  ;;  %v654_v43 = vmul.f32 %v3499_v34, %v652_v39  ;;  %v493_v44 = vrot.slane %v486_v40, %v4251_v17  ;;  %v511_v45 = vpop.permute.xlu1 %510  ;;  %v509_v46 = vpop.permute.xlu0 %508  ;;  %v798_v27 = vld [vmem:[#allocation8 + $0x4] ss:$8 sm:$0x3] }
  0xea   : > { %v513_v48 = vsel %vm512_vm4, %v509_v46, %v511_v45  ;;  %v514_v49 = vsel %vm512_vm4, %v511_v45, %v509_v46  ;;  %v807_v28 = vrot.slane %v798_v27, %v4222_v4  ;;  %v803_v29 = vrot.slane %v798_v27, %v4217_v3  ;;  %v3771_v38 = vld [vmem:[%s5899_s4 + $0x4] ss:$8 sps:$4 sm:$0xff]   ;;  %v986_v46 = vld [vmem:[%s5900_s5 + $0x30] sm:$0xff] }
  0xeb   : > { %473 = vst.msk [vmem:[#allocation2 + $0x1] ss:$8 sm:$0x3] %vm4228_vm0, %v471_v41  ;;  %442 = vst.msk [vmem:[#allocation2] ss:$8 sm:$0x3] %vm4228_vm0, %v437_v42  ;;  %v500_v50 = vrot.slane %v493_v44, %v4251_v17  ;;  %v517_v51 = vcombine.low %v514_v49, %v513_v48  ;;  %3508 = vmatprep.mubr.msk.bf16.mxu0 %vm1064_vm8, %v3771_v38 }
  0xec   : > { %656 = vst.msk [vmem:[#allocation2 + $0x10] ss:$8 sm:$0x3] %vm4228_vm0, %v654_v43  ;;  %v981_v39 = vld [vmem:[%s5900_s5 + $0x8] sm:$0xff]  ;;  %v980_v40 = vld [vmem:[%s5900_s5] sm:$0xff]  ;;  %v5931_v41 = vmov 0  }
  0xed   : > { %v502_v52 = vmul.f32 %v3493_v47, %v500_v50  ;;  %v524_v53 = vrot.slane %v517_v51, %v4251_v17  ;;  %v548_v54 = vpop.permute.xlu1 %547  ;;  %v546_v55 = vpop.permute.xlu0 %545  ;;  %3768 = vset.pattern.permute.xlu1 %v5931_v41  ;;  %3767 = vset.pattern.permute.xlu0 %v5931_v41  ;;  %v982_v42 = vld [vmem:[%s5900_s5 + $0x10] sm:$0xff]  ;;  %v983_v43 = vld [vmem:[%s5900_s5 + $0x18] sm:$0xff]  ;;  %v984_v44 = vld [vmem:[%s5900_s5 + $0x20] sm:$0xff] }
  0xee   : > { %v550_v57 = vsel %vm549_vm5, %v546_v55, %v548_v54  ;;  %v551_v58 = vsel %vm549_vm5, %v548_v54, %v546_v55  ;;  %v985_v45 = vld [vmem:[%s5900_s5 + $0x28] sm:$0xff]  ;;  %v987_v47 = vld [vmem:[%s5900_s5 + $0x38] sm:$0xff] }
  0xef   : > { %504 = vst.msk [vmem:[#allocation2 + $0x2] ss:$8 sm:$0x3] %vm4228_vm0, %v502_v52  ;;  %v531_v59 = vrot.slane %v524_v53, %v4251_v17  ;;  %v554_v60 = vcombine.low %v550_v57, %v551_v58  ;;  %v662_v53 = vld [vmem:[#allocation8] ss:$8 sm:$0x3] }
  0xf0   : > { %v680_v57 = vrot.slane %v662_v53, %v4217_v3 }
  0xf1   : > { %v533_v61 = vmul.f32 %v3494_v56, %v531_v59  ;;  %v561_v62 = vrot.slane %v554_v60, %v4251_v17  ;;  %v579_v63 = vpop.permute.xlu1 %578  ;;  %v577_v0 = vpop.permute.xlu0 %576  ;;  %v684_v56 = vrot.slane %v662_v53, %v4222_v4 }
  0xf2   : > { %v581_v2 = vsel %vm580_vm6, %v577_v0, %v579_v63  ;;  %v582_v5 = vsel %vm580_vm6, %v579_v63, %v577_v0 }
  0xf3   : > { %v4314_v6 = vld [vmem:[#allocation2 + $0x10] sm:$0xff]  ;;  %535 = vst.msk [vmem:[#allocation2 + $0x3] ss:$8 sm:$0x3] %vm4228_vm0, %v533_v61  ;;  %v568_v7 = vrot.slane %v561_v62, %v4251_v17  ;;  %v585_v8 = vcombine.low %v581_v2, %v582_v5  ;;  %v661_v19 = vld [vmem:[#allocation2 + $0x18] sm:$0xff] }
  0xf4   : > { %665 = vrot.lane.b32.xlu1 %v4314_v6, %s4022_s17  ;;  %v4350_v32 = vmul.f32 %v807_v28, %v661_v19  ;;  %v4359_v35 = vmul.f32 %v803_v29, %v4314_v6 }
  0xf5   : > { %v570_v10 = vmul.f32 %v3496_v1, %v568_v7  ;;  %v592_v11 = vrot.slane %v585_v8, %v4251_v17  ;;  %v610_v12 = vpop.permute.xlu1 %609  ;;  %v608_v14 = vpop.permute.xlu0 %607 }
  0xf6   : > { %v612_v16 = vsel %vm611_vm7, %v608_v14, %v610_v12  ;;  %v613_v18 = vsel %vm611_vm7, %v610_v12, %v608_v14 }
  0xf7   : > { %572 = vst.msk [vmem:[#allocation2 + $0x5] ss:$8 sm:$0x3] %vm4228_vm0, %v570_v10  ;;  %v599_v20 = vrot.slane %v592_v11, %v4251_v17  ;;  %v616_v21 = vcombine.low %v612_v16, %v613_v18 }
  0xf8   : > { %669 = vrot.lane.b32.xlu1 %v661_v19, %s4022_s17 }
  0xf9   : > { %v601_v22 = vmul.f32 %v3497_v15, %v599_v20  ;;  %v623_v23 = vrot.slane %v616_v21, %v4251_v17 }
  0xfb   : > { %603 = vst.msk [vmem:[#allocation2 + $0x6] ss:$8 sm:$0x3] %vm4228_vm0, %v601_v22  ;;  %v630_v25 = vrot.slane %v623_v23, %v4251_v17 }
  0xfc   : > { %699 = vrot.lane.b32.xlu1 %v4314_v6, %s5920_s28 }
  0xfd   : > { %v632_v26 = vmul.f32 %v3498_v24, %v630_v25 }
  0xff   : > { %634 = vst.msk [vmem:[#allocation2 + $0x7] ss:$8 sm:$0x3] %vm4228_vm0, %v632_v26  ;;  %v730_v26 = vld [vmem:[#allocation8 + $0x2] ss:$8 sm:$0x3] }
 0x100   : > { %703 = vrot.lane.b32.xlu1 %v661_v19, %s5920_s28 }
 0x104   : > { %733 = vrot.lane.b32.xlu1 %v4314_v6, %s5918_s27 }
 0x106   : > { %v658_v30 = vld [vmem:[#allocation2] sm:$0xff]  ;;  %v659_v31 = vld [vmem:[#allocation2 + $0x8] sm:$0xff] }
 0x107   : > { %663 = vrot.lane.b32.xlu0 %v658_v30, %s4022_s17  ;;  %v4354_v33 = vmul.f32 %v807_v28, %v659_v31  ;;  %v4356_v34 = vmul.f32 %v803_v29, %v658_v30 }
 0x108   : > { %737 = vrot.lane.b32.xlu1 %v661_v19, %s5918_s27 }
 0x109   : > { %v815_v36 = vpack.c.bf16 %v4350_v32, %v4354_v33  ;;  %v814_v37 = vpack.c.bf16 %v4359_v35, %v4356_v34 }
 0x10b   : > { %667 = vrot.lane.b32.xlu0 %v659_v31, %s4022_s17  ;;  %s5922_s17 = smov 125  }
 0x10c   : > { %767 = vrot.lane.b32.xlu1 %v4314_v6, %s5914_s13 }
 0x10f   : > { %697 = vrot.lane.b32.xlu0 %v658_v30, %s5920_s28 }
 0x110   : > { %771 = vrot.lane.b32.xlu1 %v661_v19, %s5914_s13 }
 0x113   : > { %701 = vrot.lane.b32.xlu0 %v659_v31, %s5920_s28  ;;  %s5982_s28 = smov 3  }
 0x114   : > { %822 = vrot.lane.b32.xlu1 %v4314_v6, %s5916_s14 }
 0x117   : > { %731 = vrot.lane.b32.xlu0 %v658_v30, %s5918_s27 }
 0x118   : > { %826 = vrot.lane.b32.xlu1 %v661_v19, %s5916_s14 }
 0x11b   : > { %735 = vrot.lane.b32.xlu0 %v659_v31, %s5918_s27  ;;  %s5983_s27 = smov 2  }
 0x11c   : > { %856 = vrot.lane.b32.xlu1 %v4314_v6, %s5924_s19 }
 0x11f   : > { %765 = vrot.lane.b32.xlu0 %v658_v30, %s5914_s13 }
 0x120   : > { %860 = vrot.lane.b32.xlu1 %v661_v19, %s5924_s19 }
 0x123   : > { %769 = vrot.lane.b32.xlu0 %v659_v31, %s5914_s13  ;;  %s1150_s13 = sld [smem:[#allocation7]] }
 0x124   : > { %890 = vrot.lane.b32.xlu1 %v4314_v6, %s5922_s17 }
 0x127   : > { %820 = vrot.lane.b32.xlu0 %v658_v30, %s5916_s14 }
 0x128   : > { %894 = vrot.lane.b32.xlu1 %v661_v19, %s5922_s17 }
 0x12b   : > { %824 = vrot.lane.b32.xlu0 %v659_v31, %s5916_s14  ;;  %s5984_s14 = smov 1  }
 0x12c   : > { %924 = vrot.lane.b32.xlu1 %v4314_v6, %s4029_s20  ;;  %v696_v6 = vld [vmem:[#allocation8 + $0x1] ss:$8 sm:$0x3] }
 0x12d   : > { %v714_v12 = vrot.slane %v696_v6, %v4217_v3  ;;  %v718_v14 = vrot.slane %v696_v6, %v4222_v4 }
 0x12f   : > { %854 = vrot.lane.b32.xlu0 %v658_v30, %s5924_s19 }
 0x130   : > { %928 = vrot.lane.b32.xlu1 %v661_v19, %s4029_s20 }
 0x133   : > { %858 = vrot.lane.b32.xlu0 %v659_v31, %s5924_s19  ;;  %s3592_s19 = sld [smem:[#allocation7 + $0x2]] }
 0x134   : > { %995 = vperm.xlu1 %3768, %v981_v39  }
 0x137   : > { %888 = vrot.lane.b32.xlu0 %v658_v30, %s5922_s17 }
 0x138   : > { %1000 = vperm.xlu1 %3768, %v982_v42  }
 0x13b   : > { %892 = vrot.lane.b32.xlu0 %v659_v31, %s5922_s17 }
 0x13c   : > { %1010 = vperm.xlu1 %3768, %v984_v44  }
 0x13f   : > { %922 = vrot.lane.b32.xlu0 %v658_v30, %s4029_s20  ;;  %v748_v30 = vrot.slane %v730_v26, %v4217_v3 }
 0x140   : > { %1020 = vperm.xlu1 %3768, %v986_v46  }
 0x143   : > { %926 = vrot.lane.b32.xlu0 %v659_v31, %s4029_s20  ;;  %v752_v31 = vrot.slane %v730_v26, %v4222_v4 }
 0x147   : > { %990 = vperm.xlu0 %3767, %v980_v40  }
 0x14b   : > { %1005 = vperm.xlu0 %3767, %v983_v43  }
 0x14f   : > { %1015 = vperm.xlu0 %3767, %v985_v45  }
 0x153   : > { %1025 = vperm.xlu0 %3767, %v987_v47  }
 0x166   : > { %v666_v48 = vpop.permute.xlu1 %665 }
 0x16a   : > { %v670_v49 = vpop.permute.xlu1 %669 }
 0x16b   : > { %v675_v58 = vsel %vm671_vm9, %v670_v49, %v666_v48  ;;  %v673_v59 = vsel %vm671_vm9, %v666_v48, %v670_v49  ;;  %v764_v49 = vld [vmem:[#allocation8 + $0x3] ss:$8 sm:$0x3] }
 0x16c   : > { %v690_v1 = vmul.f32 %v684_v56, %v673_v59  ;;  %v689_v5 = vmul.f32 %v680_v57, %v675_v58 }
 0x16e   : > { %v700_v50 = vpop.permute.xlu1 %699 }
 0x172   : > { %v704_v51 = vpop.permute.xlu1 %703 }
 0x173   : > { %v707_v15 = vsel %vm705_vm10, %v700_v50, %v704_v51  ;;  %v709_v16 = vsel %vm705_vm10, %v704_v51, %v700_v50 }
 0x174   : > { %v723_v21 = vmul.f32 %v714_v12, %v709_v16  ;;  %v724_v22 = vmul.f32 %v718_v14, %v707_v15 }
 0x176   : > { %v734_v52 = vpop.permute.xlu1 %733 }
 0x179   : > { %v664_v55 = vpop.permute.xlu0 %663 }
 0x17a   : > { %v738_v54 = vpop.permute.xlu1 %737 }
 0x17b   : > { %v741_v38 = vsel %vm739_vm11, %v734_v52, %v738_v54  ;;  %v743_v39 = vsel %vm739_vm11, %v738_v54, %v734_v52  ;;  %v782_v52 = vrot.slane %v764_v49, %v4217_v3  ;;  %v786_v54 = vrot.slane %v764_v49, %v4222_v4 }
 0x17c   : > { %v757_v45 = vmul.f32 %v748_v30, %v743_v39  ;;  %v758_v46 = vmul.f32 %v752_v31, %v741_v38  ;;  %v887_v39 = vld [vmem:[#allocation8 + $0x7] ss:$8 sm:$0x3] }
 0x17d   : > { %v668_v61 = vpop.permute.xlu0 %667 }
 0x17e   : > { %v768_v60 = vpop.permute.xlu1 %767  ;;  %v674_v62 = vsel %vm671_vm9, %v668_v61, %v664_v55  ;;  %v672_v63 = vsel %vm671_vm9, %v664_v55, %v668_v61 }
 0x17f   : > { %v688_v0 = vmul.f32 %v684_v56, %v672_v63  ;;  %v687_v2 = vmul.f32 %v680_v57, %v674_v62 }
 0x181   : > { %v698_v8 = vpop.permute.xlu0 %697  ;;  %v692_v10 = vpack.c.bf16 %v690_v1, %v688_v0  ;;  %v691_v11 = vpack.c.bf16 %v689_v5, %v687_v2  ;;  %v819_v2 = vld [vmem:[#allocation8 + $0x5] ss:$8 sm:$0x3] }
 0x182   : > { %v772_v7 = vpop.permute.xlu1 %771 }
 0x183   : > { %1077 = vmatprep.subr.bf16.mxu0 %v692_v10  ;;  %v775_v56 = vsel %vm773_vm12, %v768_v60, %v772_v7  ;;  %v777_v57 = vsel %vm773_vm12, %v772_v7, %v768_v60  ;;  %v837_v60 = vrot.slane %v819_v2, %v4217_v3  ;;  %v841_v7 = vrot.slane %v819_v2, %v4222_v4 }
 0x184   : > { %1078 = vmatpush1.bf16.msra.mxu0 %v691_v11  ;;  %v791_v62 = vmul.f32 %v782_v52, %v777_v57  ;;  %v792_v63 = vmul.f32 %v786_v54, %v775_v56  ;;  %v921_v56 = vld [vmem:[#allocation8 + $0x10] ss:$8 sm:$0x3] }
 0x185   : > { %v702_v18 = vpop.permute.xlu0 %701 }
 0x186   : > { %v706_v19 = vsel %vm705_vm10, %v698_v8, %v702_v18  ;;  %v708_v20 = vsel %vm705_vm10, %v702_v18, %v698_v8  ;;  %v823_v23 = vpop.permute.xlu1 %822 }
 0x187   : > { %v721_v24 = vmul.f32 %v714_v12, %v708_v20  ;;  %v722_v25 = vmul.f32 %v718_v14, %v706_v19 }
 0x189   : > { %v732_v27 = vpop.permute.xlu0 %731  ;;  %v726_v28 = vpack.c.bf16 %v724_v22, %v722_v25  ;;  %v725_v29 = vpack.c.bf16 %v723_v21, %v721_v24  ;;  %v853_v24 = vld [vmem:[#allocation8 + $0x6] ss:$8 sm:$0x3] }
 0x18a   : > { %v827_v40 = vpop.permute.xlu1 %826  ;;  %v875_v25 = vrot.slane %v853_v24, %v4222_v4 }
 0x18b   : > { %1079 = vmatprep.subr.bf16.mxu0 %v726_v28  ;;  %v830_v11 = vsel %vm5930_vm13, %v823_v23, %v827_v40  ;;  %v832_v12 = vsel %vm5930_vm13, %v827_v40, %v823_v23  ;;  %v871_v23 = vrot.slane %v853_v24, %v4217_v3 }
 0x18c   : > { %1080 = vmatpush1.bf16.msra.mxu0 %v725_v29  ;;  %v846_v18 = vmul.f32 %v837_v60, %v830_v11  ;;  %v847_v19 = vmul.f32 %v841_v7, %v832_v12 }
 0x18d   : > { %v736_v42 = vpop.permute.xlu0 %735 }
 0x18e   : > { %v740_v43 = vsel %vm739_vm11, %v732_v27, %v736_v42  ;;  %v742_v44 = vsel %vm739_vm11, %v736_v42, %v732_v27  ;;  %v857_v55 = vpop.permute.xlu1 %856 }
 0x18f   : > { %v755_v47 = vmul.f32 %v748_v30, %v742_v44  ;;  %v756_v48 = vmul.f32 %v752_v31, %v740_v43  ;;  %v905_v44 = vrot.slane %v887_v39, %v4217_v3 }
 0x191   : > { %v766_v50 = vpop.permute.xlu0 %765  ;;  %v760_v51 = vpack.c.bf16 %v758_v46, %v756_v48  ;;  %v759_v53 = vpack.c.bf16 %v757_v45, %v755_v47  ;;  %v909_v45 = vrot.slane %v887_v39, %v4222_v4 }
 0x192   : > { %v861_v5 = vpop.permute.xlu1 %860 }
 0x193   : > { %1081 = vmatprep.subr.bf16.mxu0 %v760_v51  ;;  %v864_v26 = vsel %vm5929_vm14, %v857_v55, %v861_v5  ;;  %v866_v27 = vsel %vm5929_vm14, %v861_v5, %v857_v55 }
 0x194   : > { %1082 = vmatpush1.bf16.msra.mxu0 %v759_v53  ;;  %v880_v29 = vmul.f32 %v871_v23, %v864_v26  ;;  %v881_v30 = vmul.f32 %v875_v25, %v866_v27 }
 0x195   : > { %v770_v58 = vpop.permute.xlu0 %769 }
 0x196   : > { %v774_v59 = vsel %vm773_vm12, %v766_v50, %v770_v58  ;;  %v776_v61 = vsel %vm773_vm12, %v770_v58, %v766_v50  ;;  %v891_v20 = vpop.permute.xlu1 %890 }
 0x197   : > { %v789_v0 = vmul.f32 %v782_v52, %v776_v61  ;;  %v790_v1 = vmul.f32 %v786_v54, %v774_v59 }
 0x199   : > { %v821_v6 = vpop.permute.xlu0 %820  ;;  %v794_v8 = vpack.c.bf16 %v792_v63, %v790_v1  ;;  %v793_v10 = vpack.c.bf16 %v791_v62, %v789_v0  ;;  %v939_v62 = vrot.slane %v921_v56, %v4217_v3  ;;  %v943_v63 = vrot.slane %v921_v56, %v4222_v4 }
 0x19a   : > { %v895_v28 = vpop.permute.xlu1 %894 }
 0x19b   : > { %1083 = vmatprep.subr.bf16.mxu0 %v794_v8  ;;  %v898_v47 = vsel %vm5928_vm15, %v891_v20, %v895_v28  ;;  %v900_v48 = vsel %vm5928_vm15, %v895_v28, %v891_v20  ;;  %v3778_v20 = vld [vmem:[%s5899_s4 + $0x34] ss:$8 sps:$4 sm:$0xff]  }
 0x19c   : > { %1084 = vmatpush1.bf16.msra.mxu0 %v793_v10  ;;  %v914_v53 = vmul.f32 %v905_v44, %v898_v47  ;;  %v915_v52 = vmul.f32 %v909_v45, %v900_v48 }
 0x19d   : > { %1085 = vmatprep.subr.bf16.mxu0 %v815_v36  ;;  %v825_v14 = vpop.permute.xlu0 %824 }
 0x19e   : > { %v829_v15 = vsel %vm5930_vm13, %v821_v6, %v825_v14  ;;  %v831_v16 = vsel %vm5930_vm13, %v825_v14, %v821_v6  ;;  %v925_v46 = vpop.permute.xlu1 %924  ;;  %v3769_v14 = vld [vmem:[%s5899_s4] ss:$8 sps:$4 sm:$0xff]  }
 0x19f   : > { %v844_v21 = vmul.f32 %v837_v60, %v829_v15  ;;  %v845_v22 = vmul.f32 %v841_v7, %v831_v16  ;;  %v3772_v15 = vld [vmem:[%s5899_s4 + $0x14] ss:$8 sps:$4 sm:$0xff]   ;;  %v3774_v16 = vld [vmem:[%s5899_s4 + $0x10] ss:$8 sps:$4 sm:$0xff]  }
 0x1a0   : > { %1086 = vmatpush1.bf16.msra.mxu0 %v814_v37 }
 0x1a1   : > { %v855_v32 = vpop.permute.xlu0 %854  ;;  %v849_v33 = vpack.c.bf16 %v847_v19, %v845_v22  ;;  %v848_v36 = vpack.c.bf16 %v846_v18, %v844_v21  ;;  %v3775_v18 = vld [vmem:[%s5899_s4 + $0x24] ss:$8 sps:$4 sm:$0xff]   ;;  %v3777_v19 = vld [vmem:[%s5899_s4 + $0x20] ss:$8 sps:$4 sm:$0xff]   ;;  %v3780_v21 = vld [vmem:[%s5899_s4 + $0x30] ss:$8 sps:$4 sm:$0xff]  }
 0x1a2   : > { %v929_v57 = vpop.permute.xlu1 %928 }
 0x1a3   : > { %1087 = vmatprep.subr.bf16.mxu0 %v849_v33  ;;  %v932_v0 = vsel %vm930_vm2, %v925_v46, %v929_v57  ;;  %v934_v1 = vsel %vm930_vm2, %v929_v57, %v925_v46 }
 0x1a4   : > { %1088 = vmatpush1.bf16.msra.mxu0 %v848_v36  ;;  %v948_v8 = vmul.f32 %v939_v62, %v932_v0  ;;  %v949_v10 = vmul.f32 %v943_v63, %v934_v1 }
 0x1a5   : > { %v859_v34 = vpop.permute.xlu0 %858 }
 0x1a6   : > { %v863_v35 = vsel %vm5929_vm14, %v855_v32, %v859_v34  ;;  %v865_v37 = vsel %vm5929_vm14, %v859_v34, %v855_v32  ;;  %v4523_v32 = vstv %s1150_s13 }
 0x1a7   : > { %v878_v31 = vmul.f32 %v871_v23, %v863_v35  ;;  %v879_v38 = vmul.f32 %v875_v25, %v865_v37 }
 0x1a9   : > { %v889_v40 = vpop.permute.xlu0 %888  ;;  %v883_v42 = vpack.c.bf16 %v881_v30, %v879_v38  ;;  %v882_v43 = vpack.c.bf16 %v880_v29, %v878_v31 }
 0x1ab   : > { %1089 = vmatprep.subr.bf16.mxu0 %v883_v42 }
 0x1ac   : > { %1090 = vmatpush1.bf16.msra.mxu0 %v882_v43 }
 0x1ad   : > { %v893_v49 = vpop.permute.xlu0 %892 }
 0x1ae   : > { %v897_v50 = vsel %vm5928_vm15, %v889_v40, %v893_v49  ;;  %v899_v51 = vsel %vm5928_vm15, %v893_v49, %v889_v40 }
 0x1af   : > { %v912_v54 = vmul.f32 %v905_v44, %v897_v50  ;;  %v913_v55 = vmul.f32 %v909_v45, %v899_v51 }
 0x1b1   : > { %v923_v58 = vpop.permute.xlu0 %922  ;;  %v917_v59 = vpack.c.bf16 %v915_v52, %v913_v55  ;;  %v916_v61 = vpack.c.bf16 %v914_v53, %v912_v54 }
 0x1b3   : > { %1091 = vmatprep.subr.bf16.mxu0 %v917_v59  ;;  %v996_v23 = vpop.permute.xlu1 %995 }
 0x1b4   : > { %1092 = vmatpush1.bf16.msra.mxu0 %v916_v61 }
 0x1b5   : > { %v927_v2 = vpop.permute.xlu0 %926 }
 0x1b6   : > { %v931_v5 = vsel %vm930_vm2, %v923_v58, %v927_v2  ;;  %v933_v6 = vsel %vm930_vm2, %v927_v2, %v923_v58 }
 0x1b7   : > { %v946_v60 = vmul.f32 %v939_v62, %v931_v5  ;;  %v947_v7 = vmul.f32 %v943_v63, %v933_v6  ;;  %v4537_v31 = vpop.permute.xlu1 %1000 }
 0x1b9   : > { %v951_v11 = vpack.c.bf16 %v949_v10, %v947_v7  ;;  %v950_v12 = vpack.c.bf16 %v948_v8, %v946_v60 }
 0x1bb   : > { %1093 = vmatprep.subr.bf16.mxu0 %v951_v11  ;;  %v1011_v44 = vpop.permute.xlu1 %1010 }
 0x1bc   : > { %1094 = vmatpush1.bf16.msra.mxu0 %v950_v12 }
 0x1bf   : > { %1110 = vmatmul.mubr.bf16.vlgmr.msra.gmra.mrb[0].mxu0 %v3769_v14  ;;  %v1021_v2 = vpop.permute.xlu1 %1020 }
 0x1c0   : > { %3509 = vmatprep.mubr.msk.bf16.mxu0 %vm1064_vm8, %v3772_v15 }
 0x1c6   : > { %v991_v22 = vpop.permute.xlu0 %990 }
 0x1c7   : > { %1120 = vmatmul.mubr.bf16.gmra.mrb[4].mxu0 %v3774_v16 }
 0x1c8   : > { %3510 = vmatprep.mubr.msk.bf16.mxu0 %vm1064_vm8, %v3775_v18 }
 0x1ca   : > { %v4545_v40 = vpop.permute.xlu0 %1005 }
 0x1ce   : > { %v1016_v49 = vpop.permute.xlu0 %1015 }
 0x1cf   : > { %1130 = vmatmul.mubr.bf16.gmra.mrb[8].mxu0 %v3777_v19 }
 0x1d0   : > { %3511 = vmatprep.mubr.msk.bf16.mxu0 %vm1064_vm8, %v3778_v20 }
 0x1d2   : > { %v1026_v60 = vpop.permute.xlu0 %1025 }
 0x1d7   : > { %1140 = vmatmul.mubr.bf16.gmra.mrb[12].mxu0 %v3780_v21 }
 0x292   : > { %v1111_v24 = vpop.f32.mrb[0].mxu0 }
 0x293   : > { %v1112_v33 = vadd.f32 %v1111_v24, %v991_v22  ;;  %v1113_v36 = vpop.f32.mrb[1].mxu0 }
 0x294   : > { %v1115_v25 = vpop.f32.mrb[2].mxu0  ;;  %v1114_v42 = vadd.f32 %v1113_v36, %v991_v22 }
 0x295   : > { %vm1151_vm9 = vcmp.ge.f32.partialorder %v1112_v33, 0.0  ;;  %v1168_v26 = vmul.f32 %v4523_v32, %v1112_v33  ;;  %v1116_v27 = vadd.f32 %v1115_v25, %v996_v23  ;;  %v1117_v28 = vpop.f32.mrb[3].mxu0 }
 0x296   : > { %v1118_v43 = vadd.f32 %v1117_v28, %v996_v23  ;;  %v1169_v46 = vmul.f32 %v4523_v32, %v1114_v42  ;;  %vm1152_vm2 = vcmp.ge.f32.partialorder %v1114_v42, 0.0 }
 0x297   : > { %v4526_v34 = vsel %vm1151_vm9, %v1112_v33, %v1168_v26  ;;  %vm1153_vm8 = vcmp.ge.f32.partialorder %v1116_v27, 0.0  ;;  %v1170_v35 = vmul.f32 %v4523_v32, %v1116_v27 }
 0x298   : > { %1201 = vrot.lane.b32.xlu1 %v4526_v34, %s4014_s26  ;;  %v1171_v53 = vmul.f32 %v4523_v32, %v1118_v43  ;;  %v4561_v58 = vsel %vm1152_vm2, %v1114_v42, %v1169_v46 }
 0x299   : > { %v4531_v37 = vsel %vm1153_vm8, %v1116_v27, %v1170_v35  ;;  %vm1154_vm8 = vcmp.ge.f32.partialorder %v1118_v43, 0.0 }
 0x29a   : > { %v1121_v29 = vpop.f32.mrb[4].mxu0  ;;  %1203 = vrot.lane.b32.xlu0 %v4531_v37, %s4014_s26  ;;  %v4571_v0 = vsel %vm1154_vm8, %v1118_v43, %v1171_v53 }
 0x29b   : > { %v4535_v30 = vpop.f32.mrb[5].mxu0  ;;  %v1122_v19 = vadd.f32 %v1121_v29, %v4537_v31 }
 0x29c   : > { %v4539_v38 = vpop.f32.mrb[6].mxu0  ;;  %1293 = vrot.lane.b32.xlu1 %v4526_v34, %s4016_s29  ;;  %v1124_v35 = vadd.f32 %v4535_v30, %v4537_v31 }
 0x29d   : > { %v4543_v39 = vpop.f32.mrb[7].mxu0  ;;  %v1126_v33 = vadd.f32 %v4539_v38, %v4545_v40  ;;  %v1172_v25 = vmul.f32 %v4523_v32, %v1122_v19 }
 0x29e   : > { %1295 = vrot.lane.b32.xlu0 %v4531_v37, %s4016_s29  ;;  %v1128_v29 = vadd.f32 %v4543_v39, %v4545_v40  ;;  %v1173_v38 = vmul.f32 %v4523_v32, %v1124_v35 }
 0x29f   : > { %v1174_v26 = vmul.f32 %v4523_v32, %v1126_v33  ;;  %vm1157_vm8 = vcmp.ge.f32.partialorder %v1126_v33, 0.0 }
 0x2a0   : > { %1385 = vrot.lane.b32.xlu1 %v4526_v34, %s4017_s15  ;;  %v1175_v42 = vmul.f32 %v4523_v32, %v1128_v29 }
 0x2a1   : > { %v4612_v28 = vsel %vm1157_vm8, %v1126_v33, %v1174_v26 }
 0x2a2   : > { %v1131_v45 = vpop.f32.mrb[8].mxu0  ;;  %1387 = vrot.lane.b32.xlu0 %v4531_v37, %s4017_s15 }
 0x2a3   : > { %v1132_v47 = vadd.f32 %v1131_v45, %v1011_v44  ;;  %v1133_v48 = vpop.f32.mrb[9].mxu0 }
 0x2a4   : > { %v1134_v50 = vadd.f32 %v1133_v48, %v1011_v44  ;;  %v1135_v51 = vpop.f32.mrb[10].mxu0  ;;  %1521 = vrot.lane.b32.xlu1 %v4526_v34, %s4018_s18 }
 0x2a5   : > { %vm1159_vm9 = vcmp.ge.f32.partialorder %v1132_v47, 0.0  ;;  %v1176_v52 = vmul.f32 %v4523_v32, %v1132_v47  ;;  %v1136_v54 = vadd.f32 %v1135_v51, %v1016_v49  ;;  %v1137_v55 = vpop.f32.mrb[11].mxu0 }
 0x2a6   : > { %vm1160_vm15 = vcmp.ge.f32.partialorder %v1134_v50, 0.0  ;;  %v1177_v56 = vmul.f32 %v4523_v32, %v1134_v50  ;;  %v1138_v57 = vadd.f32 %v1137_v55, %v1016_v49  ;;  %1523 = vrot.lane.b32.xlu0 %v4531_v37, %s4018_s18 }
 0x2a7   : > { %v4563_v59 = vsel %vm1159_vm9, %v1132_v47, %v1176_v52  ;;  %vm1161_vm14 = vcmp.ge.f32.partialorder %v1136_v54, 0.0  ;;  %v1178_v61 = vmul.f32 %v4523_v32, %v1136_v54  ;;  %vm1155_vm9 = vcmp.ge.f32.partialorder %v1122_v19, 0.0  ;;  %v3512_v47 = vld [vmem:[%s5897_s2 + $0x1] ss:$8 sm:$0x3] }
 0x2a8   : > { %5962 = vst [vmem:[#allocation24_spill] sm:$0xff] %v4563_v59  ;;  %v4566_v62 = vsel %vm1160_vm15, %v1134_v50, %v1177_v56  ;;  %vm1162_vm13 = vcmp.ge.f32.partialorder %v1138_v57, 0.0  ;;  %v1179_v63 = vmul.f32 %v4523_v32, %v1138_v57  ;;  %1217 = vrot.lane.b32.xlu1 %v4561_v58, %s4014_s26  ;;  %v4608_v27 = vsel %vm1155_vm9, %v1122_v19, %v1172_v25 }
 0x2a9   : > { %v4573_v1 = vsel %vm1161_vm14, %v1136_v54, %v1178_v61  ;;  %v4734_v50 = vrot.slane %v3512_v47, %v4222_v4  ;;  %v4737_v51 = vrot.slane %v3512_v47, %v4217_v3  ;;  %vm5992_vm9 = vcmp.lt.s32.totalorder %v4247_v13, 126 }
 0x2aa   : > { %v4575_v5 = vsel %vm1162_vm13, %v1138_v57, %v1179_v63  ;;  %v1141_v6 = vpop.f32.mrb[12].mxu0  ;;  %1219 = vrot.lane.b32.xlu0 %v4571_v0, %s4014_s26  ;;  %vm5993_vm8 = vmmov %vm5992_vm9 }
 0x2ab   : > { %v1142_v8 = vadd.f32 %v1141_v6, %v1021_v2  ;;  %v1143_v10 = vpop.f32.mrb[13].mxu0 }
 0x2ac   : > { %v1144_v7 = vadd.f32 %v1143_v10, %v1021_v2  ;;  %v1145_v11 = vpop.f32.mrb[14].mxu0  ;;  %1309 = vrot.lane.b32.xlu1 %v4561_v58, %s4016_s29 }
 0x2ad   : > { %vm1163_vm15 = vcmp.ge.f32.partialorder %v1142_v8, 0.0  ;;  %v1180_v12 = vmul.f32 %v4523_v32, %v1142_v8  ;;  %v1146_v14 = vadd.f32 %v1145_v11, %v1026_v60  ;;  %v1147_v15 = vpop.f32.mrb[15].mxu0  ;;  %v3516_v11 = vld [vmem:[%s5897_s2 + $0x5] ss:$8 sm:$0x3] }
 0x2ae   : > { %vm1164_vm14 = vcmp.ge.f32.partialorder %v1144_v7, 0.0  ;;  %v1181_v16 = vmul.f32 %v4523_v32, %v1144_v7  ;;  %v1148_v18 = vadd.f32 %v1147_v15, %v1026_v60  ;;  %1311 = vrot.lane.b32.xlu0 %v4571_v0, %s4016_s29  ;;  %v4778_v15 = vrot.slane %v3516_v11, %v4222_v4 }
 0x2af   : > { %v4586_v20 = vsel %vm1163_vm15, %v1142_v8, %v1180_v12  ;;  %vm1165_vm13 = vcmp.ge.f32.partialorder %v1146_v14, 0.0  ;;  %v1182_v21 = vmul.f32 %v4523_v32, %v1146_v14  ;;  %vm1156_vm15 = vcmp.ge.f32.partialorder %v1124_v35, 0.0 }
 0x2b0   : > { %5963 = vst [vmem:[#allocation25_spill] sm:$0xff] %v4586_v20  ;;  %v4589_v22 = vsel %vm1164_vm14, %v1144_v7, %v1181_v16  ;;  %vm1166_vm2 = vcmp.ge.f32.partialorder %v1148_v18, 0.0  ;;  %v1183_v24 = vmul.f32 %v4523_v32, %v1148_v18  ;;  %1401 = vrot.lane.b32.xlu1 %v4561_v58, %s4017_s15  ;;  %vm1158_vm14 = vcmp.ge.f32.partialorder %v1128_v29, 0.0 }
 0x2b1   : > { %5964 = vst [vmem:[#allocation26_spill] sm:$0xff] %v4589_v22  ;;  %v4596_v36 = vsel %vm1165_vm13, %v1146_v14, %v1182_v21  ;;  %v4634_v30 = vsel %vm1156_vm15, %v1124_v35, %v1173_v38  ;;  %v4638_v31 = vsel %vm1158_vm14, %v1128_v29, %v1175_v42  ;;  %v4775_v14 = vrot.slane %v3516_v11, %v4217_v3  ;;  %v3783_v21 = vld [vmem:[#allocation11 + $0x4] ss:$16 sps:$4 sm:$0xff]   ;;  %vm5994_vm15 = vmmov %vm5993_vm8 }
 0x2b2   : > { %5965 = vst [vmem:[#allocation27_spill] sm:$0xff] %v4596_v36  ;;  %v4598_v23 = vsel %vm1166_vm2, %v1148_v18, %v1183_v24  ;;  %1403 = vrot.lane.b32.xlu0 %v4571_v0, %s4017_s15  ;;  %2249 = vmatprep.mubr.bf16.mxu1 %v3783_v21  ;;  %vm2174_vm13 = vcmask 523264   ;;  %vm5995_vm14 = vmmov %vm5993_vm8 }
 0x2b3   : > { %5966 = vst [vmem:[#allocation28_spill] sm:$0xff] %v4598_v23 }
 0x2b4   : > { %1537 = vrot.lane.b32.xlu1 %v4561_v58, %s4018_s18 }
 0x2b6   : > { %1539 = vrot.lane.b32.xlu0 %v4571_v0, %s4018_s18 }
 0x2b8   : > { %1205 = vrot.lane.b32.xlu1 %v4608_v27, %s4014_s26 }
 0x2ba   : > { %1207 = vrot.lane.b32.xlu0 %v4612_v28, %s4014_s26 }
 0x2bc   : > { %1297 = vrot.lane.b32.xlu1 %v4608_v27, %s4016_s29 }
 0x2be   : > { %1299 = vrot.lane.b32.xlu0 %v4612_v28, %s4016_s29 }
 0x2c0   : > { %1389 = vrot.lane.b32.xlu1 %v4608_v27, %s4017_s15 }
 0x2c2   : > { %1391 = vrot.lane.b32.xlu0 %v4612_v28, %s4017_s15 }
 0x2c4   : > { %1525 = vrot.lane.b32.xlu1 %v4608_v27, %s4018_s18 }
 0x2c6   : > { %1527 = vrot.lane.b32.xlu0 %v4612_v28, %s4018_s18 }
 0x2c8   : > { %1221 = vrot.lane.b32.xlu1 %v4634_v30, %s4014_s26 }
 0x2ca   : > { %1223 = vrot.lane.b32.xlu0 %v4638_v31, %s4014_s26 }
 0x2cc   : > { %1313 = vrot.lane.b32.xlu1 %v4634_v30, %s4016_s29 }
 0x2ce   : > { %1315 = vrot.lane.b32.xlu0 %v4638_v31, %s4016_s29 }
 0x2d0   : > { %1405 = vrot.lane.b32.xlu1 %v4634_v30, %s4017_s15 }
 0x2d2   : > { %1407 = vrot.lane.b32.xlu0 %v4638_v31, %s4017_s15 }
 0x2d4   : > { %1541 = vrot.lane.b32.xlu1 %v4634_v30, %s4018_s18 }
 0x2d6   : > { %1543 = vrot.lane.b32.xlu0 %v4638_v31, %s4018_s18 }
 0x2d8   : > { %1209 = vrot.lane.b32.xlu1 %v4563_v59, %s4014_s26 }
 0x2da   : > { %1211 = vrot.lane.b32.xlu0 %v4573_v1, %s4014_s26 }
 0x2dc   : > { %1301 = vrot.lane.b32.xlu1 %v4563_v59, %s4016_s29 }
 0x2de   : > { %1303 = vrot.lane.b32.xlu0 %v4573_v1, %s4016_s29 }
 0x2e0   : > { %1393 = vrot.lane.b32.xlu1 %v4563_v59, %s4017_s15 }
 0x2e2   : > { %1395 = vrot.lane.b32.xlu0 %v4573_v1, %s4017_s15 }
 0x2e4   : > { %1225 = vrot.lane.b32.xlu1 %v4566_v62, %s4014_s26 }
 0x2e6   : > { %1227 = vrot.lane.b32.xlu0 %v4575_v5, %s4014_s26 }
 0x2e8   : > { %1317 = vrot.lane.b32.xlu1 %v4566_v62, %s4016_s29 }
 0x2ea   : > { %1319 = vrot.lane.b32.xlu0 %v4575_v5, %s4016_s29 }
 0x2ec   : > { %1409 = vrot.lane.b32.xlu1 %v4566_v62, %s4017_s15 }
 0x2ee   : > { %1411 = vrot.lane.b32.xlu0 %v4575_v5, %s4017_s15 }
 0x2f0   : > { %1213 = vrot.lane.b32.xlu1 %v4586_v20, %s4014_s26 }
 0x2f2   : > { %1215 = vrot.lane.b32.xlu0 %v4596_v36, %s4014_s26 }
 0x2f4   : > { %1305 = vrot.lane.b32.xlu1 %v4586_v20, %s4016_s29 }
 0x2f6   : > { %1307 = vrot.lane.b32.xlu0 %v4596_v36, %s4016_s29 }
 0x2f8   : > { %1397 = vrot.lane.b32.xlu1 %v4586_v20, %s4017_s15 }
 0x2fa   : > { %1399 = vrot.lane.b32.xlu0 %v4596_v36, %s4017_s15 }
 0x2fc   : > { %1229 = vrot.lane.b32.xlu1 %v4589_v22, %s4014_s26 }
 0x2fe   : > { %1231 = vrot.lane.b32.xlu0 %v4598_v23, %s4014_s26  ;;  %s3589_s26 = sld [smem:[#allocation7 + $0x1]] }
 0x300   : > { %1529 = vrot.lane.b32.xlu1 %v4563_v59, %s4018_s18 }
 0x302   : > { %1531 = vrot.lane.b32.xlu0 %v4573_v1, %s4018_s18 }
 0x304   : > { %1321 = vrot.lane.b32.xlu1 %v4589_v22, %s4016_s29 }
 0x306   : > { %1547 = vrot.lane.b32.xlu0 %v4575_v5, %s4018_s18 }
 0x308   : > { %1413 = vrot.lane.b32.xlu1 %v4589_v22, %s4017_s15 }
 0x30a   : > { %1535 = vrot.lane.b32.xlu0 %v4596_v36, %s4018_s18  ;;  %v1202_v32 = vpop.permute.xlu1 %1201 }
 0x30c   : > { %v1204_v39 = vpop.permute.xlu0 %1203  ;;  %1545 = vrot.lane.b32.xlu1 %v4566_v62, %s4018_s18 }
 0x30e   : > { %1323 = vrot.lane.b32.xlu0 %v4598_v23, %s4016_s29  ;;  %v4710_v40 = vpop.permute.xlu1 %1293 }
 0x310   : > { %v4712_v43 = vpop.permute.xlu0 %1295  ;;  %1533 = vrot.lane.b32.xlu1 %v4586_v20, %s4018_s18 }
 0x312   : > { %1615 = vrot.lane.b32.xlu0 %v4531_v37, %s4019_s16  ;;  %v4718_v44 = vpop.permute.xlu1 %1385 }
 0x314   : > { %v4720_v45 = vpop.permute.xlu0 %1387  ;;  %1549 = vrot.lane.b32.xlu1 %v4589_v22, %s4018_s18 }
 0x316   : > { %1631 = vrot.lane.b32.xlu0 %v4571_v0, %s4019_s16  ;;  %v1522_v46 = vpop.permute.xlu1 %1521 }
 0x318   : > { %v1524_v48 = vpop.permute.xlu0 %1523  ;;  %1613 = vrot.lane.b32.xlu1 %v4526_v34, %s4019_s16 }
 0x31a   : > { %1619 = vrot.lane.b32.xlu0 %v4612_v28, %s4019_s16  ;;  %v1218_v49 = vpop.permute.xlu1 %1217 }
 0x31b   : > { %v1241_v53 = vsel %vm450_vm1, %v1218_v49, %v1202_v32  ;;  %v1233_v52 = vsel %vm450_vm1, %v1202_v32, %v1218_v49 }
 0x31c   : > { %v1220_v54 = vpop.permute.xlu0 %1219  ;;  %1629 = vrot.lane.b32.xlu1 %v4561_v58, %s4019_s16  ;;  %v1261_v61 = vmul.f32 %v4734_v50, %v1233_v52  ;;  %v1260_v2 = vmul.f32 %v4737_v51, %v1241_v53 }
 0x31d   : > { %v1242_v55 = vsel %vm450_vm1, %v1220_v54, %v1204_v39  ;;  %v1234_v56 = vsel %vm450_vm1, %v1204_v39, %v1220_v54 }
 0x31e   : > { %1415 = vrot.lane.b32.xlu0 %v4598_v23, %s4017_s15  ;;  %v4751_v57 = vpop.permute.xlu1 %1309  ;;  %v1263_v63 = vmul.f32 %v4734_v50, %v1234_v56  ;;  %v1262_v6 = vmul.f32 %v4737_v51, %v1242_v55 }
 0x320   : > { %v4757_v8 = vpop.permute.xlu0 %1311  ;;  %1617 = vrot.lane.b32.xlu1 %v4608_v27, %s4019_s16  ;;  %v1277_v10 = vpack.c.bf16 %v1263_v63, %v1261_v61  ;;  %v1276_v60 = vpack.c.bf16 %v1262_v6, %v1260_v2 }
 0x322   : > { %1635 = vrot.lane.b32.xlu0 %v4638_v31, %s4019_s16  ;;  %2217 = vmatprep.subr.bf16.mxu1 %v1277_v10  ;;  %v4763_v7 = vpop.permute.xlu1 %1401 }
 0x323   : > { %2218 = vmatpush1.bf16.msra.mxu1 %v1276_v60 }
 0x324   : > { %v4768_v12 = vpop.permute.xlu0 %1403  ;;  %1633 = vrot.lane.b32.xlu1 %v4634_v30, %s4019_s16 }
 0x326   : > { %1623 = vrot.lane.b32.xlu0 %v4573_v1, %s4019_s16  ;;  %v1538_v16 = vpop.permute.xlu1 %1537 }
 0x327   : > { %v1553_v18 = vsel %vm549_vm5, %v1522_v46, %v1538_v16  ;;  %v1561_v19 = vsel %vm549_vm5, %v1538_v16, %v1522_v46 }
 0x328   : > { %v1540_v24 = vpop.permute.xlu0 %1539  ;;  %1621 = vrot.lane.b32.xlu1 %v4563_v59, %s4019_s16  ;;  %v1580_v26 = vmul.f32 %v4775_v14, %v1553_v18  ;;  %v1581_v35 = vmul.f32 %v4778_v15, %v1561_v19 }
 0x329   : > { %v1554_v33 = vsel %vm549_vm5, %v1524_v48, %v1540_v24  ;;  %v1562_v25 = vsel %vm549_vm5, %v1540_v24, %v1524_v48 }
 0x32a   : > { %v1582_v29 = vmul.f32 %v4775_v14, %v1554_v33  ;;  %v1583_v38 = vmul.f32 %v4778_v15, %v1562_v25  ;;  %1639 = vrot.lane.b32.xlu0 %v4575_v5, %s4019_s16  ;;  %v1206_v42 = vpop.permute.xlu1 %1205 }
 0x32c   : > { %v4796_v32 = vpack.c.bf16 %v1582_v29, %v1580_v26  ;;  %v1208_v39 = vpop.permute.xlu0 %1207  ;;  %1637 = vrot.lane.b32.xlu1 %v4566_v62, %s4019_s16  ;;  %v4800_v46 = vpack.c.bf16 %v1583_v38, %v1581_v35 }
 0x32e   : > { %5967 = vst [vmem:[#allocation29_spill] sm:$0xff] %v4796_v32  ;;  %5968 = vst [vmem:[#allocation30_spill] sm:$0xff] %v4800_v46  ;;  %1627 = vrot.lane.b32.xlu0 %v4596_v36, %s4019_s16  ;;  %2390 = vmatprep.subr.bf16.mxu0 %v4800_v46  ;;  %v4805_v47 = vpop.permute.xlu1 %1297 }
 0x32f   : > { %2391 = vmatpush1.bf16.msra.mxu0 %v4796_v32 }
 0x330   : > { %v4808_v48 = vpop.permute.xlu0 %1299  ;;  %1625 = vrot.lane.b32.xlu1 %v4586_v20, %s4019_s16 }
 0x332   : > { %1707 = vrot.lane.b32.xlu0 %v4531_v37, %s5969_s21  ;;  %v4814_v49 = vpop.permute.xlu1 %1389 }
 0x334   : > { %v4816_v53 = vpop.permute.xlu0 %1391  ;;  %1641 = vrot.lane.b32.xlu1 %v4589_v22, %s4019_s16 }
 0x336   : > { %1551 = vrot.lane.b32.xlu0 %v4598_v23, %s4018_s18  ;;  %v1526_v52 = vpop.permute.xlu1 %1525 }
 0x338   : > { %v1528_v54 = vpop.permute.xlu0 %1527  ;;  %1705 = vrot.lane.b32.xlu1 %v4526_v34, %s5969_s21 }
 0x33a   : > { %1723 = vrot.lane.b32.xlu0 %v4571_v0, %s5969_s21  ;;  %v1222_v55 = vpop.permute.xlu1 %1221 }
 0x33b   : > { %v1235_v56 = vsel %vm450_vm1, %v1206_v42, %v1222_v55  ;;  %v1243_v61 = vsel %vm450_vm1, %v1222_v55, %v1206_v42 }
 0x33c   : > { %v1224_v63 = vpop.permute.xlu0 %1223  ;;  %1721 = vrot.lane.b32.xlu1 %v4561_v58, %s5969_s21  ;;  %v1264_v10 = vmul.f32 %v4737_v51, %v1243_v61  ;;  %v1265_v60 = vmul.f32 %v4734_v50, %v1235_v56 }
 0x33d   : > { %v1236_v2 = vsel %vm450_vm1, %v1208_v39, %v1224_v63  ;;  %v1244_v6 = vsel %vm450_vm1, %v1224_v63, %v1208_v39 }
 0x33e   : > { %v1266_v11 = vmul.f32 %v4737_v51, %v1244_v6  ;;  %v1267_v16 = vmul.f32 %v4734_v50, %v1236_v2  ;;  %1711 = vrot.lane.b32.xlu0 %v4612_v28, %s5969_s21  ;;  %v4842_v18 = vpop.permute.xlu1 %1313 }
 0x340   : > { %v4844_v19 = vpop.permute.xlu0 %1315  ;;  %1709 = vrot.lane.b32.xlu1 %v4608_v27, %s5969_s21  ;;  %v1279_v21 = vpack.c.bf16 %v1267_v16, %v1265_v60  ;;  %v1278_v24 = vpack.c.bf16 %v1266_v11, %v1264_v10  ;;  %v3800_v60 = vld [vmem:[#allocation11 + $0xc] ss:$16 sps:$4 sm:$0xff]  }
 0x341   : > { %3575 = vmatprep.mubr.msk.bf16.mxu0 %vm2174_vm13, %v3800_v60 }
 0x342   : > { %1727 = vrot.lane.b32.xlu0 %v4638_v31, %s5969_s21  ;;  %2219 = vmatprep.subr.bf16.mxu1 %v1279_v21  ;;  %v4850_v33 = vpop.permute.xlu1 %1405 }
 0x343   : > { %2220 = vmatpush1.bf16.msra.mxu1 %v1278_v24  ;;  %v2895_v24 = vld [vmem:[%s5902_s7] sm:$0xff] }
 0x344   : > { %v4852_v25 = vpop.permute.xlu0 %1407  ;;  %1725 = vrot.lane.b32.xlu1 %v4634_v30, %s5969_s21 }
 0x346   : > { %1643 = vrot.lane.b32.xlu0 %v4598_v23, %s4019_s16  ;;  %v1542_v26 = vpop.permute.xlu1 %1541 }
 0x347   : > { %v1555_v35 = vsel %vm549_vm5, %v1526_v52, %v1542_v26  ;;  %v1563_v29 = vsel %vm549_vm5, %v1542_v26, %v1526_v52 }
 0x348   : > { %v1544_v38 = vpop.permute.xlu0 %1543  ;;  %1713 = vrot.lane.b32.xlu1 %v4563_v59, %s5969_s21  ;;  %v1584_v55 = vmul.f32 %v4775_v14, %v1555_v35  ;;  %v1585_v56 = vmul.f32 %v4778_v15, %v1563_v29 }
 0x349   : > { %v1556_v42 = vsel %vm549_vm5, %v1528_v54, %v1544_v38  ;;  %v1564_v39 = vsel %vm549_vm5, %v1544_v38, %v1528_v54  ;;  %v2896_v38 = vld [vmem:[%s5902_s7 + $0x8] sm:$0xff] }
 0x34a   : > { %v1586_v61 = vmul.f32 %v4775_v14, %v1556_v42  ;;  %v1587_v63 = vmul.f32 %v4778_v15, %v1564_v39  ;;  %1715 = vrot.lane.b32.xlu0 %v4573_v1, %s5969_s21  ;;  %v1210_v52 = vpop.permute.xlu1 %1209 }
 0x34c   : > { %v4874_v2 = vpack.c.bf16 %v1586_v61, %v1584_v55  ;;  %v1212_v6 = vpop.permute.xlu0 %1211  ;;  %1729 = vrot.lane.b32.xlu1 %v4566_v62, %s5969_s21  ;;  %v4878_v10 = vpack.c.bf16 %v1587_v63, %v1585_v56  ;;  %v2897_v56 = vld [vmem:[%s5902_s7 + $0x10] sm:$0xff] }
 0x34e   : > { %5970 = vst [vmem:[#allocation31_spill] sm:$0xff] %v4874_v2  ;;  %5971 = vst [vmem:[#allocation32_spill] sm:$0xff] %v4878_v10  ;;  %1731 = vrot.lane.b32.xlu0 %v4575_v5, %s5969_s21  ;;  %2392 = vmatprep.subr.bf16.mxu0 %v4878_v10  ;;  %v4883_v54 = vpop.permute.xlu1 %1301  ;;  %v1334_v10 = vsel %vm481_vm3, %v4757_v8, %v4712_v43 }
 0x34f   : > { %2393 = vmatpush1.bf16.msra.mxu0 %v4874_v2 }
 0x350   : > { %v4886_v11 = vpop.permute.xlu0 %1303  ;;  %1717 = vrot.lane.b32.xlu1 %v4586_v20, %s5969_s21 }
 0x352   : > { %1719 = vrot.lane.b32.xlu0 %v4596_v36, %s5969_s21  ;;  %v4893_v16 = vpop.permute.xlu1 %1393 }
 0x354   : > { %v4895_v21 = vpop.permute.xlu0 %1395  ;;  %1733 = vrot.lane.b32.xlu1 %v4589_v22, %s5969_s21 }
 0x356   : > { %1735 = vrot.lane.b32.xlu0 %v4598_v23, %s5969_s21  ;;  %v1226_v26 = vpop.permute.xlu1 %1225  ;;  %s5985_s21 = smov 127  }
 0x357   : > { %v1237_v35 = vsel %vm450_vm1, %v1210_v52, %v1226_v26  ;;  %v1245_v29 = vsel %vm450_vm1, %v1226_v26, %v1210_v52  ;;  %v2898_v26 = vld [vmem:[%s5902_s7 + $0x18] sm:$0xff] }
 0x358   : > { %v1228_v42 = vpop.permute.xlu0 %1227  ;;  %2901 = vperm.xlu1 %3768, %v2895_v24   ;;  %v1268_v61 = vmul.f32 %v4737_v51, %v1245_v29  ;;  %v1269_v63 = vmul.f32 %v4734_v50, %v1237_v35 }
 0x359   : > { %v1238_v39 = vsel %vm450_vm1, %v1212_v6, %v1228_v42  ;;  %v1246_v55 = vsel %vm450_vm1, %v1228_v42, %v1212_v6 }
 0x35a   : > { %v1270_v52 = vmul.f32 %v4737_v51, %v1246_v55  ;;  %v1271_v60 = vmul.f32 %v4734_v50, %v1238_v39  ;;  %2906 = vperm.xlu0 %3767, %v2896_v38   ;;  %v1318_v24 = vpop.permute.xlu1 %1317 }
 0x35c   : > { %v1320_v41 = vpop.permute.xlu0 %1319  ;;  %2911 = vperm.xlu1 %3768, %v2897_v56   ;;  %v1281_v6 = vpack.c.bf16 %v1271_v60, %v1269_v63  ;;  %v1280_v42 = vpack.c.bf16 %v1270_v52, %v1268_v61  ;;  %v3513_v56 = vld [vmem:[%s5897_s2 + $0x2] ss:$8 sm:$0x3]  ;;  %v1326_v63 = vsel %vm481_vm3, %v4712_v43, %v4757_v8  ;;  %v1328_v43 = vsel %vm481_vm3, %v4808_v48, %v4844_v19 }
 0x35d   : > { %v4945_v60 = vrot.slane %v3513_v56, %v4222_v4  ;;  %v4969_v23 = vrot.slane %v3513_v56, %v4217_v3  ;;  %v1333_v8 = vsel %vm481_vm3, %v4751_v57, %v4710_v40  ;;  %v1336_v56 = vsel %vm481_vm3, %v4844_v19, %v4808_v48 }
 0x35e   : > { %2916 = vperm.xlu0 %3767, %v2898_v26   ;;  %2221 = vmatprep.subr.bf16.mxu1 %v1281_v6  ;;  %v4925_v9 = vpop.permute.xlu1 %1409  ;;  %v1338_v48 = vsel %vm481_vm3, %v1320_v41, %v4886_v11 }
 0x35f   : > { %2222 = vmatpush1.bf16.msra.mxu1 %v1280_v42  ;;  %v1325_v42 = vsel %vm481_vm3, %v4710_v40, %v4751_v57  ;;  %v1355_v32 = vmul.f32 %v4945_v60, %v1326_v63  ;;  %v1359_v63 = vmul.f32 %v4945_v60, %v1328_v43  ;;  %v1362_v43 = vmul.f32 %v4969_v23, %v1338_v48 }
 0x360   : > { %v4927_v35 = vpop.permute.xlu0 %1411 }
 0x362   : > { %v1214_v29 = vpop.permute.xlu1 %1213 }
 0x364   : > { %v1216_v55 = vpop.permute.xlu0 %1215 }
 0x366   : > { %v4929_v39 = vpop.permute.xlu1 %1305 }
 0x368   : > { %v4931_v38 = vpop.permute.xlu0 %1307 }
 0x36a   : > { %v4933_v17 = vpop.permute.xlu1 %1397 }
 0x36c   : > { %v4938_v61 = vpop.permute.xlu0 %1399 }
 0x36e   : > { %v1230_v52 = vpop.permute.xlu1 %1229 }
 0x36f   : > { %v1239_v26 = vsel %vm450_vm1, %v1214_v29, %v1230_v52  ;;  %v1247_v6 = vsel %vm450_vm1, %v1230_v52, %v1214_v29 }
 0x370   : > { %v1232_v2 = vpop.permute.xlu0 %1231  ;;  %v1272_v29 = vmul.f32 %v4737_v51, %v1247_v6  ;;  %v1273_v52 = vmul.f32 %v4734_v50, %v1239_v26  ;;  %v1358_v6 = vmul.f32 %v4969_v23, %v1336_v56 }
 0x371   : > { %v1240_v46 = vsel %vm450_vm1, %v1216_v55, %v1232_v2  ;;  %v1248_v20 = vsel %vm450_vm1, %v1232_v2, %v1216_v55  ;;  %v1353_v2 = vmul.f32 %v4945_v60, %v1325_v42  ;;  %v1329_v42 = vsel %vm481_vm3, %v4883_v54, %v1318_v24 }
 0x372   : > { %v1274_v36 = vmul.f32 %v4737_v51, %v1248_v20  ;;  %v1275_v22 = vmul.f32 %v4734_v50, %v1240_v46  ;;  %v1530_v59 = vpop.permute.xlu1 %1529  ;;  %v1354_v50 = vmul.f32 %v4969_v23, %v1334_v10  ;;  %v1327_v46 = vsel %vm481_vm3, %v4805_v47, %v4842_v18 }
 0x373   : > { %v1369_v57 = vpack.c.bf16 %v1355_v32, %v1353_v2  ;;  %v1335_v10 = vsel %vm481_vm3, %v4842_v18, %v4805_v47  ;;  %v1357_v26 = vmul.f32 %v4945_v60, %v1327_v46  ;;  %v3514_v32 = vld [vmem:[%s5897_s2 + $0x3] ss:$8 sm:$0x3]  ;;  %v1337_v47 = vsel %vm481_vm3, %v1318_v24, %v4883_v54 }
 0x374   : > { %v1532_v55 = vpop.permute.xlu0 %1531  ;;  %v1283_v20 = vpack.c.bf16 %v1275_v22, %v1273_v52  ;;  %v1282_v51 = vpack.c.bf16 %v1274_v36, %v1272_v29  ;;  %v1352_v22 = vmul.f32 %v4969_v23, %v1333_v8  ;;  %v1330_v36 = vsel %vm481_vm3, %v4886_v11, %v1320_v41 }
 0x375   : > { %v1363_v18 = vmul.f32 %v4945_v60, %v1330_v36  ;;  %v1371_v11 = vpack.c.bf16 %v1359_v63, %v1357_v26  ;;  %v1356_v52 = vmul.f32 %v4969_v23, %v1335_v10  ;;  %v5018_v8 = vrot.slane %v3514_v32, %v4222_v4 }
 0x376   : > { %2223 = vmatprep.subr.bf16.mxu1 %v1283_v20  ;;  %v1322_v40 = vpop.permute.xlu1 %1321  ;;  %v1368_v29 = vpack.c.bf16 %v1354_v50, %v1352_v22  ;;  %v1417_v2 = vsel %vm512_vm4, %v4718_v44, %v4763_v7  ;;  %v1418_v54 = vsel %vm512_vm4, %v4720_v45, %v4768_v12  ;;  %v1361_v24 = vmul.f32 %v4945_v60, %v1329_v42 }
 0x377   : > { %2224 = vmatpush1.bf16.msra.mxu1 %v1282_v51  ;;  %v1360_v51 = vmul.f32 %v4969_v23, %v1337_v47  ;;  %v1370_v56 = vpack.c.bf16 %v1358_v6, %v1356_v52  ;;  %v1426_v63 = vsel %vm512_vm4, %v4768_v12, %v4720_v45  ;;  %v1339_v22 = vsel %vm481_vm3, %v1322_v40, %v4929_v39 }
 0x378   : > { %v1548_v19 = vpop.permute.xlu0 %1547  ;;  %2225 = vmatprep.subr.bf16.mxu1 %v1369_v57  ;;  %v1331_v57 = vsel %vm481_vm3, %v4929_v39, %v1322_v40  ;;  %v1373_v10 = vpack.c.bf16 %v1363_v18, %v1361_v24  ;;  %v1447_v26 = vmul.f32 %v5018_v8, %v1418_v54  ;;  %v1364_v42 = vmul.f32 %v4969_v23, %v1339_v22 }
 0x379   : > { %v1558_v50 = vsel %vm549_vm5, %v1532_v55, %v1548_v19  ;;  %v1566_v46 = vsel %vm549_vm5, %v1548_v19, %v1532_v55  ;;  %v1372_v45 = vpack.c.bf16 %v1362_v43, %v1360_v51  ;;  %v1437_v24 = vrot.slane %v3514_v32, %v4217_v3 }
 0x37a   : > { %v5013_v41 = vpop.permute.xlu1 %1413  ;;  %v1590_v12 = vmul.f32 %v4775_v14, %v1558_v50  ;;  %v1591_v19 = vmul.f32 %v4778_v15, %v1566_v46  ;;  %v1420_v51 = vsel %vm512_vm4, %v4816_v53, %v4852_v25  ;;  %vm5988_vm1 = vcmp.lt.s32.totalorder %v4247_v13, 127 }
 0x37b   : > { %2226 = vmatpush1.bf16.msra.mxu1 %v1368_v29  ;;  %v1365_v29 = vmul.f32 %v4945_v60, %v1331_v57  ;;  %v1446_v32 = vmul.f32 %v1437_v24, %v1426_v63  ;;  %v1422_v63 = vsel %vm512_vm4, %v4895_v21, %v4927_v35  ;;  %vm5991_vm2 = vmmov %vm5988_vm1 }
 0x37c   : > { %v5029_v20 = vpop.permute.xlu0 %1535  ;;  %2227 = vmatprep.subr.bf16.mxu1 %v1371_v11 }
 0x37e   : > { %v1546_v36 = vpop.permute.xlu1 %1545 }
 0x37f   : > { %v1557_v55 = vsel %vm549_vm5, %v1530_v59, %v1546_v36  ;;  %v1565_v48 = vsel %vm549_vm5, %v1546_v36, %v1530_v59  ;;  %2228 = vmatpush1.bf16.msra.mxu1 %v1370_v56  ;;  %v1419_v56 = vsel %vm512_vm4, %v4814_v49, %v4850_v33  ;;  %v1427_v36 = vsel %vm512_vm4, %v4850_v33, %v4814_v49 }
 0x380   : > { %v1588_v6 = vmul.f32 %v4775_v14, %v1557_v55  ;;  %v1589_v39 = vmul.f32 %v4778_v15, %v1565_v48  ;;  %v1324_v40 = vpop.permute.xlu0 %1323  ;;  %2229 = vmatprep.subr.bf16.mxu1 %v1373_v10  ;;  %v1430_v48 = vsel %vm512_vm4, %v4927_v35, %v4895_v21  ;;  %v3515_v21 = vld [vmem:[%s5897_s2 + $0x4] ss:$8 sm:$0x3] }
 0x381   : > { %v1332_v59 = vsel %vm481_vm3, %v4931_v38, %v1324_v40  ;;  %v1340_v47 = vsel %vm481_vm3, %v1324_v40, %v4931_v38  ;;  %v1425_v38 = vsel %vm512_vm4, %v4763_v7, %v4718_v44  ;;  %v1428_v44 = vsel %vm512_vm4, %v4852_v25, %v4816_v53 }
 0x382   : > { %v5063_v18 = vpack.c.bf16 %v1590_v12, %v1588_v6  ;;  %v1366_v11 = vmul.f32 %v4969_v23, %v1340_v47  ;;  %v1367_v52 = vmul.f32 %v4945_v60, %v1332_v59  ;;  %v5067_v43 = vpop.permute.xlu1 %1533  ;;  %v5069_v54 = vpack.c.bf16 %v1591_v19, %v1589_v39 }
 0x383   : > { %2230 = vmatpush1.bf16.msra.mxu1 %v1372_v45  ;;  %v1445_v23 = vmul.f32 %v5018_v8, %v1417_v2  ;;  %v1451_v7 = vmul.f32 %v5018_v8, %v1420_v51  ;;  %v1444_v22 = vmul.f32 %v1437_v24, %v1425_v38  ;;  %v1449_v53 = vmul.f32 %v5018_v8, %v1419_v56 }
 0x384   : > { %v5081_v60 = vpop.permute.xlu0 %1615  ;;  %2394 = vmatprep.subr.bf16.mxu0 %v5069_v54  ;;  %v1375_v50 = vpack.c.bf16 %v1367_v52, %v1365_v29  ;;  %v1374_v46 = vpack.c.bf16 %v1366_v11, %v1364_v42  ;;  %v1450_v10 = vmul.f32 %v1437_v24, %v1428_v44  ;;  %v1455_v45 = vmul.f32 %v5018_v8, %v1422_v63 }
 0x385   : > { %2395 = vmatpush1.bf16.msra.mxu0 %v5063_v18  ;;  %v1461_v57 = vpack.c.bf16 %v1447_v26, %v1445_v23  ;;  %v1421_v26 = vsel %vm512_vm4, %v4893_v16, %v4925_v9  ;;  %v1460_v55 = vpack.c.bf16 %v1446_v32, %v1444_v22  ;;  %v1463_v33 = vpack.c.bf16 %v1451_v7, %v1449_v53 }
 0x386   : > { %2231 = vmatprep.subr.bf16.mxu1 %v1375_v50  ;;  %v5094_v2 = vpop.permute.xlu1 %1549  ;;  %v1448_v12 = vmul.f32 %v1437_v24, %v1427_v36  ;;  %v1429_v19 = vsel %vm512_vm4, %v4925_v9, %v4893_v16  ;;  %v1453_v6 = vmul.f32 %v5018_v8, %v1421_v26  ;;  %v1454_v35 = vmul.f32 %v1437_v24, %v1430_v48 }
 0x387   : > { %2232 = vmatpush1.bf16.msra.mxu1 %v1374_v46  ;;  %v1452_v59 = vmul.f32 %v1437_v24, %v1429_v19  ;;  %v1423_v9 = vsel %vm512_vm4, %v4933_v17, %v5013_v41  ;;  %v1431_v16 = vsel %vm512_vm4, %v5013_v41, %v4933_v17  ;;  %v1485_v47 = vrot.slane %v3515_v21, %v4222_v4 }
 0x388   : > { %v5105_v25 = vpop.permute.xlu0 %1631  ;;  %2233 = vmatprep.subr.bf16.mxu1 %v1461_v57  ;;  %v1462_v40 = vpack.c.bf16 %v1450_v10, %v1448_v12  ;;  %v1465_v29 = vpack.c.bf16 %v1455_v45, %v1453_v6  ;;  %v1456_v50 = vmul.f32 %v1437_v24, %v1431_v16  ;;  %v1457_v46 = vmul.f32 %v5018_v8, %v1423_v9  ;;  %v5973_v6 = vld [vmem:[#allocation24_spill] sm:$0xff] }
 0x389   : > { %v1464_v38 = vpack.c.bf16 %v1454_v35, %v1452_v59  ;;  %v1491_v23 = vmul.f32 %v1485_v47, %v4571_v0  ;;  %v1481_v56 = vrot.slane %v3515_v21, %v4217_v3  ;;  %v1493_v53 = vmul.f32 %v1485_v47, %v4634_v30 }
 0x38a   : > { %v5116_v49 = vpop.permute.xlu1 %1613 }
 0x38b   : > { %2234 = vmatpush1.bf16.msra.mxu1 %v1460_v55  ;;  %v1490_v22 = vmul.f32 %v1481_v56, %v4531_v37  ;;  %v1494_v26 = vmul.f32 %v1481_v56, %v4612_v28  ;;  %v1499_v55 = vmul.f32 %v1485_v47, %v4575_v5  ;;  %v1492_v48 = vmul.f32 %v1481_v56, %v4608_v27  ;;  %v5972_v28 = vld [vmem:[#allocation28_spill] sm:$0xff]  ;;  %v5974_v27 = vld [vmem:[#allocation26_spill] sm:$0xff] }
 0x38c   : > { %v5123_v39 = vpop.permute.xlu0 %1619  ;;  %2235 = vmatprep.subr.bf16.mxu1 %v1463_v33  ;;  %v1498_v33 = vmul.f32 %v1481_v56, %v4573_v1  ;;  %v1503_v19 = vmul.f32 %v1485_v47, %v5972_v28  ;;  %v1496_v21 = vmul.f32 %v1481_v56, %v5973_v6  ;;  %v1501_v35 = vmul.f32 %v1485_v47, %v5974_v27  ;;  %v5976_v1 = vld [vmem:[#allocation25_spill] sm:$0xff] }
 0x38d   : > { %v1506_v45 = vpack.c.bf16 %v1494_v26, %v1492_v48  ;;  %v1500_v16 = vmul.f32 %v1481_v56, %v5976_v1  ;;  %v3786_v28 = vld [vmem:[#allocation11 + $0x20] ss:$16 sps:$4 sm:$0xff]  }
 0x38e   : > { %v5128_v42 = vpop.permute.xlu1 %1629  ;;  %v1511_v9 = vpack.c.bf16 %v1503_v19, %v1501_v35 }
 0x38f   : > { %2236 = vmatpush1.bf16.msra.mxu1 %v1462_v40  ;;  %v1508_v40 = vpack.c.bf16 %v1498_v33, %v1496_v21  ;;  %v5980_v21 = vld [vmem:[#allocation31_spill] sm:$0xff] }
 0x390   : > { %v1416_v11 = vpop.permute.xlu0 %1415  ;;  %2237 = vmatprep.subr.bf16.mxu1 %v1465_v29  ;;  %v5975_v29 = vld [vmem:[#allocation27_spill] sm:$0xff] }
 0x391   : > { %v1424_v52 = vsel %vm512_vm4, %v4938_v61, %v1416_v11  ;;  %v1432_v51 = vsel %vm512_vm4, %v1416_v11, %v4938_v61  ;;  %v1489_v61 = vmul.f32 %v1485_v47, %v4561_v58  ;;  %v1502_v59 = vmul.f32 %v1481_v56, %v5975_v29 }
 0x392   : > { %v1458_v17 = vmul.f32 %v1437_v24, %v1432_v51  ;;  %v1459_v41 = vmul.f32 %v5018_v8, %v1424_v52  ;;  %v5148_v32 = vpop.permute.xlu1 %1617  ;;  %v1495_v24 = vmul.f32 %v1485_v47, %v4638_v31  ;;  %v1488_v8 = vmul.f32 %v1481_v56, %v4526_v34 }
 0x393   : > { %2238 = vmatpush1.bf16.msra.mxu1 %v1464_v38  ;;  %v1505_v63 = vpack.c.bf16 %v1491_v23, %v1489_v61  ;;  %v1497_v34 = vmul.f32 %v1485_v47, %v4566_v62  ;;  %v1559_v52 = vsel %vm549_vm5, %v5067_v43, %v5094_v2  ;;  %v3517_v47 = vld [vmem:[%s5897_s2 + $0x6] ss:$8 sm:$0x3]  ;;  %v1510_v51 = vpack.c.bf16 %v1502_v59, %v1500_v16 }
 0x394   : > { %v5151_v44 = vpop.permute.xlu0 %1635  ;;  %v1467_v7 = vpack.c.bf16 %v1459_v41, %v1457_v46  ;;  %v1466_v57 = vpack.c.bf16 %v1458_v17, %v1456_v50  ;;  %v1504_v10 = vpack.c.bf16 %v1490_v22, %v1488_v8  ;;  %v1507_v37 = vpack.c.bf16 %v1495_v24, %v1493_v53  ;;  %v3781_v50 = vld [vmem:[#allocation11] ss:$16 sps:$4 sm:$0xff]   ;;  %v3784_v17 = vld [vmem:[#allocation11 + $0x24] ss:$16 sps:$4 sm:$0xff]  }
 0x395   : > { %v1509_v12 = vpack.c.bf16 %v1499_v55, %v1497_v34  ;;  %v1567_v38 = vsel %vm549_vm5, %v5094_v2, %v5067_v43  ;;  %v1653_v46 = vsel %vm580_vm6, %v5128_v42, %v5116_v49  ;;  %v1592_v41 = vmul.f32 %v4775_v14, %v1559_v52  ;;  %v5979_v55 = vld [vmem:[#allocation32_spill] sm:$0xff] }
 0x396   : > { %2239 = vmatprep.subr.bf16.mxu1 %v1467_v7  ;;  %v5155_v0 = vpop.permute.xlu1 %1633  ;;  %v5203_v56 = vrot.slane %v3517_v47, %v4222_v4  ;;  %v1593_v43 = vmul.f32 %v4778_v15, %v1567_v38  ;;  %v1654_v2 = vsel %vm580_vm6, %v5105_v25, %v5081_v60  ;;  %v5227_v26 = vrot.slane %v3517_v47, %v4217_v3 }
 0x397   : > { %2240 = vmatpush1.bf16.msra.mxu1 %v1466_v57  ;;  %v5977_v57 = vld [vmem:[#allocation30_spill] sm:$0xff] }
 0x398   : > { %v5159_v36 = vpop.permute.xlu0 %1623  ;;  %2241 = vmatprep.subr.bf16.mxu1 %v1505_v63  ;;  %v1645_v63 = vsel %vm580_vm6, %v5116_v49, %v5128_v42  ;;  %v1673_v24 = vmul.f32 %v5203_v56, %v1653_v46  ;;  %v3789_v46 = vld [vmem:[#allocation11 + $0x40] ss:$16 sps:$4 sm:$0xff]  }
 0x399   : > { %v1672_v34 = vmul.f32 %v5227_v26, %v1645_v63 }
 0x39a   : > { %v5163_v58 = vpop.permute.xlu1 %1621 }
 0x39b   : > { %2242 = vmatpush1.bf16.msra.mxu1 %v1504_v10 }
 0x39c   : > { %v5167_v31 = vpop.permute.xlu0 %1639  ;;  %2243 = vmatprep.subr.bf16.mxu1 %v1507_v37  ;;  %v5978_v37 = vld [vmem:[#allocation29_spill] sm:$0xff] }
 0x39d   : > { %v1658_v29 = vsel %vm580_vm6, %v5167_v31, %v5159_v36  ;;  %v1650_v16 = vsel %vm580_vm6, %v5159_v36, %v5167_v31  ;;  %v3518_v36 = vld [vmem:[%s5897_s2 + $0x7] ss:$8 sm:$0x3] }
 0x39e   : > { %v5171_v30 = vpop.permute.xlu1 %1637  ;;  %v1683_v52 = vmul.f32 %v5203_v56, %v1658_v29 }
 0x39f   : > { %2244 = vmatpush1.bf16.msra.mxu1 %v1506_v45  ;;  %v1656_v45 = vsel %vm580_vm6, %v5151_v44, %v5123_v39  ;;  %v1657_v6 = vsel %vm580_vm6, %v5171_v30, %v5163_v58 }
 0x3a0   : > { %v5175_v5 = vpop.permute.xlu0 %1627  ;;  %2245 = vmatprep.subr.bf16.mxu1 %v1509_v12  ;;  %v1681_v59 = vmul.f32 %v5203_v56, %v1657_v6 }
 0x3a2   : > { %v5179_v62 = vpop.permute.xlu1 %1625 }
 0x3a3   : > { %2246 = vmatpush1.bf16.msra.mxu1 %v1508_v40 }
 0x3a4   : > { %v5182_v11 = vpop.permute.xlu0 %1707  ;;  %2247 = vmatprep.subr.bf16.mxu1 %v1511_v9 }
 0x3a6   : > { %v5195_v23 = vpop.permute.xlu1 %1641 }
 0x3a7   : > { %2248 = vmatpush1.bf16.msra.mxu1 %v1510_v51  ;;  %v1651_v51 = vsel %vm580_vm6, %v5179_v62, %v5195_v23  ;;  %v1659_v31 = vsel %vm580_vm6, %v5195_v23, %v5179_v62 }
 0x3a8   : > { %v1552_v7 = vpop.permute.xlu0 %1551  ;;  %3606 = vmatprep.subr.bf16.mxu1 %v5977_v57  ;;  %v5301_v57 = vrot.slane %v3518_v36, %v4222_v4  ;;  %v1685_v62 = vmul.f32 %v5203_v56, %v1659_v31 }
 0x3a9   : > { %v1560_v61 = vsel %vm549_vm5, %v5029_v20, %v1552_v7  ;;  %v1568_v22 = vsel %vm549_vm5, %v1552_v7, %v5029_v20  ;;  %v1655_v20 = vsel %vm580_vm6, %v5155_v0, %v5148_v32  ;;  %v1684_v7 = vmul.f32 %v5227_v26, %v1651_v51 }
 0x3aa   : > { %v1594_v8 = vmul.f32 %v4775_v14, %v1560_v61  ;;  %v1595_v53 = vmul.f32 %v4778_v15, %v1568_v22  ;;  %v5224_v10 = vpop.permute.xlu1 %1705  ;;  %2250 = vmatmul.mubr.bf16.vlgmr.msra.gmra.mrb[0].mxu1 %v3781_v50  ;;  %v1646_v14 = vsel %vm580_vm6, %v5081_v60, %v5105_v25  ;;  %v1675_v15 = vmul.f32 %v5203_v56, %v1654_v2  ;;  %v3790_v2 = vld [vmem:[#allocation11 + $0x64] ss:$16 sps:$4 sm:$0xff]  }
 0x3ab   : > { %3618 = vmatpush1.bf16.msra.mxu1 %v5978_v37  ;;  %2259 = vmatprep.mubr.bf16.mxu1 %v3784_v17  ;;  %v1647_v60 = vsel %vm580_vm6, %v5148_v32, %v5155_v0  ;;  %v1677_v25 = vmul.f32 %v5203_v56, %v1655_v20  ;;  %v1674_v19 = vmul.f32 %v5227_v26, %v1646_v14 }
 0x3ac   : > { %v1602_v49 = vpack.c.bf16 %v1594_v8, %v1592_v41  ;;  %v5239_v42 = vpop.permute.xlu0 %1723  ;;  %3607 = vmatprep.subr.bf16.mxu1 %v5979_v55  ;;  %v1603_v48 = vpack.c.bf16 %v1595_v53, %v1593_v43  ;;  %v1689_v12 = vpack.c.bf16 %v1675_v15, %v1673_v24  ;;  %v1648_v32 = vsel %vm580_vm6, %v5123_v39, %v5151_v44  ;;  %v3787_v44 = vld [vmem:[#allocation11 + $0x44] ss:$16 sps:$4 sm:$0xff]  }
 0x3ad   : > { %v1679_v0 = vmul.f32 %v5203_v56, %v1656_v45  ;;  %v1688_v35 = vpack.c.bf16 %v1674_v19, %v1672_v34  ;;  %v1676_v40 = vmul.f32 %v5227_v26, %v1647_v60  ;;  %v1649_v39 = vsel %vm580_vm6, %v5163_v58, %v5171_v30  ;;  %v3792_v45 = vld [vmem:[#allocation11 + $0x60] ss:$16 sps:$4 sm:$0xff]  }
 0x3ae   : > { %2396 = vmatprep.subr.bf16.mxu0 %v1603_v48  ;;  %v1722_v33 = vpop.permute.xlu1 %1721  ;;  %v1678_v1 = vmul.f32 %v5227_v26, %v1648_v32  ;;  %v1680_v58 = vmul.f32 %v5227_v26, %v1649_v39  ;;  %v1693_v50 = vpack.c.bf16 %v1683_v52, %v1681_v59  ;;  %v1746_v23 = vsel %vm611_vm7, %v5239_v42, %v5182_v11  ;;  %v3793_v32 = vld [vmem:[#allocation11 + $0x84] ss:$16 sps:$4 sm:$0xff]   ;;  %v3795_v52 = vld [vmem:[#allocation11 + $0x80] ss:$16 sps:$4 sm:$0xff]  }
 0x3af   : > { %3619 = vmatpush1.bf16.msra.mxu1 %v5980_v21  ;;  %2397 = vmatpush1.bf16.msra.mxu0 %v1602_v49  ;;  %v1745_v17 = vsel %vm611_vm7, %v1722_v33, %v5224_v10  ;;  %v1737_v63 = vsel %vm611_vm7, %v5224_v10, %v1722_v33  ;;  %v5321_v37 = vrot.slane %v3518_v36, %v4217_v3  ;;  %v3796_v36 = vld [vmem:[#allocation11 + $0xa4] ss:$16 sps:$4 sm:$0xff]  }
 0x3b0   : > { %v5263_v27 = vpop.permute.xlu0 %1711  ;;  %3608 = vmatprep.subr.bf16.mxu1 %v5069_v54  ;;  %2398 = vmatprep.subr.bf16.mxu0 %v1689_v12  ;;  %v1691_v54 = vpack.c.bf16 %v1679_v0, %v1677_v25  ;;  %v1690_v47 = vpack.c.bf16 %v1678_v1, %v1676_v40  ;;  %v1765_v24 = vmul.f32 %v5301_v57, %v1745_v17 }
 0x3b1   : > { %v1767_v10 = vmul.f32 %v5301_v57, %v1746_v23  ;;  %v3802_v23 = vld [vmem:[#allocation11 + $0xc4] ss:$16 sps:$4 sm:$0xff]  }
 0x3b2   : > { %v1710_v9 = vpop.permute.xlu1 %1709  ;;  %2260 = vmatmul.mubr.bf16.gmra.mrb[4].mxu1 %v3786_v28 }
 0x3b3   : > { %3620 = vmatpush1.bf16.msra.mxu1 %v5063_v18  ;;  %2399 = vmatpush1.bf16.msra.mxu0 %v1688_v35  ;;  %v1682_v18 = vmul.f32 %v5227_v26, %v1650_v16  ;;  %v1781_v34 = vpack.c.bf16 %v1767_v10, %v1765_v24  ;;  %v3810_v24 = vld [vmem:[#allocation11 + $0x4c] ss:$16 sps:$4 sm:$0xff]   ;;  %v3820_v10 = vld [vmem:[#allocation11 + $0x124] ss:$16 sps:$4 sm:$0xff]  }
 0x3b4   : > { %v1728_v30 = vpop.permute.xlu0 %1727  ;;  %3609 = vmatprep.subr.bf16.mxu1 %v1603_v48  ;;  %2400 = vmatprep.subr.bf16.mxu0 %v1691_v54 }
 0x3b5   : > { %2269 = vmatprep.mubr.bf16.mxu1 %v3787_v44  ;;  %v1692_v41 = vpack.c.bf16 %v1682_v18, %v1680_v58  ;;  %v1748_v55 = vsel %vm611_vm7, %v1728_v30, %v5263_v27  ;;  %v1740_v25 = vsel %vm611_vm7, %v5263_v27, %v1728_v30 }
 0x3b6   : > { %v1726_v38 = vpop.permute.xlu1 %1725  ;;  %v1771_v33 = vmul.f32 %v5301_v57, %v1748_v55  ;;  %v1770_v29 = vmul.f32 %v5321_v37, %v1740_v25  ;;  %v3828_v55 = vld [vmem:[#allocation11 + $0xac] ss:$16 sps:$4 sm:$0xff]   ;;  %v3838_v25 = vld [vmem:[#allocation11 + $0x184] ss:$16 sps:$4 sm:$0xff]  }
 0x3b7   : > { %3621 = vmatpush1.bf16.msra.mxu1 %v1602_v49  ;;  %2401 = vmatpush1.bf16.msra.mxu0 %v1690_v47  ;;  %v1747_v14 = vsel %vm611_vm7, %v1726_v38, %v1710_v9  ;;  %v1764_v49 = vmul.f32 %v5321_v37, %v1737_v63  ;;  %v3808_v63 = vld [vmem:[#allocation11 + $0xe4] ss:$16 sps:$4 sm:$0xff]  }
 0x3b8   : > { %v1644_v43 = vpop.permute.xlu0 %1643  ;;  %3610 = vmatprep.subr.bf16.mxu1 %v1689_v12  ;;  %2402 = vmatprep.subr.bf16.mxu0 %v1693_v50 }
 0x3b9   : > { %v1652_v61 = vsel %vm580_vm6, %v5175_v5, %v1644_v43  ;;  %v1660_v22 = vsel %vm580_vm6, %v1644_v43, %v5175_v5  ;;  %v1738_v5 = vsel %vm611_vm7, %v5182_v11, %v5239_v42  ;;  %v1739_v11 = vsel %vm611_vm7, %v1710_v9, %v1726_v38 }
 0x3ba   : > { %v1686_v8 = vmul.f32 %v5227_v26, %v1652_v61  ;;  %v1687_v53 = vmul.f32 %v5203_v56, %v1660_v22  ;;  %v1714_v20 = vpop.permute.xlu1 %1713  ;;  %2270 = vmatmul.mubr.bf16.gmra.mrb[8].mxu1 %v3789_v46  ;;  %v1769_v42 = vmul.f32 %v5301_v57, %v1747_v14  ;;  %v1766_v60 = vmul.f32 %v5321_v37, %v1738_v5  ;;  %v3804_v61 = vld [vmem:[#allocation11 + $0x2c] ss:$16 sps:$4 sm:$0xff]   ;;  %v3807_v22 = vld [vmem:[#allocation11 + $0x28] ss:$16 sps:$4 sm:$0xff]   ;;  %v3818_v5 = vld [vmem:[#allocation11 + $0x100] ss:$16 sps:$4 sm:$0xff]  }
 0x3bb   : > { %3622 = vmatpush1.bf16.msra.mxu1 %v1688_v35  ;;  %2403 = vmatpush1.bf16.msra.mxu0 %v1692_v41  ;;  %v1768_v19 = vmul.f32 %v5321_v37, %v1739_v11  ;;  %v3819_v14 = vld [vmem:[#allocation11 + $0x68] ss:$16 sps:$4 sm:$0xff]   ;;  %v3830_v11 = vld [vmem:[#allocation11 + $0x140] ss:$16 sps:$4 sm:$0xff]  }
 0x3bc   : > { %v1694_v26 = vpack.c.bf16 %v1686_v8, %v1684_v7  ;;  %v1716_v15 = vpop.permute.xlu0 %1715  ;;  %3611 = vmatprep.subr.bf16.mxu1 %v1691_v54  ;;  %v1695_v56 = vpack.c.bf16 %v1687_v53, %v1685_v62  ;;  %2279 = vmatprep.mubr.bf16.mxu1 %v3790_v2  ;;  %v1780_v28 = vpack.c.bf16 %v1766_v60, %v1764_v49  ;;  %v3798_v2 = vld [vmem:[#allocation11 + $0x8] ss:$16 sps:$4 sm:$0xff]   ;;  %v3801_v62 = vld [vmem:[#allocation11 + $0xa0] ss:$16 sps:$4 sm:$0xff]   ;;  %v3826_v49 = vld [vmem:[#allocation11 + $0x144] ss:$16 sps:$4 sm:$0xff]  }
 0x3bd   : > { %v1783_v40 = vpack.c.bf16 %v1771_v33, %v1769_v42  ;;  %v1782_v9 = vpack.c.bf16 %v1770_v29, %v1768_v19  ;;  %v3812_v8 = vld [vmem:[#allocation11 + $0xe0] ss:$16 sps:$4 sm:$0xff]   ;;  %v3813_v53 = vld [vmem:[#allocation11 + $0x48] ss:$16 sps:$4 sm:$0xff]   ;;  %v3840_v33 = vld [vmem:[#allocation11 + $0xec] ss:$16 sps:$4 sm:$0xff]  }
 0x3be   : > { %2404 = vmatprep.subr.bf16.mxu0 %v1695_v56  ;;  %v1730_v48 = vpop.permute.xlu1 %1729  ;;  %v3831_v42 = vld [vmem:[#allocation11 + $0xa8] ss:$16 sps:$4 sm:$0xff]   ;;  %v3844_v19 = vld [vmem:[#allocation11 + $0x1a4] ss:$16 sps:$4 sm:$0xff]   ;;  %v3856_v29 = vld [vmem:[#allocation11 + $0x14c] ss:$16 sps:$4 sm:$0xff]  }
 0x3bf   : > { %3623 = vmatpush1.bf16.msra.mxu1 %v1690_v47  ;;  %2405 = vmatpush1.bf16.msra.mxu0 %v1694_v26  ;;  %v1749_v6 = vsel %vm611_vm7, %v1730_v48, %v1714_v20  ;;  %v1741_v39 = vsel %vm611_vm7, %v1714_v20, %v1730_v48  ;;  %v3814_v20 = vld [vmem:[#allocation11 + $0x104] ss:$16 sps:$4 sm:$0xff]   ;;  %v3837_v60 = vld [vmem:[#allocation11 + $0xc8] ss:$16 sps:$4 sm:$0xff]  }
 0x3c0   : > { %v1732_v12 = vpop.permute.xlu0 %1731  ;;  %3612 = vmatprep.subr.bf16.mxu1 %v1693_v50  ;;  %2406 = vmatprep.subr.bf16.mxu0 %v1781_v34  ;;  %v1773_v44 = vmul.f32 %v5301_v57, %v1749_v6  ;;  %v1772_v58 = vmul.f32 %v5321_v37, %v1741_v39  ;;  %v3832_v48 = vld [vmem:[#allocation11 + $0x164] ss:$16 sps:$4 sm:$0xff]   ;;  %v3846_v6 = vld [vmem:[#allocation11 + $0x10c] ss:$16 sps:$4 sm:$0xff]  }
 0x3c1   : > { %v1750_v21 = vsel %vm611_vm7, %v1732_v12, %v1716_v15  ;;  %v1742_v0 = vsel %vm611_vm7, %v1716_v15, %v1732_v12  ;;  %v3824_v15 = vld [vmem:[#allocation11 + $0x120] ss:$16 sps:$4 sm:$0xff]   ;;  %v3858_v39 = vld [vmem:[#allocation11 + $0x18c] ss:$16 sps:$4 sm:$0xff]  }
 0x3c2   : > { %v1775_v27 = vmul.f32 %v5301_v57, %v1750_v21  ;;  %v1718_v35 = vpop.permute.xlu1 %1717  ;;  %2280 = vmatmul.mubr.bf16.gmra.mrb[12].mxu1 %v3792_v45  ;;  %v1774_v54 = vmul.f32 %v5321_v37, %v1742_v0  ;;  %v3836_v45 = vld [vmem:[#allocation11 + $0x160] ss:$16 sps:$4 sm:$0xff]   ;;  %v3850_v0 = vld [vmem:[#allocation11 + $0x12c] ss:$16 sps:$4 sm:$0xff]  }
 0x3c3   : > { %3624 = vmatpush1.bf16.msra.mxu1 %v1692_v41  ;;  %2407 = vmatpush1.bf16.msra.mxu0 %v1780_v28  ;;  %v3842_v12 = vld [vmem:[#allocation11 + $0x180] ss:$16 sps:$4 sm:$0xff]  }
 0x3c4   : > { %v1720_v59 = vpop.permute.xlu0 %1719  ;;  %3613 = vmatprep.subr.bf16.mxu1 %v1695_v56  ;;  %2408 = vmatprep.subr.bf16.mxu0 %v1783_v40  ;;  %v1785_v16 = vpack.c.bf16 %v1775_v27, %v1773_v44  ;;  %v1784_v18 = vpack.c.bf16 %v1774_v54, %v1772_v58  ;;  %v3825_v56 = vld [vmem:[#allocation11 + $0x88] ss:$16 sps:$4 sm:$0xff]   ;;  %v3848_v21 = vld [vmem:[#allocation11 + $0x1a0] ss:$16 sps:$4 sm:$0xff]   ;;  %v3854_v27 = vld [vmem:[#allocation11 + $0x16c] ss:$16 sps:$4 sm:$0xff]  }
 0x3c5   : > { %2289 = vmatprep.mubr.bf16.mxu1 %v3793_v32  ;;  %v3849_v32 = vld [vmem:[#allocation11 + $0x108] ss:$16 sps:$4 sm:$0xff]   ;;  %v5981_v54 = vmov 0  }
 0x3c6   : > { %v1734_v1 = vpop.permute.xlu1 %1733  ;;  %v3860_v44 = vld [vmem:[#allocation11 + $0x148] ss:$16 sps:$4 sm:$0xff]  }
 0x3c7   : > { %v1743_v30 = vsel %vm611_vm7, %v1718_v35, %v1734_v1  ;;  %v1751_v47 = vsel %vm611_vm7, %v1734_v1, %v1718_v35  ;;  %3625 = vmatpush1.bf16.msra.mxu1 %v1694_v26  ;;  %2409 = vmatpush1.bf16.msra.mxu0 %v1782_v9  ;;  %v3822_v26 = vld [vmem:[#allocation11 + $0x8c] ss:$16 sps:$4 sm:$0xff]   ;;  %v3852_v35 = vld [vmem:[#allocation11 + $0x168] ss:$16 sps:$4 sm:$0xff]  }
 0x3c8   : > { %v1736_v51 = vpop.permute.xlu0 %1735  ;;  %3614 = vmatprep.subr.bf16.mxu1 %v1781_v34  ;;  %2410 = vmatprep.subr.bf16.mxu0 %v1785_v16  ;;  %v1776_v50 = vmul.f32 %v5321_v37, %v1743_v30  ;;  %v1777_v46 = vmul.f32 %v5301_v57, %v1751_v47  ;;  %v3834_v34 = vld [vmem:[#allocation11 + $0xcc] ss:$16 sps:$4 sm:$0xff]   ;;  %v3864_v1 = vld [vmem:[#allocation11 + $0x1a8] ss:$16 sps:$4 sm:$0xff]  }
 0x3c9   : > { %v1744_v31 = vsel %vm611_vm7, %v1720_v59, %v1736_v51  ;;  %v1752_v38 = vsel %vm611_vm7, %v1736_v51, %v1720_v59  ;;  %v3861_v59 = vld [vmem:[#allocation11 + $0x188] ss:$16 sps:$4 sm:$0xff]   ;;  %vm5989_vm7 = vmmov %vm5988_vm1 }
 0x3ca   : > { %v1778_v17 = vmul.f32 %v5321_v37, %v1744_v31  ;;  %v1779_v41 = vmul.f32 %v5301_v57, %v1752_v38  ;;  %2290 = vmatmul.mubr.bf16.gmra.mrb[16].mxu1 %v3795_v52  ;;  %v3806_v57 = vld [vmem:[#allocation11 + $0xc0] ss:$16 sps:$4 sm:$0xff]   ;;  %v3816_v37 = vld [vmem:[#allocation11 + $0x6c] ss:$16 sps:$4 sm:$0xff]  }
 0x3cb   : > { %3626 = vmatpush1.bf16.msra.mxu1 %v1780_v28  ;;  %2411 = vmatpush1.bf16.msra.mxu0 %v1784_v18  ;;  %v3843_v28 = vld [vmem:[#allocation11 + $0xe8] ss:$16 sps:$4 sm:$0xff]  }
 0x3cc   : > { %v1786_v7 = vpack.c.bf16 %v1778_v17, %v1776_v50  ;;  %3615 = vmatprep.subr.bf16.mxu1 %v1783_v40  ;;  %v1787_v43 = vpack.c.bf16 %v1779_v41, %v1777_v46  ;;  %2299 = vmatprep.mubr.bf16.mxu1 %v3796_v36  ;;  %v3855_v40 = vld [vmem:[#allocation11 + $0x128] ss:$16 sps:$4 sm:$0xff]  }
 0x3ce   : > { %2412 = vmatprep.subr.bf16.mxu0 %v1787_v43 }
 0x3cf   : > { %3627 = vmatpush1.bf16.msra.mxu1 %v1782_v9  ;;  %2413 = vmatpush1.bf16.msra.mxu0 %v1786_v7  ;;  %v3862_v9 = vld [vmem:[#allocation11 + $0x1ac] ss:$16 sps:$4 sm:$0xff]  }
 0x3d0   : > { %3616 = vmatprep.subr.bf16.mxu1 %v1785_v16 }
 0x3d2   : > { %2300 = vmatmul.mubr.bf16.gmra.mrb[20].mxu1 %v3801_v62  ;;  %2423 = vmatmul.mubr.bf16.vlgmr.msra.gmra.mrb[16].mxu0 %v3798_v2 }
 0x3d3   : > { %3628 = vmatpush1.bf16.msra.mxu1 %v1784_v18  ;;  %2309 = vmatprep.mubr.bf16.mxu1 %v3802_v23 }
 0x3d4   : > { %3617 = vmatprep.subr.bf16.mxu1 %v1787_v43  ;;  %3576 = vmatprep.mubr.msk.bf16.mxu0 %vm2174_vm13, %v3804_v61 }
 0x3d7   : > { %3629 = vmatpush1.bf16.msra.mxu1 %v1786_v7 }
 0x3da   : > { %2310 = vmatmul.mubr.bf16.gmra.mrb[24].mxu1 %v3806_v57  ;;  %2433 = vmatmul.mubr.bf16.gmra.mrb[20].mxu0 %v3807_v22 }
 0x3db   : > { %2319 = vmatprep.mubr.bf16.mxu1 %v3808_v63  ;;  %3577 = vmatprep.mubr.msk.bf16.mxu0 %vm2174_vm13, %v3810_v24 }
 0x3e2   : > { %2320 = vmatmul.mubr.bf16.gmra.mrb[28].mxu1 %v3812_v8  ;;  %2443 = vmatmul.mubr.bf16.gmra.mrb[24].mxu0 %v3813_v53 }
 0x3e3   : > { %2329 = vmatprep.mubr.bf16.mxu1 %v3814_v20  ;;  %3578 = vmatprep.mubr.msk.bf16.mxu0 %vm2174_vm13, %v3816_v37 }
 0x3ea   : > { %2330 = vmatmul.mubr.bf16.gmra.mrb[32].mxu1 %v3818_v5  ;;  %2453 = vmatmul.mubr.bf16.gmra.mrb[28].mxu0 %v3819_v14 }
 0x3eb   : > { %2339 = vmatprep.mubr.bf16.mxu1 %v3820_v10  ;;  %3579 = vmatprep.mubr.msk.bf16.mxu0 %vm2174_vm13, %v3822_v26 }
 0x3f2   : > { %2340 = vmatmul.mubr.bf16.gmra.mrb[36].mxu1 %v3824_v15  ;;  %2463 = vmatmul.mubr.bf16.gmra.mrb[32].mxu0 %v3825_v56 }
 0x3f3   : > { %2349 = vmatprep.mubr.bf16.mxu1 %v3826_v49  ;;  %3580 = vmatprep.mubr.msk.bf16.mxu0 %vm2174_vm13, %v3828_v55 }
 0x3fa   : > { %2350 = vmatmul.mubr.bf16.gmra.mrb[40].mxu1 %v3830_v11  ;;  %2473 = vmatmul.mubr.bf16.gmra.mrb[36].mxu0 %v3831_v42 }
 0x3fb   : > { %2359 = vmatprep.mubr.bf16.mxu1 %v3832_v48  ;;  %3581 = vmatprep.mubr.msk.bf16.mxu0 %vm2174_vm13, %v3834_v34 }
 0x402   : > { %2360 = vmatmul.mubr.bf16.gmra.mrb[44].mxu1 %v3836_v45  ;;  %2483 = vmatmul.mubr.bf16.gmra.mrb[40].mxu0 %v3837_v60 }
 0x403   : > { %2369 = vmatprep.mubr.bf16.mxu1 %v3838_v25  ;;  %3582 = vmatprep.mubr.msk.bf16.mxu0 %vm2174_vm13, %v3840_v33 }
 0x40a   : > { %2370 = vmatmul.mubr.bf16.gmra.mrb[48].mxu1 %v3842_v12  ;;  %2493 = vmatmul.mubr.bf16.gmra.mrb[44].mxu0 %v3843_v28 }
 0x40b   : > { %2379 = vmatprep.mubr.bf16.mxu1 %v3844_v19  ;;  %3583 = vmatprep.mubr.msk.bf16.mxu0 %vm2174_vm13, %v3846_v6 }
 0x412   : > { %2380 = vmatmul.mubr.bf16.gmra.mrb[52].mxu1 %v3848_v21  ;;  %2503 = vmatmul.mubr.bf16.gmra.mrb[48].mxu0 %v3849_v32 }
 0x413   : > { %3584 = vmatprep.mubr.msk.bf16.mxu0 %vm2174_vm13, %v3850_v0  ;;  %3586 = vmatprep.mubr.msk.bf16.mxu1 %vm2174_vm13, %v3854_v27 }
 0x41a   : > { %2513 = vmatmul.mubr.bf16.gmra.mrb[52].mxu0 %v3855_v40  ;;  %2533 = vmatmul.mubr.bf16.vlgmr.msra.gmra.mrb[44].mxu1 %v3852_v35 }
 0x41b   : > { %3585 = vmatprep.mubr.msk.bf16.mxu0 %vm2174_vm13, %v3856_v29  ;;  %3587 = vmatprep.mubr.msk.bf16.mxu1 %vm2174_vm13, %v3858_v39 }
 0x422   : > { %2523 = vmatmul.mubr.bf16.gmra.mrb[56].mxu0 %v3860_v44  ;;  %2543 = vmatmul.mubr.bf16.gmra.mrb[48].mxu1 %v3861_v59 }
 0x423   : > { %3588 = vmatprep.mubr.msk.bf16.mxu1 %vm2174_vm13, %v3862_v9  ;;  %3012 = vmatprep.mubr.bf16.mxu0 %v5981_v54  ;;  %vm5996_vm13 = vmmov %vm5988_vm1 }
 0x42a   : > { %2553 = vmatmul.mubr.bf16.gmra.mrb[52].mxu1 %v3864_v1 }
 0x47d   : > { %v2251_v16 = vpop.f32.mrb[0].mxu1 }
 0x47e   : > { %v2253_v52 = vpop.f32.mrb[1].mxu1 }
 0x47f   : > { %v2255_v58 = vpop.f32.mrb[2].mxu1 }
 0x480   : > { %v2257_v30 = vpop.f32.mrb[3].mxu1 }
 0x485   : > { %v2261_v47 = vpop.f32.mrb[4].mxu1 }
 0x486   : > { %v2263_v51 = vpop.f32.mrb[5].mxu1 }
 0x487   : > { %v2265_v36 = vpop.f32.mrb[6].mxu1 }
 0x488   : > { %v2267_v18 = vpop.f32.mrb[7].mxu1 }
 0x48d   : > { %v2271_v31 = vpop.f32.mrb[8].mxu1 }
 0x48e   : > { %v2273_v38 = vpop.f32.mrb[9].mxu1 }
 0x48f   : > { %v2275_v50 = vpop.f32.mrb[10].mxu1 }
 0x490   : > { %v2277_v46 = vpop.f32.mrb[11].mxu1 }
 0x495   : > { %v2281_v17 = vpop.f32.mrb[12].mxu1 }
 0x496   : > { %v2283_v41 = vpop.f32.mrb[13].mxu1 }
 0x497   : > { %v2285_v7 = vpop.f32.mrb[14].mxu1 }
 0x498   : > { %v5382_v43 = vpop.f32.mrb[15].mxu1 }
 0x49d   : > { %v5384_v2 = vpop.f32.mrb[16].mxu1 }
 0x49e   : > { %v5386_v62 = vpop.f32.mrb[17].mxu1 }
 0x49f   : > { %v5388_v23 = vpop.f32.mrb[18].mxu1 }
 0x4a0   : > { %v5390_v61 = vpop.f32.mrb[19].mxu1 }
 0x4a5   : > { %v2424_v57 = vpop.f32.mrb[16].mxu0  ;;  %v5392_v22 = vpop.f32.mrb[20].mxu1 }
 0x4a6   : > { %v2425_v63 = vadd.f32 %v2424_v57, %v2251_v16  ;;  %v2426_v24 = vpop.f32.mrb[17].mxu0  ;;  %v5394_v8 = vpop.f32.mrb[21].mxu1 }
 0x4a7   : > { %v2427_v53 = vadd.f32 %v2426_v24, %v2253_v52  ;;  %v2428_v20 = vpop.f32.mrb[18].mxu0  ;;  %v5396_v37 = vpop.f32.mrb[22].mxu1 }
 0x4a8   : > { %v2429_v5 = vadd.f32 %v2428_v20, %v2255_v58  ;;  %v2430_v14 = vpop.f32.mrb[19].mxu0  ;;  %2564 = vrot.lane.b32.xlu1 %v2425_v63, %s5982_s28  ;;  %v5399_v10 = vpop.f32.mrb[23].mxu1 }
 0x4a9   : > { %v2431_v26 = vadd.f32 %v2430_v14, %v2257_v30 }
 0x4aa   : > { %2566 = vrot.lane.b32.xlu0 %v2429_v5, %s5982_s28 }
 0x4ac   : > { %2572 = vrot.lane.b32.xlu1 %v2427_v53, %s5982_s28 }
 0x4ad   : > { %v2434_v15 = vpop.f32.mrb[20].mxu0  ;;  %v5403_v56 = vpop.f32.mrb[24].mxu1 }
 0x4ae   : > { %v2435_v49 = vadd.f32 %v2434_v15, %v2261_v47  ;;  %v2436_v55 = vpop.f32.mrb[21].mxu0  ;;  %2574 = vrot.lane.b32.xlu0 %v2431_v26, %s5982_s28  ;;  %v5406_v11 = vpop.f32.mrb[25].mxu1 }
 0x4af   : > { %v2437_v42 = vadd.f32 %v2436_v55, %v2263_v51  ;;  %v2438_v48 = vpop.f32.mrb[22].mxu0  ;;  %v5408_v34 = vpop.f32.mrb[26].mxu1 }
 0x4b0   : > { %v2439_v45 = vadd.f32 %v2438_v48, %v2265_v36  ;;  %v2440_v60 = vpop.f32.mrb[23].mxu0  ;;  %2568 = vrot.lane.b32.xlu1 %v2435_v49, %s5982_s28  ;;  %v5411_v25 = vpop.f32.mrb[27].mxu1 }
 0x4b1   : > { %v2441_v33 = vadd.f32 %v2440_v60, %v2267_v18 }
 0x4b2   : > { %2570 = vrot.lane.b32.xlu0 %v2439_v45, %s5982_s28 }
 0x4b4   : > { %2576 = vrot.lane.b32.xlu1 %v2437_v42, %s5982_s28 }
 0x4b5   : > { %v2444_v12 = vpop.f32.mrb[24].mxu0  ;;  %v5415_v28 = vpop.f32.mrb[28].mxu1 }
 0x4b6   : > { %v2445_v19 = vadd.f32 %v2444_v12, %v2271_v31  ;;  %v2446_v6 = vpop.f32.mrb[25].mxu0  ;;  %2578 = vrot.lane.b32.xlu0 %v2441_v33, %s5982_s28  ;;  %v5418_v21 = vpop.f32.mrb[29].mxu1 }
 0x4b7   : > { %v2447_v32 = vadd.f32 %v2446_v6, %v2273_v38  ;;  %v2448_v0 = vpop.f32.mrb[26].mxu0  ;;  %v5420_v27 = vpop.f32.mrb[30].mxu1 }
 0x4b8   : > { %v2449_v35 = vadd.f32 %v2448_v0, %v2275_v50  ;;  %v2450_v40 = vpop.f32.mrb[27].mxu0  ;;  %2608 = vrot.lane.b32.xlu1 %v2445_v19, %s5983_s27  ;;  %v5423_v29 = vpop.f32.mrb[31].mxu1 }
 0x4b9   : > { %v2451_v39 = vadd.f32 %v2450_v40, %v2277_v46 }
 0x4ba   : > { %2610 = vrot.lane.b32.xlu0 %v2449_v35, %s5983_s27 }
 0x4bc   : > { %2616 = vrot.lane.b32.xlu1 %v2447_v32, %s5983_s27 }
 0x4bd   : > { %v2454_v44 = vpop.f32.mrb[28].mxu0  ;;  %v5427_v59 = vpop.f32.mrb[32].mxu1 }
 0x4be   : > { %v2455_v9 = vadd.f32 %v2454_v44, %v2281_v17  ;;  %v2456_v1 = vpop.f32.mrb[29].mxu0  ;;  %2618 = vrot.lane.b32.xlu0 %v2451_v39, %s5983_s27  ;;  %v5430_v16 = vpop.f32.mrb[33].mxu1 }
 0x4bf   : > { %v2457_v52 = vadd.f32 %v2456_v1, %v2283_v41  ;;  %v2458_v58 = vpop.f32.mrb[30].mxu0  ;;  %v2335_v30 = vpop.f32.mrb[34].mxu1 }
 0x4c0   : > { %v2459_v47 = vadd.f32 %v2458_v58, %v2285_v7  ;;  %v2460_v51 = vpop.f32.mrb[31].mxu0  ;;  %2612 = vrot.lane.b32.xlu1 %v2455_v9, %s5983_s27  ;;  %v2337_v36 = vpop.f32.mrb[35].mxu1 }
 0x4c1   : > { %v2461_v18 = vadd.f32 %v2460_v51, %v5382_v43 }
 0x4c2   : > { %2614 = vrot.lane.b32.xlu0 %v2459_v47, %s5983_s27 }
 0x4c4   : > { %2620 = vrot.lane.b32.xlu1 %v2457_v52, %s5983_s27 }
 0x4c5   : > { %v2464_v31 = vpop.f32.mrb[32].mxu0  ;;  %v2341_v38 = vpop.f32.mrb[36].mxu1 }
 0x4c6   : > { %v2465_v50 = vadd.f32 %v2464_v31, %v5384_v2  ;;  %v2466_v46 = vpop.f32.mrb[33].mxu0  ;;  %2622 = vrot.lane.b32.xlu0 %v2461_v18, %s5983_s27  ;;  %v2343_v17 = vpop.f32.mrb[37].mxu1 }
 0x4c7   : > { %v2467_v41 = vadd.f32 %v2466_v46, %v5386_v62  ;;  %v2468_v7 = vpop.f32.mrb[34].mxu0  ;;  %v2345_v57 = vpop.f32.mrb[38].mxu1 }
 0x4c8   : > { %v2469_v63 = vadd.f32 %v2468_v7, %v5388_v23  ;;  %v2470_v24 = vpop.f32.mrb[35].mxu0  ;;  %2660 = vrot.lane.b32.xlu1 %v2465_v50, %s5984_s14  ;;  %v2347_v43 = vpop.f32.mrb[39].mxu1 }
 0x4c9   : > { %v2471_v53 = vadd.f32 %v2470_v24, %v5390_v61 }
 0x4ca   : > { %2662 = vrot.lane.b32.xlu0 %v2469_v63, %s5984_s14 }
 0x4cc   : > { %2668 = vrot.lane.b32.xlu1 %v2467_v41, %s5984_s14 }
 0x4cd   : > { %v2474_v2 = vpop.f32.mrb[36].mxu0  ;;  %v2351_v20 = vpop.f32.mrb[40].mxu1 }
 0x4ce   : > { %v2475_v5 = vadd.f32 %v2474_v2, %v5392_v22  ;;  %v2476_v14 = vpop.f32.mrb[37].mxu0  ;;  %2670 = vrot.lane.b32.xlu0 %v2471_v53, %s5984_s14  ;;  %v2353_v62 = vpop.f32.mrb[41].mxu1 }
 0x4cf   : > { %v2477_v23 = vadd.f32 %v2476_v14, %v5394_v8  ;;  %v2478_v26 = vpop.f32.mrb[38].mxu0  ;;  %v2355_v15 = vpop.f32.mrb[42].mxu1 }
 0x4d0   : > { %v2479_v49 = vadd.f32 %v2478_v26, %v5396_v37  ;;  %v2480_v55 = vpop.f32.mrb[39].mxu0  ;;  %2664 = vrot.lane.b32.xlu1 %v2475_v5, %s5984_s14  ;;  %v2357_v61 = vpop.f32.mrb[43].mxu1  ;;  %v2959_v26 = vld [vmem:[%s5904_s9] sm:$0xff] }
 0x4d1   : > { %v2481_v42 = vadd.f32 %v2480_v55, %v5399_v10 }
 0x4d2   : > { %2666 = vrot.lane.b32.xlu0 %v2479_v49, %s5984_s14  ;;  %v2960_v49 = vld [vmem:[%s5904_s9 + $0x8] sm:$0xff] }
 0x4d4   : > { %2672 = vrot.lane.b32.xlu1 %v2477_v23, %s5984_s14  ;;  %v5502_v23 = vpop.permute.xlu0 %2906 }
 0x4d5   : > { %v2484_v22 = vpop.f32.mrb[40].mxu0 }
 0x4d6   : > { %v5453_v48 = vadd.f32 %v2484_v22, %v5403_v56  ;;  %v2486_v45 = vpop.f32.mrb[41].mxu0  ;;  %2674 = vrot.lane.b32.xlu0 %v2481_v42, %s5984_s14 }
 0x4d7   : > { %v5457_v8 = vadd.f32 %v2486_v45, %v5406_v11  ;;  %v2488_v37 = vpop.f32.mrb[42].mxu0 }
 0x4d8   : > { %v5460_v60 = vadd.f32 %v2488_v37, %v5408_v34  ;;  %v2490_v33 = vpop.f32.mrb[43].mxu0  ;;  %v5515_v55 = vpop.permute.xlu0 %2916 }
 0x4d9   : > { %v5463_v10 = vadd.f32 %v2490_v33, %v5411_v25 }
 0x4dd   : > { %v2494_v12 = vpop.f32.mrb[44].mxu0 }
 0x4de   : > { %v5466_v19 = vadd.f32 %v2494_v12, %v5415_v28  ;;  %v2496_v56 = vpop.f32.mrb[45].mxu0 }
 0x4df   : > { %v5469_v6 = vadd.f32 %v2496_v56, %v5418_v21  ;;  %v2498_v32 = vpop.f32.mrb[46].mxu0 }
 0x4e0   : > { %v5472_v11 = vadd.f32 %v2498_v32, %v5420_v27  ;;  %v2500_v0 = vpop.f32.mrb[47].mxu0 }
 0x4e1   : > { %v5475_v34 = vadd.f32 %v2500_v0, %v5423_v29 }
 0x4e5   : > { %v2504_v35 = vpop.f32.mrb[48].mxu0 }
 0x4e6   : > { %v2505_v25 = vadd.f32 %v2504_v35, %v5427_v59  ;;  %v2506_v40 = vpop.f32.mrb[49].mxu0 }
 0x4e7   : > { %v2507_v39 = vadd.f32 %v2506_v40, %v5430_v16  ;;  %v2508_v28 = vpop.f32.mrb[50].mxu0 }
 0x4e8   : > { %v2509_v44 = vadd.f32 %v2508_v28, %v2335_v30  ;;  %v2510_v9 = vpop.f32.mrb[51].mxu0  ;;  %2740 = vrot.lane.b32.xlu1 %v2505_v25, %s5985_s21 }
 0x4e9   : > { %v2511_v21 = vadd.f32 %v2510_v9, %v2337_v36 }
 0x4ea   : > { %2742 = vrot.lane.b32.xlu0 %v2509_v44, %s5985_s21 }
 0x4ec   : > { %2748 = vrot.lane.b32.xlu1 %v2507_v39, %s5985_s21 }
 0x4ed   : > { %v2514_v27 = vpop.f32.mrb[52].mxu0  ;;  %v2534_v1 = vpop.f32.mrb[44].mxu1 }
 0x4ee   : > { %v2515_v29 = vadd.f32 %v2514_v27, %v2341_v38  ;;  %v2516_v52 = vpop.f32.mrb[53].mxu0  ;;  %2750 = vrot.lane.b32.xlu0 %v2511_v21, %s5985_s21  ;;  %v2536_v59 = vpop.f32.mrb[45].mxu1 }
 0x4ef   : > { %v2517_v58 = vadd.f32 %v2516_v52, %v2343_v17  ;;  %v2518_v47 = vpop.f32.mrb[54].mxu0  ;;  %v2538_v16 = vpop.f32.mrb[46].mxu1  ;;  %v2607_v52 = vld [vmem:[#allocation8 + $0x2] ss:$8 sm:$0x3] }
 0x4f0   : > { %v2519_v51 = vadd.f32 %v2518_v47, %v2345_v57  ;;  %v2520_v30 = vpop.f32.mrb[55].mxu0  ;;  %2744 = vrot.lane.b32.xlu1 %v2515_v29, %s5985_s21  ;;  %v2540_v18 = vpop.f32.mrb[47].mxu1  ;;  %v2636_v47 = vrot.slane %v2607_v52, %v4217_v3 }
 0x4f1   : > { %v2521_v36 = vadd.f32 %v2520_v30, %v2347_v43  ;;  %v2711_v30 = vld [vmem:[#allocation8 + $0x4] ss:$8 sm:$0x3] }
 0x4f2   : > { %2746 = vrot.lane.b32.xlu0 %v2519_v51, %s5985_s21 }
 0x4f4   : > { %2752 = vrot.lane.b32.xlu1 %v2517_v58, %s5985_s21  ;;  %v2563_v58 = vld [vmem:[#allocation8 + $0x1] ss:$8 sm:$0x3] }
 0x4f5   : > { %v2524_v31 = vpop.f32.mrb[56].mxu0  ;;  %v2544_v50 = vpop.f32.mrb[48].mxu1 }
 0x4f6   : > { %v2525_v38 = vadd.f32 %v2524_v31, %v2351_v20  ;;  %v2526_v46 = vpop.f32.mrb[57].mxu0  ;;  %2754 = vrot.lane.b32.xlu0 %v2521_v36, %s5985_s21  ;;  %v2546_v41 = vpop.f32.mrb[49].mxu1  ;;  %v2592_v31 = vrot.slane %v2563_v58, %v4217_v3 }
 0x4f7   : > { %v2527_v17 = vadd.f32 %v2526_v46, %v2353_v62  ;;  %v2528_v7 = vpop.f32.mrb[58].mxu0  ;;  %v2548_v63 = vpop.f32.mrb[50].mxu1 }
 0x4f8   : > { %v2529_v57 = vadd.f32 %v2528_v7, %v2355_v15  ;;  %v2530_v24 = vpop.f32.mrb[59].mxu0  ;;  %2792 = vrot.lane.b32.xlu1 %v2525_v38, %s5986_s30  ;;  %v2550_v53 = vpop.f32.mrb[51].mxu1  ;;  %v5554_v7 = vrot.slane %v2711_v30, %v4217_v3 }
 0x4f9   : > { %v2531_v43 = vadd.f32 %v2530_v24, %v2357_v61  ;;  %v5499_v62 = vpop.permute.xlu1 %2901 }
 0x4fa   : > { %2794 = vrot.lane.b32.xlu0 %v2529_v57, %s5986_s30 }
 0x4fc   : > { %2800 = vrot.lane.b32.xlu1 %v2527_v17, %s5986_s30  ;;  %v2659_v17 = vld [vmem:[#allocation8 + $0x3] ss:$8 sm:$0x3] }
 0x4fd   : > { %v2554_v2 = vpop.f32.mrb[52].mxu1  ;;  %v5509_v15 = vpop.permute.xlu1 %2911 }
 0x4fe   : > { %v2556_v5 = vpop.f32.mrb[53].mxu1  ;;  %2802 = vrot.lane.b32.xlu0 %v2531_v43, %s5986_s30 }
 0x4ff   : > { %v2558_v20 = vpop.f32.mrb[54].mxu1 }
 0x500   : > { %2796 = vrot.lane.b32.xlu1 %v2534_v1, %s5986_s30  ;;  %v2560_v14 = vpop.f32.mrb[55].mxu1 }
 0x502   : > { %2798 = vrot.lane.b32.xlu0 %v2538_v16, %s5986_s30  ;;  %v2640_v16 = vrot.slane %v2607_v52, %v4222_v4 }
 0x504   : > { %2804 = vrot.lane.b32.xlu1 %v2536_v59, %s5986_s30 }
 0x506   : > { %2806 = vrot.lane.b32.xlu0 %v2540_v18, %s5986_s30 }
 0x508   : > { %2844 = vrot.lane.b32.xlu1 %v2544_v50, %s5987_s23  ;;  %v2596_v50 = vrot.slane %v2563_v58, %v4222_v4 }
 0x50a   : > { %2846 = vrot.lane.b32.xlu0 %v2548_v63, %s5987_s23  ;;  %v5557_v63 = vrot.slane %v2711_v30, %v4222_v4 }
 0x50c   : > { %2852 = vrot.lane.b32.xlu1 %v2546_v41, %s5987_s23 }
 0x50e   : > { %2854 = vrot.lane.b32.xlu0 %v2550_v53, %s5987_s23 }
 0x510   : > { %2848 = vrot.lane.b32.xlu1 %v2554_v2, %s5987_s23 }
 0x512   : > { %2850 = vrot.lane.b32.xlu0 %v2558_v20, %s5987_s23 }
 0x514   : > { %2856 = vrot.lane.b32.xlu1 %v2556_v5, %s5987_s23 }
 0x516   : > { %2858 = vrot.lane.b32.xlu0 %v2560_v14, %s5987_s23 }
 0x518   : > { %2963 = vperm.xlu1 %3768, %v2959_v26   ;;  %v2688_v26 = vrot.slane %v2659_v17, %v4217_v3 }
 0x51a   : > { %v2565_v61 = vpop.permute.xlu1 %2564  ;;  %2968 = vperm.xlu0 %3767, %v2960_v49   ;;  %v2692_v49 = vrot.slane %v2659_v17, %v4222_v4 }
 0x51c   : > { %v2567_v42 = vpop.permute.xlu0 %2566 }
 0x51e   : > { %v2573_v22 = vpop.permute.xlu1 %2572 }
 0x51f   : > { %v2580_v45 = vsel %vm705_vm10, %v2565_v61, %v2573_v22  ;;  %v2584_v37 = vsel %vm705_vm10, %v2573_v22, %v2565_v61  ;;  %v2723_v22 = vmul.f32 %v5554_v7, %v5453_v48 }
 0x520   : > { %v2575_v33 = vpop.permute.xlu0 %2574  ;;  %v2599_v5 = vmul.f32 %v2592_v31, %v2584_v37  ;;  %v2600_v20 = vmul.f32 %v2596_v50, %v2580_v45 }
 0x521   : > { %v2581_v12 = vsel %vm705_vm10, %v2567_v42, %v2575_v33  ;;  %v2585_v56 = vsel %vm705_vm10, %v2575_v33, %v2567_v42  ;;  %v2724_v33 = vmul.f32 %v5557_v63, %v5457_v8 }
 0x522   : > { %v2569_v32 = vpop.permute.xlu1 %2568  ;;  %v2601_v61 = vmul.f32 %v2592_v31, %v2585_v56  ;;  %v2602_v42 = vmul.f32 %v2596_v50, %v2581_v12 }
 0x524   : > { %v2571_v0 = vpop.permute.xlu0 %2570 }
 0x526   : > { %v2577_v35 = vpop.permute.xlu1 %2576 }
 0x527   : > { %v5527_v25 = vsel %vm705_vm10, %v2569_v32, %v2577_v35  ;;  %v5531_v40 = vsel %vm705_vm10, %v2577_v35, %v2569_v32 }
 0x528   : > { %v2579_v39 = vpop.permute.xlu0 %2578 }
 0x529   : > { %v5535_v28 = vsel %vm705_vm10, %v2571_v0, %v2579_v39  ;;  %v5539_v44 = vsel %vm705_vm10, %v2579_v39, %v2571_v0  ;;  %vm5990_vm10 = vmmov %vm5988_vm1 }
 0x52a   : > { %v2609_v9 = vpop.permute.xlu1 %2608 }
 0x52c   : > { %v2611_v21 = vpop.permute.xlu0 %2610 }
 0x52e   : > { %v2617_v27 = vpop.permute.xlu1 %2616 }
 0x52f   : > { %v2624_v18 = vsel %vm739_vm11, %v2609_v9, %v2617_v27  ;;  %v2628_v36 = vsel %vm739_vm11, %v2617_v27, %v2609_v9 }
 0x530   : > { %v2619_v1 = vpop.permute.xlu0 %2618  ;;  %v2643_v57 = vmul.f32 %v2636_v47, %v2628_v36  ;;  %v2644_v24 = vmul.f32 %v2640_v16, %v2624_v18 }
 0x531   : > { %v2625_v38 = vsel %vm739_vm11, %v2611_v21, %v2619_v1  ;;  %v2629_v46 = vsel %vm739_vm11, %v2619_v1, %v2611_v21 }
 0x532   : > { %v2613_v29 = vpop.permute.xlu1 %2612  ;;  %v2645_v43 = vmul.f32 %v2636_v47, %v2629_v46  ;;  %v2646_v2 = vmul.f32 %v2640_v16, %v2625_v38  ;;  %v2651_v32 = vadd.f32 %v2643_v57, %v2599_v5  ;;  %v2652_v0 = vadd.f32 %v2644_v24, %v2600_v20 }
 0x533   : > { %v2726_v46 = vmul.f32 %v5557_v63, %v5463_v10  ;;  %v2728_v5 = vmul.f32 %v5557_v63, %v5469_v6  ;;  %v2604_v10 = vmul.f32 %v2596_v50, %v5527_v25 }
 0x534   : > { %v2615_v59 = vpop.permute.xlu0 %2614  ;;  %v2653_v39 = vadd.f32 %v2645_v43, %v2601_v61  ;;  %v2654_v9 = vadd.f32 %v2646_v2, %v2602_v42  ;;  %v2727_v2 = vmul.f32 %v5554_v7, %v5466_v19 }
 0x536   : > { %v2621_v51 = vpop.permute.xlu1 %2620 }
 0x537   : > { %v2626_v12 = vsel %vm739_vm11, %v2613_v29, %v2621_v51  ;;  %v2630_v48 = vsel %vm739_vm11, %v2621_v51, %v2613_v29  ;;  %v2725_v51 = vmul.f32 %v5554_v7, %v5460_v60 }
 0x538   : > { %v2623_v41 = vpop.permute.xlu0 %2622  ;;  %v2647_v17 = vmul.f32 %v2636_v47, %v2630_v48  ;;  %v2648_v57 = vmul.f32 %v2640_v16, %v2626_v12  ;;  %v2730_v12 = vmul.f32 %v5557_v63, %v5475_v34 }
 0x539   : > { %v2627_v27 = vsel %vm739_vm11, %v2615_v59, %v2623_v41  ;;  %v2631_v1 = vsel %vm739_vm11, %v2623_v41, %v2615_v59 }
 0x53a   : > { %v2661_v53 = vpop.permute.xlu1 %2660  ;;  %v2649_v20 = vmul.f32 %v2636_v47, %v2631_v1  ;;  %v2650_v60 = vmul.f32 %v2640_v16, %v2627_v27  ;;  %v2656_v16 = vadd.f32 %v2648_v57, %v2604_v10  ;;  %v2791_v57 = vld [vmem:[#allocation8 + $0x6] ss:$8 sm:$0x3] }
 0x53c   : > { %v2663_v14 = vpop.permute.xlu0 %2662 }
 0x53e   : > { %v2669_v35 = vpop.permute.xlu1 %2668 }
 0x53f   : > { %v2676_v45 = vsel %vm773_vm12, %v2661_v53, %v2669_v35  ;;  %v2680_v37 = vsel %vm773_vm12, %v2669_v35, %v2661_v53 }
 0x540   : > { %v2695_v56 = vmul.f32 %v2688_v26, %v2680_v37  ;;  %v2696_v21 = vmul.f32 %v2692_v49, %v2676_v45  ;;  %v2671_v8 = vpop.permute.xlu0 %2670  ;;  %v2729_v37 = vmul.f32 %v5554_v7, %v5472_v11 }
 0x541   : > { %v2677_v52 = vsel %vm773_vm12, %v2663_v14, %v2671_v8  ;;  %v2681_v58 = vsel %vm773_vm12, %v2671_v8, %v2663_v14  ;;  %v2603_v14 = vmul.f32 %v2592_v31, %v5531_v40 }
 0x542   : > { %v2703_v30 = vadd.f32 %v2695_v56, %v2651_v32  ;;  %v2704_v18 = vadd.f32 %v2696_v21, %v2652_v0  ;;  %v2697_v36 = vmul.f32 %v2688_v26, %v2681_v58  ;;  %v2698_v38 = vmul.f32 %v2692_v49, %v2677_v52  ;;  %v2665_v29 = vpop.permute.xlu1 %2664 }
 0x543   : > { %v2655_v47 = vadd.f32 %v2647_v17, %v2603_v14  ;;  %v2824_v14 = vrot.slane %v2791_v57, %v4222_v4 }
 0x544   : > { %v2705_v59 = vadd.f32 %v2697_v36, %v2653_v39  ;;  %v2706_v41 = vadd.f32 %v2698_v38, %v2654_v9  ;;  %v2667_v24 = vpop.permute.xlu0 %2666  ;;  %v5585_v53 = vadd.f32 %v2723_v22, %v2703_v30  ;;  %v5587_v43 = vadd.f32 %v2724_v33, %v2704_v18  ;;  %v2739_v38 = vld [vmem:[#allocation8 + $0x5] ss:$8 sm:$0x3] }
 0x545   : > { %v2605_v22 = vmul.f32 %v2592_v31, %v5539_v44  ;;  %v2606_v33 = vmul.f32 %v2596_v50, %v5535_v28  ;;  %v2772_v17 = vrot.slane %v2739_v38, %v4222_v4 }
 0x546   : > { %v2673_v61 = vpop.permute.xlu1 %2672  ;;  %v5595_v42 = vadd.f32 %v2725_v51, %v2705_v59  ;;  %v5597_v32 = vadd.f32 %v2726_v46, %v2706_v41  ;;  %v2768_v46 = vrot.slane %v2739_v38, %v4217_v3  ;;  %v2843_v59 = vld [vmem:[#allocation8 + $0x7] ss:$8 sm:$0x3] }
 0x547   : > { %v2678_v19 = vsel %vm773_vm12, %v2665_v29, %v2673_v61  ;;  %v2682_v6 = vsel %vm773_vm12, %v2673_v61, %v2665_v29  ;;  %v2657_v35 = vadd.f32 %v2649_v20, %v2605_v22  ;;  %v2658_v39 = vadd.f32 %v2650_v60, %v2606_v33 }
 0x548   : > { %v2699_v40 = vmul.f32 %v2688_v26, %v2682_v6  ;;  %v2700_v0 = vmul.f32 %v2692_v49, %v2678_v19  ;;  %v2675_v25 = vpop.permute.xlu0 %2674  ;;  %v2820_v60 = vrot.slane %v2791_v57, %v4217_v3  ;;  %v5634_v61 = vrot.slane %v2843_v59, %v4217_v3 }
 0x549   : > { %v2679_v9 = vsel %vm773_vm12, %v2667_v24, %v2675_v25  ;;  %v2683_v44 = vsel %vm773_vm12, %v2675_v25, %v2667_v24 }
 0x54a   : > { %v2707_v28 = vadd.f32 %v2699_v40, %v2655_v47  ;;  %v2708_v31 = vadd.f32 %v2700_v0, %v2656_v16  ;;  %v2701_v50 = vmul.f32 %v2688_v26, %v2683_v44  ;;  %v2702_v45 = vmul.f32 %v2692_v49, %v2679_v9 }
 0x54b   : > { %v5649_v9 = vrot.slane %v2843_v59, %v4222_v4  ;;  %v5651_v44 = vstv %s3589_s26 }
 0x54c   : > { %v2709_v48 = vadd.f32 %v2701_v50, %v2657_v35  ;;  %v2710_v56 = vadd.f32 %v2702_v45, %v2658_v39  ;;  %v5613_v21 = vadd.f32 %v2727_v2, %v2707_v28  ;;  %v5615_v8 = vadd.f32 %v2728_v5, %v2708_v31 }
 0x54e   : > { %v5617_v27 = vadd.f32 %v2729_v37, %v2709_v48  ;;  %v5619_v1 = vadd.f32 %v2730_v12, %v2710_v56 }
 0x55a   : > { %v2741_v52 = vpop.permute.xlu1 %2740 }
 0x55c   : > { %v2743_v58 = vpop.permute.xlu0 %2742 }
 0x55e   : > { %v2749_v26 = vpop.permute.xlu1 %2748 }
 0x55f   : > { %v2756_v41 = vsel %vm5988_vm1, %v2741_v52, %v2749_v26  ;;  %v2760_v24 = vsel %vm5989_vm7, %v2749_v26, %v2741_v52  ;;  %vm5997_vm7 = vmmov %vm5988_vm1 }
 0x560   : > { %v2751_v49 = vpop.permute.xlu0 %2750  ;;  %v2775_v22 = vmul.f32 %v2768_v46, %v2756_v41  ;;  %v2776_v33 = vmul.f32 %v2772_v17, %v2760_v24 }
 0x561   : > { %v2757_v5 = vsel %vm5990_vm10, %v2743_v58, %v2751_v49  ;;  %v2761_v20 = vsel %vm5991_vm2, %v2751_v49, %v2743_v58  ;;  %vm5998_vm10 = vmmov %vm5988_vm1 }
 0x562   : > { %v2745_v30 = vpop.permute.xlu1 %2744  ;;  %v2777_v47 = vmul.f32 %v2768_v46, %v2757_v5  ;;  %v2778_v16 = vmul.f32 %v2772_v17, %v2761_v20  ;;  %v2783_v12 = vadd.f32 %v2775_v22, %v5585_v53  ;;  %v2784_v48 = vadd.f32 %v2776_v33, %v5587_v43  ;;  %vm5999_vm2 = vmmov %vm5993_vm8 }
 0x564   : > { %v2747_v18 = vpop.permute.xlu0 %2746  ;;  %v2785_v58 = vadd.f32 %v2777_v47, %v5595_v42  ;;  %v2786_v26 = vadd.f32 %v2778_v16, %v5597_v32 }
 0x566   : > { %v2753_v11 = vpop.permute.xlu1 %2752 }
 0x567   : > { %v2758_v35 = vsel %vm5996_vm13, %v2745_v30, %v2753_v11  ;;  %v2762_v39 = vsel %vm5988_vm1, %v2753_v11, %v2745_v30 }
 0x568   : > { %v2755_v7 = vpop.permute.xlu0 %2754  ;;  %v2779_v49 = vmul.f32 %v2768_v46, %v2758_v35  ;;  %v2780_v30 = vmul.f32 %v2772_v17, %v2762_v39 }
 0x569   : > { %v2759_v28 = vsel %vm5997_vm7, %v2747_v18, %v2755_v7  ;;  %v2763_v31 = vsel %vm5998_vm10, %v2755_v7, %v2747_v18 }
 0x56a   : > { %v2793_v36 = vpop.permute.xlu1 %2792  ;;  %v2787_v16 = vadd.f32 %v2779_v49, %v5613_v21 }
 0x56c   : > { %v2795_v34 = vpop.permute.xlu0 %2794 }
 0x56e   : > { %v2801_v63 = vpop.permute.xlu1 %2800 }
 0x56f   : > { %v2808_v19 = vsel %vm5992_vm9, %v2793_v36, %v2801_v63  ;;  %v2812_v6 = vsel %vm5993_vm8, %v2801_v63, %v2793_v36  ;;  %v2781_v36 = vmul.f32 %v2768_v46, %v2759_v28  ;;  %vm6000_vm9 = vmmov %vm5999_vm2 }
 0x570   : > { %v2803_v29 = vpop.permute.xlu0 %2802  ;;  %v2827_v50 = vmul.f32 %v2820_v60, %v2808_v19  ;;  %v2828_v45 = vmul.f32 %v2824_v14, %v2812_v6  ;;  %vm6001_vm8 = vmmov %vm5999_vm2 }
 0x571   : > { %v2809_v40 = vsel %vm5994_vm15, %v2795_v34, %v2803_v29  ;;  %v2813_v0 = vsel %vm5995_vm14, %v2803_v29, %v2795_v34  ;;  %v2782_v34 = vmul.f32 %v2772_v17, %v2763_v31  ;;  %vm6002_vm15 = vmmov %vm5999_vm2  ;;  %vm6003_vm14 = vcmp.lt.s32.totalorder %v4247_v13, 125 }
 0x572   : > { %v2797_v51 = vpop.permute.xlu1 %2796  ;;  %v2829_v56 = vmul.f32 %v2820_v60, %v2809_v40  ;;  %v2830_v52 = vmul.f32 %v2824_v14, %v2813_v0  ;;  %v2835_v53 = vadd.f32 %v2827_v50, %v2783_v12  ;;  %v2836_v63 = vadd.f32 %v2828_v45, %v2784_v48  ;;  %vm6004_vm13 = vmmov %vm6003_vm14 }
 0x573   : > { %vm6005_vm1 = vmmov %vm6004_vm13  ;;  %v2788_v40 = vadd.f32 %v2780_v30, %v5615_v8 }
 0x574   : > { %v2799_v2 = vpop.permute.xlu0 %2798  ;;  %v2837_v38 = vadd.f32 %v2829_v56, %v2785_v58  ;;  %v2838_v29 = vadd.f32 %v2830_v52, %v2786_v26  ;;  %vm6006_vm7 = vmmov %vm6005_vm1 }
 0x575   : > { %vm6007_vm10 = vmmov %vm6005_vm1 }
 0x576   : > { %v2805_v10 = vpop.permute.xlu1 %2804 }
 0x577   : > { %v2810_v18 = vsel %vm5999_vm2, %v2797_v51, %v2805_v10  ;;  %v2814_v7 = vsel %vm6000_vm9, %v2805_v10, %v2797_v51  ;;  %vm6008_vm2 = vmmov %vm6005_vm1 }
 0x578   : > { %v2807_v25 = vpop.permute.xlu0 %2806  ;;  %v2831_v57 = vmul.f32 %v2820_v60, %v2810_v18  ;;  %v2832_v59 = vmul.f32 %v2824_v14, %v2814_v7 }
 0x579   : > { %v2811_v43 = vsel %vm6001_vm8, %v2799_v2, %v2807_v25  ;;  %v2815_v42 = vsel %vm6002_vm15, %v2807_v25, %v2799_v2 }
 0x57a   : > { %v2845_v37 = vpop.permute.xlu1 %2844  ;;  %v2833_v5 = vmul.f32 %v2820_v60, %v2811_v43  ;;  %v2834_v20 = vmul.f32 %v2824_v14, %v2815_v42  ;;  %v2789_v60 = vadd.f32 %v2781_v36, %v5617_v27  ;;  %v2790_v14 = vadd.f32 %v2782_v34, %v5619_v1 }
 0x57b   : > { %v2839_v31 = vadd.f32 %v2831_v57, %v2787_v16  ;;  %v2840_v50 = vadd.f32 %v2832_v59, %v2788_v40 }
 0x57c   : > { %v2847_v11 = vpop.permute.xlu0 %2846  ;;  %v2841_v45 = vadd.f32 %v2833_v5, %v2789_v60 }
 0x57e   : > { %v2853_v32 = vpop.permute.xlu1 %2852 }
 0x57f   : > { %v2860_v46 = vsel %vm6003_vm14, %v2845_v37, %v2853_v32  ;;  %v2864_v17 = vsel %vm6004_vm13, %v2853_v32, %v2845_v37  ;;  %v2842_v37 = vadd.f32 %v2834_v20, %v2790_v14  ;;  %vm6009_vm14 = vmmov %vm6005_vm1 }
 0x580   : > { %v2879_v51 = vmul.f32 %v5634_v61, %v2860_v46  ;;  %v2880_v41 = vmul.f32 %v5649_v9, %v2864_v17  ;;  %v2855_v24 = vpop.permute.xlu0 %2854  ;;  %vm6010_vm13 = vmmov %vm6005_vm1 }
 0x581   : > { %v2861_v2 = vsel %vm6005_vm1, %v2847_v11, %v2855_v24  ;;  %v2865_v10 = vsel %vm6006_vm7, %v2855_v24, %v2847_v11 }
 0x582   : > { %v2887_v22 = vadd.f32 %v2879_v51, %v2835_v53  ;;  %v2888_v33 = vadd.f32 %v2880_v41, %v2836_v63  ;;  %v2881_v19 = vmul.f32 %v5634_v61, %v2861_v2  ;;  %v2882_v6 = vmul.f32 %v5649_v9, %v2865_v10  ;;  %v2849_v47 = vpop.permute.xlu1 %2848 }
 0x584   : > { %v2919_v0 = vadd.f32 %v5499_v62, %v2887_v22  ;;  %v2920_v25 = vadd.f32 %v5499_v62, %v2888_v33  ;;  %v2889_v35 = vadd.f32 %v2881_v19, %v2837_v38  ;;  %v2890_v39 = vadd.f32 %v2882_v6, %v2838_v29  ;;  %v2851_v28 = vpop.permute.xlu0 %2850 }
 0x585   : > { %v3028_v33 = vstv %s3592_s19 }
 0x586   : > { %v2937_v12 = vmul.f32 %v5651_v44, %v2919_v0  ;;  %v2921_v21 = vadd.f32 %v5502_v23, %v2889_v35  ;;  %v2922_v8 = vadd.f32 %v5502_v23, %v2890_v39  ;;  %v2857_v27 = vpop.permute.xlu1 %2856  ;;  %vm2929_vm9 = vcmp.ge.f32.partialorder %v2920_v25, 0.0 }
 0x587   : > { %v2862_v1 = vsel %vm6007_vm10, %v2849_v47, %v2857_v27  ;;  %v2866_v62 = vsel %vm6008_vm2, %v2857_v27, %v2849_v47  ;;  %v2938_v48 = vmul.f32 %v5651_v44, %v2920_v25  ;;  %vm2928_vm15 = vcmp.ge.f32.partialorder %v2919_v0, 0.0  ;;  %v3595_v47 = vld [vmem:[%s5897_s2 + $0x4] ss:$8 sm:$0x3] }
 0x588   : > { %v2883_v56 = vmul.f32 %v5634_v61, %v2862_v1  ;;  %v2884_v52 = vmul.f32 %v5649_v9, %v2866_v62  ;;  %v2859_v58 = vpop.permute.xlu0 %2858  ;;  %vm2931_vm8 = vcmp.ge.f32.partialorder %v2922_v8, 0.0  ;;  %v2939_v26 = vmul.f32 %v5651_v44, %v2921_v21 }
 0x589   : > { %v2863_v23 = vsel %vm6009_vm14, %v2851_v28, %v2859_v58  ;;  %v2867_v49 = vsel %vm6010_vm13, %v2859_v58, %v2851_v28  ;;  %v2940_v30 = vmul.f32 %v5651_v44, %v2922_v8  ;;  %v2946_v7 = vsel %vm2929_vm9, %v2920_v25, %v2938_v48 }
 0x58a   : > { %v2891_v11 = vadd.f32 %v2883_v56, %v2839_v31  ;;  %v2892_v36 = vadd.f32 %v2884_v52, %v2840_v50  ;;  %v2885_v34 = vmul.f32 %v5634_v61, %v2863_v23  ;;  %v2886_v18 = vmul.f32 %v5649_v9, %v2867_v49 }
 0x58b   : > { %v2948_v53 = vsel %vm2931_vm8, %v2922_v8, %v2940_v30  ;;  %vm2930_vm1 = vcmp.ge.f32.partialorder %v2921_v21, 0.0  ;;  %v2945_v29 = vsel %vm2928_vm15, %v2919_v0, %v2937_v12  ;;  %vm2976_vm8 = vcmask 261120   ;;  %v3593_v30 = vld [vmem:[%s5897_s2 + $0x2] ss:$8 sm:$0x3] }
 0x58c   : > { %v2923_v63 = vadd.f32 %v5509_v15, %v2891_v11  ;;  %v2924_v43 = vadd.f32 %v5509_v15, %v2892_v36  ;;  %v2893_v42 = vadd.f32 %v2885_v34, %v2841_v45  ;;  %v2894_v32 = vadd.f32 %v2886_v18, %v2842_v37 }
 0x58d   : > { %v2956_v38 = vpack.c.bf16 %v2948_v53, %v2946_v7  ;;  %v2947_v46 = vsel %vm2930_vm1, %v2921_v21, %v2939_v26  ;;  %v3106_v39 = vrot.slane %v3595_v47, %v4217_v3  ;;  %v3110_v50 = vrot.slane %v3595_v47, %v4222_v4  ;;  %v3594_v7 = vld [vmem:[%s5897_s2 + $0x3] ss:$8 sm:$0x3] }
 0x58e   : > { %v2941_v17 = vmul.f32 %v5651_v44, %v2923_v63  ;;  %v2925_v57 = vadd.f32 %v5515_v55, %v2893_v42  ;;  %v2926_v61 = vadd.f32 %v5515_v55, %v2894_v32  ;;  %v2955_v9 = vpack.c.bf16 %v2947_v46, %v2945_v29  ;;  %v3865_v55 = vld [vmem:[%s5903_s8] sm:$0xff]  }
 0x58f   : > { %2980 = vmatprep.subr.bf16.mxu0 %v2956_v38  ;;  %vm2933_vm7 = vcmp.ge.f32.partialorder %v2924_v43, 0.0  ;;  %v2942_v59 = vmul.f32 %v5651_v44, %v2924_v43  ;;  %vm2932_vm10 = vcmp.ge.f32.partialorder %v2923_v63, 0.0  ;;  %v3054_v36 = vrot.slane %v3593_v30, %v4217_v3 }
 0x590   : > { %v2943_v15 = vmul.f32 %v5651_v44, %v2925_v57  ;;  %2981 = vmatpush1.bf16.msra.mxu0 %v2955_v9  ;;  %vm2935_vm2 = vcmp.ge.f32.partialorder %v2926_v61, 0.0  ;;  %v2944_v51 = vmul.f32 %v5651_v44, %v2926_v61  ;;  %vm2934_vm9 = vcmp.ge.f32.partialorder %v2925_v57, 0.0 }
 0x591   : > { %v2950_v41 = vsel %vm2933_vm7, %v2924_v43, %v2942_v59  ;;  %v2949_v5 = vsel %vm2932_vm10, %v2923_v63, %v2941_v17  ;;  %v3058_v34 = vrot.slane %v3593_v30, %v4222_v4  ;;  %v3086_v38 = vrot.slane %v3594_v7, %v4217_v3 }
 0x592   : > { %v2952_v24 = vsel %vm2935_vm2, %v2926_v61, %v2944_v51  ;;  %v2951_v20 = vsel %vm2934_vm9, %v2925_v57, %v2943_v15  ;;  %v3090_v29 = vrot.slane %v3594_v7, %v4222_v4 }
 0x593   : > { %v2958_v2 = vpack.c.bf16 %v2952_v24, %v2950_v41  ;;  %v2957_v10 = vpack.c.bf16 %v2951_v20, %v2949_v5 }
 0x595   : > { %2982 = vmatprep.subr.bf16.mxu0 %v2958_v2 }
 0x596   : > { %2983 = vmatpush1.bf16.msra.mxu0 %v2957_v10 }
 0x597   : > { %v2964_v22 = vpop.permute.xlu1 %2963 }
 0x599   : > { %3591 = vmatmul.mubr.msk.bf16.vlgmr.msra.gmra.mrb[60].mxu0 %vm2976_vm8, %v3865_v55  ;;  %v2969_v16 = vpop.permute.xlu0 %2968 }
 0x59a   : > { %3232 = vmatprep.mubr.bf16.mxu0 %v5981_v54 }
 0x66c   : > { %v3014_v44 = vpop.f32.mrb[60].mxu0 }
 0x66d   : > { %v3015_v19 = vadd.f32 %v3014_v44, %v2964_v22  ;;  %v3016_v6 = vpop.f32.mrb[61].mxu0 }
 0x66e   : > { %v3017_v40 = vadd.f32 %v3016_v6, %v2964_v22  ;;  %v3018_v60 = vpop.f32.mrb[62].mxu0 }
 0x66f   : > { %vm3024_vm15 = vcmp.ge.f32.partialorder %v3015_v19, 0.0  ;;  %v3029_v14 = vmul.f32 %v3028_v33, %v3015_v19  ;;  %v3019_v0 = vadd.f32 %v3018_v60, %v2969_v16  ;;  %v3020_v25 = vpop.f32.mrb[63].mxu0 }
 0x670   : > { %vm3025_vm14 = vcmp.ge.f32.partialorder %v3017_v40, 0.0  ;;  %v3030_v35 = vmul.f32 %v3028_v33, %v3017_v40  ;;  %v3021_v54 = vadd.f32 %v3020_v25, %v2969_v16 }
 0x671   : > { %v3033_v28 = vsel %vm3024_vm15, %v3015_v19, %v3029_v14  ;;  %vm3026_vm13 = vcmp.ge.f32.partialorder %v3019_v0, 0.0  ;;  %v3031_v31 = vmul.f32 %v3028_v33, %v3019_v0  ;;  %v3597_v14 = vld [vmem:[%s5897_s2 + $0x6] ss:$8 sm:$0x3] }
 0x672   : > { %v3034_v45 = vsel %vm3025_vm14, %v3017_v40, %v3030_v35  ;;  %vm3027_vm1 = vcmp.ge.f32.partialorder %v3021_v54, 0.0  ;;  %v3032_v37 = vmul.f32 %v3028_v33, %v3021_v54  ;;  %3038 = vrot.lane.b32.xlu1 %v3033_v28, %s4016_s29  ;;  %v5725_v8 = vmul.f32 %v3106_v39, %v3033_v28  ;;  %v3596_v33 = vld [vmem:[%s5897_s2 + $0x5] ss:$8 sm:$0x3] }
 0x673   : > { %v3035_v12 = vsel %vm3026_vm13, %v3019_v0, %v3031_v31  ;;  %v5729_v1 = vmul.f32 %v3110_v50, %v3034_v45  ;;  %v3138_v16 = vrot.slane %v3596_v33, %v4217_v3  ;;  %v3142_v40 = vrot.slane %v3596_v33, %v4222_v4  ;;  %v3241_v33 = vld [vmem:[#allocation8 + $0x2] ss:$8 sm:$0x3] }
 0x674   : > { %v3036_v21 = vsel %vm3027_vm1, %v3021_v54, %v3032_v37  ;;  %3040 = vrot.lane.b32.xlu0 %v3035_v12, %s4016_s29  ;;  %v5727_v27 = vmul.f32 %v3106_v39, %v3035_v12  ;;  %v3174_v31 = vrot.slane %v3597_v14, %v4222_v4 }
 0x675   : > { %v5731_v62 = vmul.f32 %v3110_v50, %v3036_v21 }
 0x676   : > { %3070 = vrot.lane.b32.xlu1 %v3033_v28, %s4017_s15  ;;  %v3117_v48 = vpack.c.bf16 %v5727_v27, %v5725_v8  ;;  %v3185_v8 = vld [vmem:[%s5905_s10] sm:$0xf] }
 0x677   : > { %v3118_v56 = vpack.c.bf16 %v5731_v62, %v5729_v1 }
 0x678   : > { %3072 = vrot.lane.b32.xlu0 %v3035_v12, %s4017_s15 }
 0x67a   : > { %3122 = vrot.lane.b32.xlu1 %v3033_v28, %s4018_s18 }
 0x67c   : > { %3124 = vrot.lane.b32.xlu0 %v3035_v12, %s4018_s18 }
 0x67e   : > { %3042 = vrot.lane.b32.xlu1 %v3034_v45, %s4016_s29 }
 0x680   : > { %3044 = vrot.lane.b32.xlu0 %v3036_v21, %s4016_s29 }
 0x682   : > { %3074 = vrot.lane.b32.xlu1 %v3034_v45, %s4017_s15 }
 0x684   : > { %3076 = vrot.lane.b32.xlu0 %v3036_v21, %s4017_s15 }
 0x686   : > { %3154 = vrot.lane.b32.xlu1 %v3033_v28, %s4019_s16  ;;  %v3170_v28 = vrot.slane %v3597_v14, %v4217_v3  ;;  %v3300_v14 = vld [vmem:[#allocation8 + $0x4] ss:$8 sm:$0x3] }
 0x688   : > { %3156 = vrot.lane.b32.xlu0 %v3035_v12, %s4019_s16 }
 0x68a   : > { %3126 = vrot.lane.b32.xlu1 %v3034_v45, %s4018_s18 }
 0x68c   : > { %3128 = vrot.lane.b32.xlu0 %v3036_v21, %s4018_s18 }
 0x68e   : > { %3158 = vrot.lane.b32.xlu1 %v3034_v45, %s4019_s16 }
 0x690   : > { %3160 = vrot.lane.b32.xlu0 %v3036_v21, %s4019_s16 }
 0x6e4   : > { %v3039_v52 = vpop.permute.xlu1 %3038 }
 0x6e6   : > { %v3041_v58 = vpop.permute.xlu0 %3040 }
 0x6e8   : > { %v3071_v26 = vpop.permute.xlu1 %3070 }
 0x6ea   : > { %v3073_v23 = vpop.permute.xlu0 %3072 }
 0x6ec   : > { %v3123_v49 = vpop.permute.xlu1 %3122 }
 0x6ee   : > { %v3125_v11 = vpop.permute.xlu0 %3124 }
 0x6f0   : > { %v3043_v18 = vpop.permute.xlu1 %3042 }
 0x6f1   : > { %v3046_v53 = vsel %vm481_vm3, %v3039_v52, %v3043_v18  ;;  %v3048_v63 = vsel %vm481_vm3, %v3043_v18, %v3039_v52 }
 0x6f2   : > { %v3045_v43 = vpop.permute.xlu0 %3044  ;;  %v3061_v46 = vmul.f32 %v3054_v36, %v3048_v63  ;;  %v3062_v17 = vmul.f32 %v3058_v34, %v3046_v53 }
 0x6f3   : > { %v3047_v42 = vsel %vm481_vm3, %v3041_v58, %v3045_v43  ;;  %v3049_v32 = vsel %vm481_vm3, %v3045_v43, %v3041_v58  ;;  %vm3196_vm3 = vcmask 654336  }
 0x6f4   : > { %v3063_v57 = vmul.f32 %v3054_v36, %v3049_v32  ;;  %v3064_v61 = vmul.f32 %v3058_v34, %v3047_v42  ;;  %v3075_v9 = vpop.permute.xlu1 %3074 }
 0x6f5   : > { %v3078_v59 = vsel %vm512_vm4, %v3071_v26, %v3075_v9  ;;  %v3080_v15 = vsel %vm512_vm4, %v3075_v9, %v3071_v26 }
 0x6f6   : > { %v3065_v51 = vpack.c.bf16 %v3063_v57, %v3061_v46  ;;  %v3077_v41 = vpop.permute.xlu0 %3076  ;;  %v3066_v24 = vpack.c.bf16 %v3064_v61, %v3062_v17  ;;  %v3093_v2 = vmul.f32 %v3086_v38, %v3080_v15  ;;  %v3094_v10 = vmul.f32 %v3090_v29, %v3078_v59  ;;  %v6011_v61 = vld [vmem:[#allocation23_spill] sm:$0xff] }
 0x6f7   : > { %v3079_v5 = vsel %vm512_vm4, %v3073_v23, %v3077_v41  ;;  %v3081_v20 = vsel %vm512_vm4, %v3077_v41, %v3073_v23  ;;  %vm6012_vm4 = vcmp.lt.s32.totalorder %v4247_v13, 127 }
 0x6f8   : > { %v3095_v55 = vmul.f32 %v3086_v38, %v3081_v20  ;;  %v3096_v22 = vmul.f32 %v3090_v29, %v3079_v5  ;;  %v3155_v44 = vpop.permute.xlu1 %3154  ;;  %3200 = vmatprep.subr.bf16.mxu0 %v3066_v24 }
 0x6f9   : > { %3201 = vmatpush1.bf16.msra.mxu0 %v3065_v51 }
 0x6fa   : > { %v3097_v19 = vpack.c.bf16 %v3095_v55, %v3093_v2  ;;  %v3157_v6 = vpop.permute.xlu0 %3156  ;;  %v3098_v47 = vpack.c.bf16 %v3096_v22, %v3094_v10 }
 0x6fc   : > { %v3127_v60 = vpop.permute.xlu1 %3126  ;;  %3202 = vmatprep.subr.bf16.mxu0 %v3098_v47 }
 0x6fd   : > { %v3130_v0 = vsel %vm549_vm5, %v3123_v49, %v3127_v60  ;;  %v3132_v25 = vsel %vm549_vm5, %v3127_v60, %v3123_v49  ;;  %3203 = vmatpush1.bf16.msra.mxu0 %v3097_v19  ;;  %v3267_v19 = vld [vmem:[#allocation8 + $0x3] ss:$8 sm:$0x3] }
 0x6fe   : > { %3204 = vmatprep.subr.bf16.mxu0 %v3118_v56  ;;  %v3129_v35 = vpop.permute.xlu0 %3128  ;;  %v3145_v50 = vmul.f32 %v3138_v16, %v3130_v0  ;;  %v3146_v45 = vmul.f32 %v3142_v40, %v3132_v25 }
 0x6ff   : > { %v3131_v54 = vsel %vm549_vm5, %v3125_v11, %v3129_v35  ;;  %v3133_v39 = vsel %vm549_vm5, %v3129_v35, %v3125_v11  ;;  %vm6013_vm5 = vmmov %vm6012_vm4 }
 0x700   : > { %v3147_v37 = vmul.f32 %v3138_v16, %v3131_v54  ;;  %v3148_v12 = vmul.f32 %v3142_v40, %v3133_v39  ;;  %v3159_v21 = vpop.permute.xlu1 %3158 }
 0x701   : > { %v3162_v1 = vsel %vm580_vm6, %v3155_v44, %v3159_v21  ;;  %v3164_v62 = vsel %vm580_vm6, %v3159_v21, %v3155_v44  ;;  %3205 = vmatpush1.bf16.msra.mxu0 %v3117_v48 }
 0x702   : > { %v3149_v56 = vpack.c.bf16 %v3147_v37, %v3145_v50  ;;  %v3161_v52 = vpop.permute.xlu0 %3160  ;;  %v3150_v3 = vpack.c.bf16 %v3148_v12, %v3146_v45  ;;  %v3177_v26 = vmul.f32 %v3170_v28, %v3162_v1  ;;  %v3178_v23 = vmul.f32 %v3174_v31, %v3164_v62 }
 0x703   : > { %v3163_v4 = vsel %vm580_vm6, %v3157_v6, %v3161_v52  ;;  %v3165_v58 = vsel %vm580_vm6, %v3161_v52, %v3157_v6  ;;  %vm6014_vm6 = vcmp.lt.s32.totalorder %v4247_v13, 126  ;;  %v3351_v52 = vld [vmem:[#allocation8 + $0x6] ss:$8 sm:$0x3] }
 0x704   : > { %v3179_v49 = vmul.f32 %v3170_v28, %v3163_v4  ;;  %v3180_v30 = vmul.f32 %v3174_v31, %v3165_v58  ;;  %3206 = vmatprep.subr.bf16.mxu0 %v3150_v3  ;;  %v3320_v28 = vld [vmem:[#allocation8 + $0x5] ss:$8 sm:$0x3] }
 0x705   : > { %3207 = vmatpush1.bf16.msra.mxu0 %v3149_v56 }
 0x706   : > { %v3181_v11 = vpack.c.bf16 %v3179_v49, %v3177_v26  ;;  %v3182_v36 = vpack.c.bf16 %v3180_v30, %v3178_v23 }
 0x708   : > { %3208 = vmatprep.subr.bf16.mxu0 %v3182_v36 }
 0x709   : > { %3209 = vmatpush1.bf16.msra.mxu0 %v3181_v11 }
 0x70c   : > { %3598 = vmatmul.mubr.msk.bf16.vlgmr.msra.gmra.mrb[64].mxu0 %vm3196_vm3, %v3185_v8 }
 0x7df   : > { %v3234_v27 = vpop.f32.mrb[64].mxu0 }
 0x7e0   : > { %v3236_v48 = vpop.f32.mrb[65].mxu0  ;;  %3242 = vrot.lane.b32.xlu1 %v3234_v27, %s5983_s27  ;;  %v3270_v7 = vrot.slane %v3234_v27, 1  ;;  %v3321_v43 = vrot.slane %v3234_v27, 3  ;;  %v3352_v32 = vrot.slane %v3234_v27, 4 }
 0x7e1   : > { %v3301_v34 = vcombine.low %v3234_v27, %v3236_v48  ;;  %3244 = vrot.lane.b32.xlu0 %v3236_v48, %s5983_s27  ;;  %v3238_v18 = vpop.f32.mrb[66].mxu0  ;;  %v3271_v63 = vrot.slane %v3236_v48, 1  ;;  %v3322_v42 = vrot.slane %v3236_v48, 3  ;;  %v3353_v38 = vrot.slane %v3236_v48, 4  ;;  %s385_s27 = sand.u32 1, %s3998_s0  }
 0x7e2   : > { %v3239_v53 = vpop.f32.mrb[67].mxu0  ;;  %s3387_s16 = scalar_lea.sflag [#allocation10], %s385_s27 }
 0x7e3   : > { %v3308_v9 = vrot.slane %v3301_v34, %v6011_v61 }
 0x7e4   : > { %3274 = vrot.lane.b32.xlu1 %v3270_v7, %s5984_s14 }
 0x7e5   : > { %3276 = vrot.lane.b32.xlu0 %v3271_v63, %s5984_s14  ;;  %v3315_v20 = vrot.slane %v3308_v9, %v6011_v61  ;;  %s3599_s14 = sld [smem:[#allocation7 + $0x3]] }
 0x7e7   : > { %v3316_v16 = vcombine.high %v3315_v20, %v3315_v20 }
 0x7e8   : > { %3325 = vrot.lane.b32.xlu1 %v3321_v43, %s5985_s21 }
 0x7e9   : > { %3327 = vrot.lane.b32.xlu0 %v3322_v42, %s5985_s21  ;;  %v3318_v37 = vmul.f32 %v3316_v16, %v3300_v14  ;;  %s3490_s21 = sshll.u32 %s385_s27, 1 }
 0x7ea   : > { %s387_s20 = scalar_lea.vmem [#allocation13], %s3490_s21 }
 0x7eb   : > { %v3383_v26 = vstv %s3599_s14  ;;  %s3401_s29 = sshll.u32 %s387_s20, 4  ;;  %s5853_s29 = int_to_ptr.vmem [resolvable:$true] %s3401_s29 }
 0x7ec   : > { %3356 = vrot.lane.b32.xlu1 %v3352_v32, %s5986_s30  ;;  %s3934_s26 = scalar_lea.vmem %s5853_s29, 32 }
 0x7ed   : > { %3358 = vrot.lane.b32.xlu0 %v3353_v38, %s5986_s30  ;;  %s3605_s30 = sshll.u32 %s4116_s25, 5  ;;  %p3935_p3 = scmp.ne.s32.totalorder %s5853_s29, %s3934_s26 }
 0x7ee   : > { %s5851_s18 = scalar_lea.hbm %s5906_s11, %s3605_s30  ;;  %s4031_s25 = smov [#allocation13]  }
 0x7ef   : > { %p3936_p7 = pnand %p3935_p3, %p6017_p6  ;;  %s3938_s28 = sshll.u32 %s4031_s25, 4  ;;  %s3939_s28 = int_to_ptr.vmem [resolvable:$false] %s3938_s28 }
 0x7f0   : > { %s3940_s23 = scalar_lea.vmem %s3939_s28, 64  ;;  %p3941_p9 = scmp.lt.s32.totalorder %s5853_s29, %s3939_s28 }
 0x7f1   : > { %p3937_p8 = pneg %p3936_p7  ;;  %p3942_p12 = scmp.lt.s32.totalorder %s3940_s23, %s3934_s26 }
 0x7f3   : > { %p3943_p13 = por %p3942_p12, %p3941_p9 }
 0x7f5   : > { %p3944_p2 = pnand %p3943_p13, %p3937_p8 }
 0x852   : > { %v3243_v29 = vpop.permute.xlu1 %3242 }
 0x853   : > { %v3245_v46 = vpop.permute.xlu0 %3244 }
 0x854   : > { %v3246_v17 = vsel %vm739_vm11, %v3243_v29, %v3245_v46  ;;  %v3247_v57 = vsel %vm739_vm11, %v3245_v46, %v3243_v29  ;;  %vm6015_vm11 = vmmov %vm6014_vm6 }
 0x855   : > { %v3250_v59 = vcombine.low %v3247_v57, %v3246_v17 }
 0x856   : > { %v3275_v15 = vpop.permute.xlu1 %3274 }
 0x857   : > { %v3257_v51 = vrot.slane %v3250_v59, %v6011_v61  ;;  %v3277_v41 = vpop.permute.xlu0 %3276 }
 0x858   : > { %v3278_v24 = vsel %vm773_vm12, %v3275_v15, %v3277_v41  ;;  %v3279_v5 = vsel %vm773_vm12, %v3277_v41, %v3275_v15 }
 0x859   : > { %v3282_v2 = vcombine.low %v3279_v5, %v3278_v24  ;;  %v3264_v55 = vrot.slane %v3257_v51, %v6011_v61 }
 0x85a   : > { %v3326_v10 = vpop.permute.xlu1 %3325 }
 0x85b   : > { %v3289_v22 = vrot.slane %v3282_v2, %v6011_v61  ;;  %v3328_v44 = vpop.permute.xlu0 %3327  ;;  %v3266_v25 = vmul.f32 %v3264_v55, %v3241_v33 }
 0x85c   : > { %v3329_v6 = vsel %vm6012_vm4, %v3326_v10, %v3328_v44  ;;  %v3330_v47 = vsel %vm6013_vm5, %v3328_v44, %v3326_v10 }
 0x85d   : > { %v3296_v40 = vrot.slane %v3289_v22, %v6011_v61  ;;  %v3333_v60 = vcombine.low %v3329_v6, %v3330_v47 }
 0x85e   : > { %v3357_v0 = vpop.permute.xlu1 %3356 }
 0x85f   : > { %v3298_v35 = vmul.f32 %v3296_v40, %v3267_v19  ;;  %v3340_v54 = vrot.slane %v3333_v60, %v6011_v61  ;;  %v3359_v39 = vpop.permute.xlu0 %3358 }
 0x860   : > { %v3360_v31 = vsel %vm6014_vm6, %v3357_v0, %v3359_v39  ;;  %v3361_v50 = vsel %vm6015_vm11, %v3359_v39, %v3357_v0 }
 0x861   : > { %v3299_v45 = vadd.f32 %v3298_v35, %v3266_v25  ;;  %v3347_v12 = vrot.slane %v3340_v54, %v6011_v61  ;;  %v3364_v21 = vcombine.low %v3360_v31, %v3361_v50 }
 0x863   : > { %v3319_v1 = vadd.f32 %v3318_v37, %v3299_v45  ;;  %v3349_v62 = vmul.f32 %v3347_v12, %v3320_v28  ;;  %v3371_v56 = vrot.slane %v3364_v21, %v6011_v61 }
 0x865   : > { %v3378_v3 = vrot.slane %v3371_v56, %v6011_v61  ;;  %v3350_v4 = vadd.f32 %v3349_v62, %v3319_v1 }
 0x867   : > { %v3380_v58 = vmul.f32 %v3378_v3, %v3351_v52 }
 0x869   : > { %v3381_v13 = vadd.f32 %v3380_v58, %v3350_v4 }
 0x86b   : > { %v3384_v23 = vadd.f32 %v3383_v26, %v3381_v13 }
 0x86d   : > { %3385 = vst.msk [vmem:[%s387_s20] sm:$0x3] %vm4228_vm0, %v3384_v23 }
 0x86e   : > { %3947 = shalt.err (!%p3944_p2)
}
 0x86f   : > { %s3948_s19 = scalar_lea.hbm %s5851_s18, 32  ;;  %s3952_s14 = scalar_lea.hbm %s5906_s11, 64 }
 0x870   : > { %p3949_p4 = scmp.ne.s32.totalorder %s5851_s18, %s3948_s19  ;;  %p3953_p11 = scmp.lt.u32.totalorder %s5851_s18, %s5906_s11 }
 0x871   : > { %p3954_p0 = scmp.lt.u32.totalorder %s3952_s14, %s3948_s19  ;;  %p3956_p3 = scmp.lt.u32.totalorder %s3948_s19, %s5851_s18 }
 0x872   : > { %p3950_p10 = pnand %p3949_p4, %p6017_p6 }
 0x873   : > { %p3955_p1 = por %p3954_p0, %p3953_p11 }
 0x874   : > { %p3951_p5 = pneg %p3950_p10 }
 0x875   : > { %p3957_p7 = por %p3956_p3, %p3955_p1 }
 0x877   : > { %p3958_p8 = pnand %p3957_p7, %p3951_p5 }
 0x879   : > { %3961 = shalt.err (!%p3958_p8)
}
 0x87a   : > { %3694 = dma.vmem_to_hbm [thread:$0]  (%p6017_p6), %s5853_s29, 32, %s5851_s18, %s3387_s16  }
 0x87b PF: > { %s6018_s20 = sld [smem:[#allocation21_spill]]  ;;  %p3711_p9 = scmp.ge.s32.totalorder %s4006_s24, 2 }
 0x87c   : > { %s3413_s13 = sand.u32 1, %s3994_s22  }
 0x87d   : > { %s3414_s15 = scalar_lea.sflag [#allocation10], %s3413_s13 }
 0x881   : > { %p6019_p12 = scmp.ne.s32.totalorder %s6018_s20, 0 }
 0x883   : > { %p3704_p13 = pnand %p3711_p9, %p6019_p12 }
 0x885   : > { %3989 = dma.done.wait (!%p3704_p13), %s3414_s15, 32  }
 0x886   : > { %3991 = vsyncadd (!%p3704_p13), %s3414_s15, 4294967264  ;;  %s6020_s24 = sld [smem:[#allocation19_spill]]  ;;  %s6021_s26 = sld [smem:[#allocation18_spill]] }
 0x887   : > { %s6022_s23 = sld [smem:[#allocation20_spill]]  ;;  %s6023_s22 = smov %s3998_s0 }
 0x88c   : > { %p29_p2 = scmp.ge.s32.totalorder %s6020_s24, 4   ;;  %s6024_s0 = smov %s6021_s26 }
 0x88e   :  { %31 = sbr.rel (!%p29_p2) target bundleno = 20 (0x14), region = 128 }
 0x895   :  { %3419 = vsyncpa [#allocation9], 1 }
 0x896   :  { %3421 = vsyncpa [#allocation9 + $0x1], 1 }
 0x897   :  { %3422 = vsyncpa [#allocation12], 1 }
 0x898   :  { %3423 = vsyncpa [#allocation10], 1 }
 0x899   :  { %3425 = vsyncpa [#allocation10 + $0x1], 1 }

</bundles_post_ra>
